<compile_context>
chip_gen: v7x
topology: tpu7x:2x2x1
jax: 0.10.0
libtpu: 0.0.40
codegen_flags: <defaults>
</compile_context>

<pallas_src>
import functools

import jax
import jax.numpy as jnp
from jax.experimental import pallas as pl
from jax.experimental.pallas import tpu as pltpu

LRELU_SLOPE = 0.1
ACT_DTYPE = jnp.bfloat16       # activation / weight storage dtype
SUB = 16                       # L-tiling granularity (bf16-safe sublane mult)
TL_MAX = 8192                  # max rows per L-tile


def get_padding(kernel_size, dilation=1):
    return (kernel_size * dilation - dilation) // 2


def _round_up(v, m):
    return ((v + m - 1) // m) * m


# ----------------------------------------------------------------------------
# Generation-aware VMEM budgets + elementwise dtype selection.
# ----------------------------------------------------------------------------
def _device_kind():
    try:
        return jax.devices()[0].device_kind.lower()
    except Exception:
        return ""


_KIND = _device_kind()


def _vmem_phys_bytes():
    try:
        return int(pltpu.get_tpu_info().vmem_capacity_bytes)
    except Exception:
        pass
    if ("v5" in _KIND) or ("v6" in _KIND):
        return 128 * 1024 * 1024
    return 64 * 1024 * 1024            # v7x-safe default


_VMEM_PHYS = _vmem_phys_bytes()
if _VMEM_PHYS >= 128 * 1024 * 1024:    # v5e / v6e: 128 MiB physical VMEM
    VMEM_LIMIT_BYTES = 80 * 1024 * 1024
    ACT_VMEM_BUDGET = 20 * 1024 * 1024
else:                                  # v7x: 64 MiB per TensorCore
    VMEM_LIMIT_BYTES = 40 * 1024 * 1024
    ACT_VMEM_BUDGET = 10 * 1024 * 1024

# v5e has no bf16 VALU/EUP: keep f32 elementwise there, bf16 on v6e/v7x.
ELEMWISE_F32 = "v5" in _KIND


def _pick_tile(l_out, gran, row_bytes, fixed_bytes, budget):
    """Largest L-tile (multiple of `gran`) fitting the VMEM budget."""
    # Streams that scale with TL get whatever the budget leaves after the
    # resident weight/bias/halo blocks (but always at least budget/4).
    avail = max(budget - fixed_bytes, budget // 4)
    budget_rows = max(gran, avail // max(row_bytes, 1))
    tl = max(gran, (min(budget_rows, TL_MAX) // gran) * gran)
    # Keep several tiles on long sequences (megacore / pipeline overlap), but
    # never shrink below 2048 rows because of it.
    par_cap = _round_up(max(2048, -(-l_out // 8)), gran)
    tl = min(tl, par_cap, _round_up(l_out, gran))
    return max(tl, gran)


# ----------------------------------------------------------------------------
# Pallas kernel: one (batch, L-tile) block of a dilated 1-D conv, with fused
# leaky-relu pre-activation, bias, residual adds and optional tanh.  The full
# conv is ONE MXU contraction of an im2col (TL, K*C_in) LHS.
# ----------------------------------------------------------------------------
def _conv1d_kernel(*refs, K, dilation, n_res, has_halo, lrelu_slope, tanh_out,
                   elemwise_f32):
    o_ref = refs[-1]                  # (1, TL, C_out)
    ins = refs[:-1]
    idx = 0
    x_ref = ins[idx]; idx += 1        # (1, TL, C_in)
    halo_ref = None
    if has_halo:
        halo_ref = ins[idx]; idx += 1  # (1, H, C_in)
    w_ref = ins[idx]; idx += 1        # (K*C_in, C_out)
    b_ref = ins[idx]; idx += 1        # (1, C_out) f32
    res_refs = ins[idx:idx + n_res]   # each (1, TL, C_out)

    tl = o_ref.shape[1]
    wdt = w_ref.dtype

    win = x_ref[0]                                         # (TL, C_in)
    if has_halo:
        win = jnp.concatenate([win, halo_ref[0]], axis=0)  # (TL + H, C_in)

    if lrelu_slope is not None:
        # leaky_relu(0) == 0, so the zero padding rows stay exactly zero.
        if elemwise_f32:
            wf = win.astype(jnp.float32)
            win = jnp.where(wf >= 0.0, wf, lrelu_slope * wf).astype(wdt)
        else:
            wv = win.astype(wdt)
            win = jnp.where(wv >= 0, wv, wv * lrelu_slope)
    else:
        win = win.astype(wdt)

    # im2col: lane-concatenate K shifted windows -> a single deep MXU dot.
    if K == 1:
        lhs = win[:tl, :]
    else:
        taps = [win[k * dilation:k * dilation + tl, :] for k in range(K)]
        lhs = jnp.concatenate(taps, axis=1)                # (TL, K*C_in)

    acc = jnp.dot(lhs, w_ref[...], preferred_element_type=jnp.float32)
    acc = acc + b_ref[...]                                 # (1, C_out) f32
    for r_ref in res_refs:                                 # fused residual adds
        acc = acc + r_ref[0].astype(jnp.float32)
    if tanh_out:
        acc = jnp.tanh(acc)
    o_ref[0] = acc.astype(o_ref.dtype)


def pallas_conv1d(x, w, b, *, dilation=1, pad_left=0, pad_right=0,
                  lrelu_slope=None, tanh_out=False, residuals=(),
                  out_dtype=None):
    """x: (B, L, C_in), w: (K, C_in, C_out), b: (C_out,) -> (B, L_out, C_out)."""
    B, L, C_in = x.shape
    K, _, C_out = w.shape
    halo = dilation * (K - 1)
    L_out = L + pad_left + pad_right - halo
    assert L_out > 0

    out_dtype = out_dtype or x.dtype
    isz_x = jnp.dtype(x.dtype).itemsize
    isz_o = jnp.dtype(out_dtype).itemsize
    isz_w = jnp.dtype(ACT_DTYPE).itemsize

    H = _round_up(halo, SUB) if halo > 0 else 0
    gran = max(SUB, H)
    n_res = len(residuals)

    # VMEM accounting: resident (fixed) bytes + per-L-row streamed bytes.
    fixed = (2 * K * C_in * C_out * isz_w       # weight, double-buffered
             + 2 * H * C_in * isz_x             # halo block, double-buffered
             + 4 * C_out + (1 << 16))           # bias + slack
    row_bytes = (2 * C_in * isz_x               # x main block, double-buffered
                 + 2 * C_out * isz_o            # output block, double-buffered
                 + 2 * n_res * C_out * isz_x    # residual blocks
                 + 2 * K * C_in * isz_w         # im2col LHS + staging
                 + C_in * isz_w                 # activated window
                 + 4 * C_out                    # f32 accumulator
                 + (4 * C_in if ELEMWISE_F32 else 0))
    TL = _pick_tile(L_out, gran, row_bytes, fixed, ACT_VMEM_BUDGET)
    T = -(-L_out // TL)

    # Zero-pad ONCE: pad_left rows in front and enough rows behind so that
    # every main (TL) block and every halo (H) block read is in-bounds.
    x_pad = jnp.pad(x, ((0, 0), (pad_left, T * TL + H - pad_left - L), (0, 0)))

    inputs = [x_pad]
    in_specs = [pl.BlockSpec((1, TL, C_in), lambda bi, ti: (bi, ti, 0))]
    if H > 0:
        hb = TL // H                  # H divides TL by construction
        inputs.append(x_pad)
        in_specs.append(
            pl.BlockSpec((1, H, C_in), lambda bi, ti: (bi, (ti + 1) * hb, 0)))

    inputs.append(w.reshape(K * C_in, C_out))
    in_specs.append(pl.BlockSpec((K * C_in, C_out), lambda bi, ti: (0, 0)))
    inputs.append(b.reshape(1, C_out).astype(jnp.float32))
    in_specs.append(pl.BlockSpec((1, C_out), lambda bi, ti: (0, 0)))
    for r in residuals:
        assert r.shape == (B, L_out, C_out)
        inputs.append(r)
        in_specs.append(pl.BlockSpec((1, TL, C_out), lambda bi, ti: (bi, ti, 0)))

    kernel = functools.partial(
        _conv1d_kernel, K=K, dilation=dilation, n_res=n_res, has_halo=H > 0,
        lrelu_slope=lrelu_slope, tanh_out=tanh_out, elemwise_f32=ELEMWISE_F32)

    return pl.pallas_call(
        kernel,
        out_shape=jax.ShapeDtypeStruct((B, L_out, C_out), out_dtype),
        grid=(B, T),
        in_specs=in_specs,
        out_specs=pl.BlockSpec((1, TL, C_out), lambda bi, ti: (bi, ti, 0)),
        compiler_params=pltpu.CompilerParams(
            dimension_semantics=("parallel", "parallel"),
            vmem_limit_bytes=VMEM_LIMIT_BYTES),
    )(*inputs)


# ----------------------------------------------------------------------------
# ConvTranspose1d -> polyphase regular conv (weight restack done once).
# ----------------------------------------------------------------------------
def _polyphase_weight(w_t, stride, padding):
    """w_t: (C_in, C_out, K) PyTorch ConvTranspose1d weight.

    Returns (w_stack (Kw, C_in, stride*C_out), pad_left, pad_right) such that a
    regular dilation-1 conv over the UN-upsampled input followed by a
    (L, stride, C_out) -> (L*stride, C_out) reshape equals ConvTranspose1d.
    """
    C_in, C_out, K = w_t.shape
    s, p = stride, padding
    # TODO(synk): no fallback path for configs violating stride | (K - 2*pad).
    assert (K - 2 * p) % s == 0, "polyphase path needs stride | (K - 2*padding)"
    Kt = -(-K // s)
    max_a = (s - 1 + p) // s
    Kw = Kt + max_a
    w_pad = jnp.pad(w_t, ((0, 0), (0, 0), (0, Kt * s - K)))
    w_stack = jnp.zeros((Kw, C_in, s * C_out), w_t.dtype)
    for r in range(s):
        rho = (r + p) % s
        a = (r + p) // s
        for t in range(a, a + Kt):
            j = a + Kt - 1 - t
            w_stack = w_stack.at[t, :, r * C_out:(r + 1) * C_out].set(
                w_pad[:, :, j * s + rho])
    pad_left = Kt - 1
    pad_right = (K - 2 * p - s) // s + max_a
    return w_stack, pad_left, pad_right


def pallas_upsample(x, up, *, lrelu_slope):
    B = x.shape[0]
    y = pallas_conv1d(x, up["w"], up["b"], dilation=1,
                      pad_left=up["pad_left"], pad_right=up["pad_right"],
                      lrelu_slope=lrelu_slope)
    # (B, Lq, stride*C_out) -> (B, Lq*stride, C_out): contiguous, free reshape.
    return y.reshape(B, y.shape[1] * up["stride"], up["c_out"])


# ----------------------------------------------------------------------------
# Parameters (synthetic init mirroring the module) + kernel-ready preparation.
# ----------------------------------------------------------------------------
def _conv_param(key, k, c_in, c_out, std=0.01):
    return (jax.random.normal(key, (k, c_in, c_out), jnp.float32) * std,
            jnp.zeros((c_out,), jnp.float32))


def _convT_param(key, k, c_in, c_out, std=0.01):
    return (jax.random.normal(key, (c_in, c_out, k), jnp.float32) * std,
            jnp.zeros((c_out,), jnp.float32))


def init_generator_params(cfg, key):
    keys = iter(jax.random.split(key, 512))
    params = {}
    c0 = cfg["upsample_initial_channel"]
    params["conv_pre"] = _conv_param(next(keys), 7, cfg["model_in_dim"], c0)

    params["ups"] = []
    for i, (u, k) in enumerate(zip(cfg["upsample_rates"],
                                   cfg["upsample_kernel_sizes"])):
        params["ups"].append(
            _convT_param(next(keys), k, c0 // (2 ** i), c0 // (2 ** (i + 1))))

    params["resblocks"] = []
    ch = c0
    for i in range(len(cfg["upsample_rates"])):
        ch = c0 // (2 ** (i + 1))
        for k, d in zip(cfg["resblock_kernel_sizes"],
                        cfg["resblock_dilation_sizes"]):
            convs1 = [_conv_param(next(keys), k, ch, ch) for _ in d]
            convs2 = [_conv_param(next(keys), k, ch, ch) for _ in d]
            params["resblocks"].append(
                {"k": k, "d": tuple(d), "convs1": convs1, "convs2": convs2})

    params["conv_post"] = _conv_param(next(keys), 7, ch, 1)
    return params


def prepare_generator_params(params, cfg):
    """Fold weight layouts (polyphase stacks, bf16 cast, 1/num_kernels)."""
    nk = len(cfg["resblock_kernel_sizes"])
    c0 = cfg["upsample_initial_channel"]
    rp = {}

    w, b = params["conv_pre"]
    rp["conv_pre"] = (w.astype(ACT_DTYPE), b)

    rp["ups"] = []
    for i, (u, k) in enumerate(zip(cfg["upsample_rates"],
                                   cfg["upsample_kernel_sizes"])):
        w_t, bias = params["ups"][i]
        w_stack, padl, padr = _polyphase_weight(w_t, u, (k - u) // 2)
        if i > 0:
            w_stack = w_stack / nk     # fold previous stage's "xs / num_kernels"
        rp["ups"].append({
            "w": w_stack.astype(ACT_DTYPE),
            "b": jnp.tile(bias, u),
            "pad_left": padl, "pad_right": padr,
            "stride": u, "c_out": c0 // (2 ** (i + 1)),
        })

    rp["resblocks"] = []
    for rb in params["resblocks"]:
        rp["resblocks"].append({
            "k": rb["k"], "d": rb["d"],
            "convs1": [(w.astype(ACT_DTYPE), b) for (w, b) in rb["convs1"]],
            "convs2": [(w.astype(ACT_DTYPE), b) for (w, b) in rb["convs2"]],
        })

    w, b = params["conv_post"]
    rp["conv_post"] = ((w / nk).astype(ACT_DTYPE), b)   # fold last "/ nk"
    return rp


# ----------------------------------------------------------------------------
# Forward pass
# ----------------------------------------------------------------------------
def resblock_forward(x, rb, xs_prev):
    """Returns xs_prev + ResBlock(x) with the adds fused into the last conv."""
    k = rb["k"]
    n = len(rb["d"])
    cur = x
    for t, ((w1, b1), (w2, b2), d) in enumerate(
            zip(rb["convs1"], rb["convs2"], rb["d"])):
        p1 = get_padding(k, d)
        xt = pallas_conv1d(cur, w1, b1, dilation=d, pad_left=p1, pad_right=p1,
                           lrelu_slope=LRELU_SLOPE)
        p2 = get_padding(k, 1)
        res = [cur]
        if t == n - 1 and xs_prev is not None:
            res.append(xs_prev)              # fused cross-resblock accumulation
        cur = pallas_conv1d(xt, w2, b2, dilation=1, pad_left=p2, pad_right=p2,
                            lrelu_slope=LRELU_SLOPE, residuals=tuple(res))
    return cur


def generator_forward(x_ncl, rp, cfg):
    """x_ncl: (B, model_in_dim, T) PyTorch layout -> (B, 1, T_out)."""
    nk = len(cfg["resblock_kernel_sizes"])
    nu = len(cfg["upsample_rates"])

    x = jnp.transpose(x_ncl, (0, 2, 1)).astype(ACT_DTYPE)     # -> (B, T, C)

    w, b = rp["conv_pre"]
    x = pallas_conv1d(x, w, b, pad_left=3, pad_right=3)

    for i in range(nu):
        # fused: leaky_relu(x, 0.1) + polyphase ConvTranspose1d
        x = pallas_upsample(x, rp["ups"][i], lrelu_slope=LRELU_SLOPE)
        xs = None
        for j in range(nk):
            xs = resblock_forward(x, rp["resblocks"][i * nk + j], xs)
        x = xs            # "/ num_kernels" folded into the next conv's weights

    w, b = rp["conv_post"]
    # fused: leaky_relu(x) [default 0.01 slope], conv_post, tanh
    x = pallas_conv1d(x, w, b, pad_left=3, pad_right=3,
                      lrelu_slope=0.01, tanh_out=True, out_dtype=jnp.float32)

    # (B, L, 1) -> (B, 1, L): size-1 axis move, free reshape.
    return jnp.transpose(x, (0, 2, 1))


if __name__ == "__main__":
    cfg = {
        "model_in_dim": 16,
        "upsample_initial_channel": 32,
        "upsample_rates": [2, 2],
        "upsample_kernel_sizes": [4, 4],
        "resblock_kernel_sizes": [3, 3],
        "resblock_dilation_sizes": [[1, 3, 5], [1, 3, 5]],
    }

    key = jax.random.PRNGKey(0)
    k_params, k_x = jax.random.split(key)
    params = init_generator_params(cfg, k_params)
    rparams = prepare_generator_params(params, cfg)

    B, C_in, T = 2, cfg["model_in_dim"], 16
    x = jax.random.normal(k_x, (B, C_in, T), jnp.float32)

    fwd = jax.jit(lambda xx: generator_forward(xx, rparams, cfg))
    y = fwd(x)
    jax.block_until_ready(y)

    expected_T = T
    for u in cfg["upsample_rates"]:
        expected_T *= u
    assert y.shape == (B, 1, expected_T), y.shape
    assert bool(jnp.all(jnp.isfinite(y)))
    print("KERNEL_OK")
</pallas_src>

<mosaic_0001>
module attributes {stable_mosaic.version = 11 : i64} {
  func.func @_conv1d_kernel(%arg0: i32, %arg1: i32, %arg2: memref<1x16x16xbf16, #tpu.memory_space<vmem>>, %arg3: memref<1x16x16xbf16, #tpu.memory_space<vmem>>, %arg4: memref<112x32xbf16, #tpu.memory_space<vmem>>, %arg5: memref<1x32xf32, #tpu.memory_space<vmem>>, %arg6: memref<1x16x32xbf16, #tpu.memory_space<vmem>>) attributes {dimension_semantics = [#tpu.dimension_semantics<parallel>, #tpu.dimension_semantics<parallel>], iteration_bounds = array<i64: 2, 1>, scalar_prefetch = 0 : i64, scratch_operands = 0 : i64, tpu.core_type = #tpu.core_type<tc>, window_params = [{transform_indices = @transform_0, window_bounds = array<i64: 1, 16, 16>}, {transform_indices = @transform_1, window_bounds = array<i64: 1, 16, 16>}, {pipeline_mode = #tpu.pipeline_mode<synchronous>, transform_indices = @transform_2, window_bounds = array<i64: 112, 32>}, {pipeline_mode = #tpu.pipeline_mode<synchronous>, transform_indices = @transform_3, window_bounds = array<i64: 1, 32>}, {transform_indices = @transform_4, window_bounds = array<i64: 1, 16, 32>}]} {
    %c0 = arith.constant 0 : index
    %c0_0 = arith.constant 0 : index
    %c0_1 = arith.constant 0 : index
    %0 = vector.load %arg2[%c0, %c0_0, %c0_1] : memref<1x16x16xbf16, #tpu.memory_space<vmem>>, vector<1x16x16xbf16>
    %1 = vector.shape_cast %0 : vector<1x16x16xbf16> to vector<16x16xbf16>
    %c0_2 = arith.constant 0 : index
    %c0_3 = arith.constant 0 : index
    %c0_4 = arith.constant 0 : index
    %2 = vector.load %arg3[%c0_2, %c0_3, %c0_4] : memref<1x16x16xbf16, #tpu.memory_space<vmem>>, vector<1x16x16xbf16>
    %3 = vector.shape_cast %2 : vector<1x16x16xbf16> to vector<16x16xbf16>
    %4 = tpu.concatenate %1, %3 in 0 : vector<16x16xbf16>, vector<16x16xbf16> -> vector<32x16xbf16>
    %5 = vector.extract_strided_slice %4 {offsets = [0, 0], sizes = [16, 16], strides = [1, 1]} : vector<32x16xbf16> to vector<16x16xbf16>
    %6 = vector.extract_strided_slice %4 {offsets = [1, 0], sizes = [16, 16], strides = [1, 1]} : vector<32x16xbf16> to vector<16x16xbf16>
    %7 = vector.extract_strided_slice %4 {offsets = [2, 0], sizes = [16, 16], strides = [1, 1]} : vector<32x16xbf16> to vector<16x16xbf16>
    %8 = vector.extract_strided_slice %4 {offsets = [3, 0], sizes = [16, 16], strides = [1, 1]} : vector<32x16xbf16> to vector<16x16xbf16>
    %9 = vector.extract_strided_slice %4 {offsets = [4, 0], sizes = [16, 16], strides = [1, 1]} : vector<32x16xbf16> to vector<16x16xbf16>
    %10 = vector.extract_strided_slice %4 {offsets = [5, 0], sizes = [16, 16], strides = [1, 1]} : vector<32x16xbf16> to vector<16x16xbf16>
    %11 = vector.extract_strided_slice %4 {offsets = [6, 0], sizes = [16, 16], strides = [1, 1]} : vector<32x16xbf16> to vector<16x16xbf16>
    %12 = tpu.concatenate %5, %6, %7, %8, %9, %10, %11 in 1 : vector<16x16xbf16>, vector<16x16xbf16>, vector<16x16xbf16>, vector<16x16xbf16>, vector<16x16xbf16>, vector<16x16xbf16>, vector<16x16xbf16> -> vector<16x112xbf16>
    %c0_5 = arith.constant 0 : index
    %c0_6 = arith.constant 0 : index
    %13 = vector.load %arg4[%c0_5, %c0_6] : memref<112x32xbf16, #tpu.memory_space<vmem>>, vector<112x32xbf16>
    %cst = arith.constant dense<0.000000e+00> : vector<16x32xf32>
    %14 = tpu.matmul %12, %13, %cst {dimension_numbers = #tpu.dot_dimension_numbers<[1], [0], [0], [1], [0, 0, 1, 1], [], []>} : vector<16x112xbf16>, vector<112x32xbf16>, vector<16x32xf32> -> vector<16x32xf32>
    %c0_7 = arith.constant 0 : index
    %c0_8 = arith.constant 0 : index
    %15 = vector.load %arg5[%c0_7, %c0_8] : memref<1x32xf32, #tpu.memory_space<vmem>>, vector<1x32xf32>
    %16 = vector.broadcast %15 : vector<1x32xf32> to vector<16x32xf32>
    %17 = arith.addf %14, %16 : vector<16x32xf32>
    %18 = arith.truncf %17 : vector<16x32xf32> to vector<16x32xbf16>
    %c0_9 = arith.constant 0 : index
    %c0_10 = arith.constant 0 : index
    %c0_11 = arith.constant 0 : index
    %19 = vector.load %arg6[%c0_9, %c0_10, %c0_11] : memref<1x16x32xbf16, #tpu.memory_space<vmem>>, vector<1x16x32xbf16>
    %20 = vector.shape_cast %19 : vector<1x16x32xbf16> to vector<16x32xbf16>
    %21 = vector.shape_cast %18 : vector<16x32xbf16> to vector<1x16x32xbf16>
    tpu.vector_store %arg6[%c0_9, %c0_10, %c0_11], %21 {strides = array<i32>} : memref<1x16x32xbf16, #tpu.memory_space<vmem>>, vector<1x16x32xbf16>,
    return
  }
  func.func @transform_0(%arg0: i32, %arg1: i32) -> (i32, i32, i32) {
    %c0_i32 = arith.constant 0 : i32
    %c0_i32_0 = arith.constant 0 : i32
    return %arg0, %arg1, %c0_i32 : i32, i32, i32
  }
  func.func @transform_1(%arg0: i32, %arg1: i32) -> (i32, i32, i32) {
    %c1_i32 = arith.constant 1 : i32
    %0 = arith.addi %arg1, %c1_i32 : i32
    %c1_i32_0 = arith.constant 1 : i32
    %1 = arith.muli %0, %c1_i32_0 : i32
    %c0_i32 = arith.constant 0 : i32
    %c0_i32_1 = arith.constant 0 : i32
    return %arg0, %1, %c0_i32 : i32, i32, i32
  }
  func.func @transform_2(%arg0: i32, %arg1: i32) -> (i32, i32) {
    %c0_i32 = arith.constant 0 : i32
    %c0_i32_0 = arith.constant 0 : i32
    %c0_i32_1 = arith.constant 0 : i32
    return %c0_i32, %c0_i32_0 : i32, i32
  }
  func.func @transform_3(%arg0: i32, %arg1: i32) -> (i32, i32) {
    %c0_i32 = arith.constant 0 : i32
    %c0_i32_0 = arith.constant 0 : i32
    %c0_i32_1 = arith.constant 0 : i32
    return %c0_i32, %c0_i32_0 : i32, i32
  }
  func.func @transform_4(%arg0: i32, %arg1: i32) -> (i32, i32, i32) {
    %c0_i32 = arith.constant 0 : i32
    %c0_i32_0 = arith.constant 0 : i32
    return %arg0, %arg1, %c0_i32 : i32, i32, i32
  }
}

module attributes {stable_mosaic.version = 11 : i64} {
  func.func @_conv1d_kernel(%arg0: i32, %arg1: i32, %arg2: memref<1x16x32xbf16, #tpu.memory_space<vmem>>, %arg3: memref<1x16x32xbf16, #tpu.memory_space<vmem>>, %arg4: memref<96x32xbf16, #tpu.memory_space<vmem>>, %arg5: memref<1x32xf32, #tpu.memory_space<vmem>>, %arg6: memref<1x16x32xbf16, #tpu.memory_space<vmem>>) attributes {dimension_semantics = [#tpu.dimension_semantics<parallel>, #tpu.dimension_semantics<parallel>], iteration_bounds = array<i64: 2, 1>, scalar_prefetch = 0 : i64, scratch_operands = 0 : i64, tpu.core_type = #tpu.core_type<tc>, window_params = [{transform_indices = @transform_0, window_bounds = array<i64: 1, 16, 32>}, {transform_indices = @transform_1, window_bounds = array<i64: 1, 16, 32>}, {pipeline_mode = #tpu.pipeline_mode<synchronous>, transform_indices = @transform_2, window_bounds = array<i64: 96, 32>}, {pipeline_mode = #tpu.pipeline_mode<synchronous>, transform_indices = @transform_3, window_bounds = array<i64: 1, 32>}, {transform_indices = @transform_4, window_bounds = array<i64: 1, 16, 32>}]} {
    %c0 = arith.constant 0 : index
    %c0_0 = arith.constant 0 : index
    %c0_1 = arith.constant 0 : index
    %0 = vector.load %arg2[%c0, %c0_0, %c0_1] : memref<1x16x32xbf16, #tpu.memory_space<vmem>>, vector<1x16x32xbf16>
    %1 = vector.shape_cast %0 : vector<1x16x32xbf16> to vector<16x32xbf16>
    %c0_2 = arith.constant 0 : index
    %c0_3 = arith.constant 0 : index
    %c0_4 = arith.constant 0 : index
    %2 = vector.load %arg3[%c0_2, %c0_3, %c0_4] : memref<1x16x32xbf16, #tpu.memory_space<vmem>>, vector<1x16x32xbf16>
    %3 = vector.shape_cast %2 : vector<1x16x32xbf16> to vector<16x32xbf16>
    %4 = tpu.concatenate %1, %3 in 0 : vector<16x32xbf16>, vector<16x32xbf16> -> vector<32x32xbf16>
    %cst = arith.constant 0.000000e+00 : bf16
    %5 = vector.broadcast %cst : bf16 to vector<32x32xbf16>
    %6 = arith.cmpf oge, %4, %5 : vector<32x32xbf16>
    %cst_5 = arith.constant 1.000980e-01 : bf16
    %7 = vector.broadcast %cst_5 : bf16 to vector<32x32xbf16>
    %8 = arith.mulf %4, %7 : vector<32x32xbf16>
    %9 = arith.select %6, %4, %8 : vector<32x32xi1>, vector<32x32xbf16>
    %10 = vector.extract_strided_slice %9 {offsets = [0, 0], sizes = [16, 32], strides = [1, 1]} : vector<32x32xbf16> to vector<16x32xbf16>
    %11 = vector.extract_strided_slice %9 {offsets = [1, 0], sizes = [16, 32], strides = [1, 1]} : vector<32x32xbf16> to vector<16x32xbf16>
    %12 = vector.extract_strided_slice %9 {offsets = [2, 0], sizes = [16, 32], strides = [1, 1]} : vector<32x32xbf16> to vector<16x32xbf16>
    %13 = tpu.concatenate %10, %11, %12 in 1 : vector<16x32xbf16>, vector<16x32xbf16>, vector<16x32xbf16> -> vector<16x96xbf16>
    %c0_6 = arith.constant 0 : index
    %c0_7 = arith.constant 0 : index
    %14 = vector.load %arg4[%c0_6, %c0_7] : memref<96x32xbf16, #tpu.memory_space<vmem>>, vector<96x32xbf16>
    %cst_8 = arith.constant dense<0.000000e+00> : vector<16x32xf32>
    %15 = tpu.matmul %13, %14, %cst_8 {dimension_numbers = #tpu.dot_dimension_numbers<[1], [0], [0], [1], [0, 0, 1, 1], [], []>} : vector<16x96xbf16>, vector<96x32xbf16>, vector<16x32xf32> -> vector<16x32xf32>
    %c0_9 = arith.constant 0 : index
    %c0_10 = arith.constant 0 : index
    %16 = vector.load %arg5[%c0_9, %c0_10] : memref<1x32xf32, #tpu.memory_space<vmem>>, vector<1x32xf32>
    %17 = vector.broadcast %16 : vector<1x32xf32> to vector<16x32xf32>
    %18 = arith.addf %15, %17 : vector<16x32xf32>
    %19 = arith.truncf %18 : vector<16x32xf32> to vector<16x32xbf16>
    %c0_11 = arith.constant 0 : index
    %c0_12 = arith.constant 0 : index
    %c0_13 = arith.constant 0 : index
    %20 = vector.load %arg6[%c0_11, %c0_12, %c0_13] : memref<1x16x32xbf16, #tpu.memory_space<vmem>>, vector<1x16x32xbf16>
    %21 = vector.shape_cast %20 : vector<1x16x32xbf16> to vector<16x32xbf16>
    %22 = vector.shape_cast %19 : vector<16x32xbf16> to vector<1x16x32xbf16>
    tpu.vector_store %arg6[%c0_11, %c0_12, %c0_13], %22 {strides = array<i32>} : memref<1x16x32xbf16, #tpu.memory_space<vmem>>, vector<1x16x32xbf16>,
    return
  }
  func.func @transform_0(%arg0: i32, %arg1: i32) -> (i32, i32, i32) {
    %c0_i32 = arith.constant 0 : i32
    %c0_i32_0 = arith.constant 0 : i32
    return %arg0, %arg1, %c0_i32 : i32, i32, i32
  }
  func.func @transform_1(%arg0: i32, %arg1: i32) -> (i32, i32, i32) {
    %c1_i32 = arith.constant 1 : i32
    %0 = arith.addi %arg1, %c1_i32 : i32
    %c1_i32_0 = arith.constant 1 : i32
    %1 = arith.muli %0, %c1_i32_0 : i32
    %c0_i32 = arith.constant 0 : i32
    %c0_i32_1 = arith.constant 0 : i32
    return %arg0, %1, %c0_i32 : i32, i32, i32
  }
  func.func @transform_2(%arg0: i32, %arg1: i32) -> (i32, i32) {
    %c0_i32 = arith.constant 0 : i32
    %c0_i32_0 = arith.constant 0 : i32
    %c0_i32_1 = arith.constant 0 : i32
    return %c0_i32, %c0_i32_0 : i32, i32
  }
  func.func @transform_3(%arg0: i32, %arg1: i32) -> (i32, i32) {
    %c0_i32 = arith.constant 0 : i32
    %c0_i32_0 = arith.constant 0 : i32
    %c0_i32_1 = arith.constant 0 : i32
    return %c0_i32, %c0_i32_0 : i32, i32
  }
  func.func @transform_4(%arg0: i32, %arg1: i32) -> (i32, i32, i32) {
    %c0_i32 = arith.constant 0 : i32
    %c0_i32_0 = arith.constant 0 : i32
    return %arg0, %arg1, %c0_i32 : i32, i32, i32
  }
}

module attributes {stable_mosaic.version = 11 : i64} {
  func.func @_conv1d_kernel(%arg0: i32, %arg1: i32, %arg2: memref<1x32x16xbf16, #tpu.memory_space<vmem>>, %arg3: memref<1x16x16xbf16, #tpu.memory_space<vmem>>, %arg4: memref<48x16xbf16, #tpu.memory_space<vmem>>, %arg5: memref<1x16xf32, #tpu.memory_space<vmem>>, %arg6: memref<1x32x16xbf16, #tpu.memory_space<vmem>>) attributes {dimension_semantics = [#tpu.dimension_semantics<parallel>, #tpu.dimension_semantics<parallel>], iteration_bounds = array<i64: 2, 1>, scalar_prefetch = 0 : i64, scratch_operands = 0 : i64, tpu.core_type = #tpu.core_type<tc>, window_params = [{transform_indices = @transform_0, window_bounds = array<i64: 1, 32, 16>}, {transform_indices = @transform_1, window_bounds = array<i64: 1, 16, 16>}, {pipeline_mode = #tpu.pipeline_mode<synchronous>, transform_indices = @transform_2, window_bounds = array<i64: 48, 16>}, {pipeline_mode = #tpu.pipeline_mode<synchronous>, transform_indices = @transform_3, window_bounds = array<i64: 1, 16>}, {transform_indices = @transform_4, window_bounds = array<i64: 1, 32, 16>}]} {
    %c0 = arith.constant 0 : index
    %c0_0 = arith.constant 0 : index
    %c0_1 = arith.constant 0 : index
    %0 = vector.load %arg2[%c0, %c0_0, %c0_1] : memref<1x32x16xbf16, #tpu.memory_space<vmem>>, vector<1x32x16xbf16>
    %1 = vector.shape_cast %0 : vector<1x32x16xbf16> to vector<32x16xbf16>
    %c0_2 = arith.constant 0 : index
    %c0_3 = arith.constant 0 : index
    %c0_4 = arith.constant 0 : index
    %2 = vector.load %arg3[%c0_2, %c0_3, %c0_4] : memref<1x16x16xbf16, #tpu.memory_space<vmem>>, vector<1x16x16xbf16>
    %3 = vector.shape_cast %2 : vector<1x16x16xbf16> to vector<16x16xbf16>
    %4 = tpu.concatenate %1, %3 in 0 : vector<32x16xbf16>, vector<16x16xbf16> -> vector<48x16xbf16>
    %cst = arith.constant 0.000000e+00 : bf16
    %5 = vector.broadcast %cst : bf16 to vector<48x16xbf16>
    %6 = arith.cmpf oge, %4, %5 : vector<48x16xbf16>
    %cst_5 = arith.constant 1.000980e-01 : bf16
    %7 = vector.broadcast %cst_5 : bf16 to vector<48x16xbf16>
    %8 = arith.mulf %4, %7 : vector<48x16xbf16>
    %9 = arith.select %6, %4, %8 : vector<48x16xi1>, vector<48x16xbf16>
    %10 = vector.extract_strided_slice %9 {offsets = [0, 0], sizes = [32, 16], strides = [1, 1]} : vector<48x16xbf16> to vector<32x16xbf16>
    %11 = vector.extract_strided_slice %9 {offsets = [1, 0], sizes = [32, 16], strides = [1, 1]} : vector<48x16xbf16> to vector<32x16xbf16>
    %12 = vector.extract_strided_slice %9 {offsets = [2, 0], sizes = [32, 16], strides = [1, 1]} : vector<48x16xbf16> to vector<32x16xbf16>
    %13 = tpu.concatenate %10, %11, %12 in 1 : vector<32x16xbf16>, vector<32x16xbf16>, vector<32x16xbf16> -> vector<32x48xbf16>
    %c0_6 = arith.constant 0 : index
    %c0_7 = arith.constant 0 : index
    %14 = vector.load %arg4[%c0_6, %c0_7] : memref<48x16xbf16, #tpu.memory_space<vmem>>, vector<48x16xbf16>
    %cst_8 = arith.constant dense<0.000000e+00> : vector<32x16xf32>
    %15 = tpu.matmul %13, %14, %cst_8 {dimension_numbers = #tpu.dot_dimension_numbers<[1], [0], [0], [1], [0, 0, 1, 1], [], []>} : vector<32x48xbf16>, vector<48x16xbf16>, vector<32x16xf32> -> vector<32x16xf32>
    %c0_9 = arith.constant 0 : index
    %c0_10 = arith.constant 0 : index
    %16 = vector.load %arg5[%c0_9, %c0_10] : memref<1x16xf32, #tpu.memory_space<vmem>>, vector<1x16xf32>
    %17 = vector.broadcast %16 : vector<1x16xf32> to vector<32x16xf32>
    %18 = arith.addf %15, %17 : vector<32x16xf32>
    %19 = arith.truncf %18 : vector<32x16xf32> to vector<32x16xbf16>
    %c0_11 = arith.constant 0 : index
    %c0_12 = arith.constant 0 : index
    %c0_13 = arith.constant 0 : index
    %20 = vector.load %arg6[%c0_11, %c0_12, %c0_13] : memref<1x32x16xbf16, #tpu.memory_space<vmem>>, vector<1x32x16xbf16>
    %21 = vector.shape_cast %20 : vector<1x32x16xbf16> to vector<32x16xbf16>
    %22 = vector.shape_cast %19 : vector<32x16xbf16> to vector<1x32x16xbf16>
    tpu.vector_store %arg6[%c0_11, %c0_12, %c0_13], %22 {strides = array<i32>} : memref<1x32x16xbf16, #tpu.memory_space<vmem>>, vector<1x32x16xbf16>,
    return
  }
  func.func @transform_0(%arg0: i32, %arg1: i32) -> (i32, i32, i32) {
    %c0_i32 = arith.constant 0 : i32
    %c0_i32_0 = arith.constant 0 : i32
    return %arg0, %arg1, %c0_i32 : i32, i32, i32
  }
  func.func @transform_1(%arg0: i32, %arg1: i32) -> (i32, i32, i32) {
    %c1_i32 = arith.constant 1 : i32
    %0 = arith.addi %arg1, %c1_i32 : i32
    %c2_i32 = arith.constant 2 : i32
    %1 = arith.muli %0, %c2_i32 : i32
    %c0_i32 = arith.constant 0 : i32
    %c0_i32_0 = arith.constant 0 : i32
    return %arg0, %1, %c0_i32 : i32, i32, i32
  }
  func.func @transform_2(%arg0: i32, %arg1: i32) -> (i32, i32) {
    %c0_i32 = arith.constant 0 : i32
    %c0_i32_0 = arith.constant 0 : i32
    %c0_i32_1 = arith.constant 0 : i32
    return %c0_i32, %c0_i32_0 : i32, i32
  }
  func.func @transform_3(%arg0: i32, %arg1: i32) -> (i32, i32) {
    %c0_i32 = arith.constant 0 : i32
    %c0_i32_0 = arith.constant 0 : i32
    %c0_i32_1 = arith.constant 0 : i32
    return %c0_i32, %c0_i32_0 : i32, i32
  }
  func.func @transform_4(%arg0: i32, %arg1: i32) -> (i32, i32, i32) {
    %c0_i32 = arith.constant 0 : i32
    %c0_i32_0 = arith.constant 0 : i32
    return %arg0, %arg1, %c0_i32 : i32, i32, i32
  }
}

module attributes {stable_mosaic.version = 11 : i64} {
  func.func @_conv1d_kernel(%arg0: i32, %arg1: i32, %arg2: memref<1x32x16xbf16, #tpu.memory_space<vmem>>, %arg3: memref<1x16x16xbf16, #tpu.memory_space<vmem>>, %arg4: memref<48x16xbf16, #tpu.memory_space<vmem>>, %arg5: memref<1x16xf32, #tpu.memory_space<vmem>>, %arg6: memref<1x32x16xbf16, #tpu.memory_space<vmem>>, %arg7: memref<1x32x16xbf16, #tpu.memory_space<vmem>>) attributes {dimension_semantics = [#tpu.dimension_semantics<parallel>, #tpu.dimension_semantics<parallel>], iteration_bounds = array<i64: 2, 1>, scalar_prefetch = 0 : i64, scratch_operands = 0 : i64, tpu.core_type = #tpu.core_type<tc>, window_params = [{transform_indices = @transform_0, window_bounds = array<i64: 1, 32, 16>}, {transform_indices = @transform_1, window_bounds = array<i64: 1, 16, 16>}, {pipeline_mode = #tpu.pipeline_mode<synchronous>, transform_indices = @transform_2, window_bounds = array<i64: 48, 16>}, {pipeline_mode = #tpu.pipeline_mode<synchronous>, transform_indices = @transform_3, window_bounds = array<i64: 1, 16>}, {transform_indices = @transform_4, window_bounds = array<i64: 1, 32, 16>}, {transform_indices = @transform_5, window_bounds = array<i64: 1, 32, 16>}]} {
    %c0 = arith.constant 0 : index
    %c0_0 = arith.constant 0 : index
    %c0_1 = arith.constant 0 : index
    %0 = vector.load %arg2[%c0, %c0_0, %c0_1] : memref<1x32x16xbf16, #tpu.memory_space<vmem>>, vector<1x32x16xbf16>
    %1 = vector.shape_cast %0 : vector<1x32x16xbf16> to vector<32x16xbf16>
    %c0_2 = arith.constant 0 : index
    %c0_3 = arith.constant 0 : index
    %c0_4 = arith.constant 0 : index
    %2 = vector.load %arg3[%c0_2, %c0_3, %c0_4] : memref<1x16x16xbf16, #tpu.memory_space<vmem>>, vector<1x16x16xbf16>
    %3 = vector.shape_cast %2 : vector<1x16x16xbf16> to vector<16x16xbf16>
    %4 = tpu.concatenate %1, %3 in 0 : vector<32x16xbf16>, vector<16x16xbf16> -> vector<48x16xbf16>
    %cst = arith.constant 0.000000e+00 : bf16
    %5 = vector.broadcast %cst : bf16 to vector<48x16xbf16>
    %6 = arith.cmpf oge, %4, %5 : vector<48x16xbf16>
    %cst_5 = arith.constant 1.000980e-01 : bf16
    %7 = vector.broadcast %cst_5 : bf16 to vector<48x16xbf16>
    %8 = arith.mulf %4, %7 : vector<48x16xbf16>
    %9 = arith.select %6, %4, %8 : vector<48x16xi1>, vector<48x16xbf16>
    %10 = vector.extract_strided_slice %9 {offsets = [0, 0], sizes = [32, 16], strides = [1, 1]} : vector<48x16xbf16> to vector<32x16xbf16>
    %11 = vector.extract_strided_slice %9 {offsets = [1, 0], sizes = [32, 16], strides = [1, 1]} : vector<48x16xbf16> to vector<32x16xbf16>
    %12 = vector.extract_strided_slice %9 {offsets = [2, 0], sizes = [32, 16], strides = [1, 1]} : vector<48x16xbf16> to vector<32x16xbf16>
    %13 = tpu.concatenate %10, %11, %12 in 1 : vector<32x16xbf16>, vector<32x16xbf16>, vector<32x16xbf16> -> vector<32x48xbf16>
    %c0_6 = arith.constant 0 : index
    %c0_7 = arith.constant 0 : index
    %14 = vector.load %arg4[%c0_6, %c0_7] : memref<48x16xbf16, #tpu.memory_space<vmem>>, vector<48x16xbf16>
    %cst_8 = arith.constant dense<0.000000e+00> : vector<32x16xf32>
    %15 = tpu.matmul %13, %14, %cst_8 {dimension_numbers = #tpu.dot_dimension_numbers<[1], [0], [0], [1], [0, 0, 1, 1], [], []>} : vector<32x48xbf16>, vector<48x16xbf16>, vector<32x16xf32> -> vector<32x16xf32>
    %c0_9 = arith.constant 0 : index
    %c0_10 = arith.constant 0 : index
    %16 = vector.load %arg5[%c0_9, %c0_10] : memref<1x16xf32, #tpu.memory_space<vmem>>, vector<1x16xf32>
    %17 = vector.broadcast %16 : vector<1x16xf32> to vector<32x16xf32>
    %18 = arith.addf %15, %17 : vector<32x16xf32>
    %c0_11 = arith.constant 0 : index
    %c0_12 = arith.constant 0 : index
    %c0_13 = arith.constant 0 : index
    %19 = vector.load %arg6[%c0_11, %c0_12, %c0_13] : memref<1x32x16xbf16, #tpu.memory_space<vmem>>, vector<1x32x16xbf16>
    %20 = vector.shape_cast %19 : vector<1x32x16xbf16> to vector<32x16xbf16>
    %21 = arith.extf %20 : vector<32x16xbf16> to vector<32x16xf32>
    %22 = arith.addf %18, %21 : vector<32x16xf32>
    %23 = arith.truncf %22 : vector<32x16xf32> to vector<32x16xbf16>
    %c0_14 = arith.constant 0 : index
    %c0_15 = arith.constant 0 : index
    %c0_16 = arith.constant 0 : index
    %24 = vector.load %arg7[%c0_14, %c0_15, %c0_16] : memref<1x32x16xbf16, #tpu.memory_space<vmem>>, vector<1x32x16xbf16>
    %25 = vector.shape_cast %24 : vector<1x32x16xbf16> to vector<32x16xbf16>
    %26 = vector.shape_cast %23 : vector<32x16xbf16> to vector<1x32x16xbf16>
    tpu.vector_store %arg7[%c0_14, %c0_15, %c0_16], %26 {strides = array<i32>} : memref<1x32x16xbf16, #tpu.memory_space<vmem>>, vector<1x32x16xbf16>,
    return
  }
  func.func @transform_0(%arg0: i32, %arg1: i32) -> (i32, i32, i32) {
    %c0_i32 = arith.constant 0 : i32
    %c0_i32_0 = arith.constant 0 : i32
    return %arg0, %arg1, %c0_i32 : i32, i32, i32
  }
  func.func @transform_1(%arg0: i32, %arg1: i32) -> (i32, i32, i32) {
    %c1_i32 = arith.constant 1 : i32
    %0 = arith.addi %arg1, %c1_i32 : i32
    %c2_i32 = arith.constant 2 : i32
    %1 = arith.muli %0, %c2_i32 : i32
    %c0_i32 = arith.constant 0 : i32
    %c0_i32_0 = arith.constant 0 : i32
    return %arg0, %1, %c0_i32 : i32, i32, i32
  }
  func.func @transform_2(%arg0: i32, %arg1: i32) -> (i32, i32) {
    %c0_i32 = arith.constant 0 : i32
    %c0_i32_0 = arith.constant 0 : i32
    %c0_i32_1 = arith.constant 0 : i32
    return %c0_i32, %c0_i32_0 : i32, i32
  }
  func.func @transform_3(%arg0: i32, %arg1: i32) -> (i32, i32) {
    %c0_i32 = arith.constant 0 : i32
    %c0_i32_0 = arith.constant 0 : i32
    %c0_i32_1 = arith.constant 0 : i32
    return %c0_i32, %c0_i32_0 : i32, i32
  }
  func.func @transform_4(%arg0: i32, %arg1: i32) -> (i32, i32, i32) {
    %c0_i32 = arith.constant 0 : i32
    %c0_i32_0 = arith.constant 0 : i32
    return %arg0, %arg1, %c0_i32 : i32, i32, i32
  }
  func.func @transform_5(%arg0: i32, %arg1: i32) -> (i32, i32, i32) {
    %c0_i32 = arith.constant 0 : i32
    %c0_i32_0 = arith.constant 0 : i32
    return %arg0, %arg1, %c0_i32 : i32, i32, i32
  }
}

module attributes {stable_mosaic.version = 11 : i64} {
  func.func @_conv1d_kernel(%arg0: i32, %arg1: i32, %arg2: memref<1x32x16xbf16, #tpu.memory_space<vmem>>, %arg3: memref<1x16x16xbf16, #tpu.memory_space<vmem>>, %arg4: memref<48x16xbf16, #tpu.memory_space<vmem>>, %arg5: memref<1x16xf32, #tpu.memory_space<vmem>>, %arg6: memref<1x32x16xbf16, #tpu.memory_space<vmem>>) attributes {dimension_semantics = [#tpu.dimension_semantics<parallel>, #tpu.dimension_semantics<parallel>], iteration_bounds = array<i64: 2, 1>, scalar_prefetch = 0 : i64, scratch_operands = 0 : i64, tpu.core_type = #tpu.core_type<tc>, window_params = [{transform_indices = @transform_0, window_bounds = array<i64: 1, 32, 16>}, {transform_indices = @transform_1, window_bounds = array<i64: 1, 16, 16>}, {pipeline_mode = #tpu.pipeline_mode<synchronous>, transform_indices = @transform_2, window_bounds = array<i64: 48, 16>}, {pipeline_mode = #tpu.pipeline_mode<synchronous>, transform_indices = @transform_3, window_bounds = array<i64: 1, 16>}, {transform_indices = @transform_4, window_bounds = array<i64: 1, 32, 16>}]} {
    %c0 = arith.constant 0 : index
    %c0_0 = arith.constant 0 : index
    %c0_1 = arith.constant 0 : index
    %0 = vector.load %arg2[%c0, %c0_0, %c0_1] : memref<1x32x16xbf16, #tpu.memory_space<vmem>>, vector<1x32x16xbf16>
    %1 = vector.shape_cast %0 : vector<1x32x16xbf16> to vector<32x16xbf16>
    %c0_2 = arith.constant 0 : index
    %c0_3 = arith.constant 0 : index
    %c0_4 = arith.constant 0 : index
    %2 = vector.load %arg3[%c0_2, %c0_3, %c0_4] : memref<1x16x16xbf16, #tpu.memory_space<vmem>>, vector<1x16x16xbf16>
    %3 = vector.shape_cast %2 : vector<1x16x16xbf16> to vector<16x16xbf16>
    %4 = tpu.concatenate %1, %3 in 0 : vector<32x16xbf16>, vector<16x16xbf16> -> vector<48x16xbf16>
    %cst = arith.constant 0.000000e+00 : bf16
    %5 = vector.broadcast %cst : bf16 to vector<48x16xbf16>
    %6 = arith.cmpf oge, %4, %5 : vector<48x16xbf16>
    %cst_5 = arith.constant 1.000980e-01 : bf16
    %7 = vector.broadcast %cst_5 : bf16 to vector<48x16xbf16>
    %8 = arith.mulf %4, %7 : vector<48x16xbf16>
    %9 = arith.select %6, %4, %8 : vector<48x16xi1>, vector<48x16xbf16>
    %10 = vector.extract_strided_slice %9 {offsets = [0, 0], sizes = [32, 16], strides = [1, 1]} : vector<48x16xbf16> to vector<32x16xbf16>
    %11 = vector.extract_strided_slice %9 {offsets = [3, 0], sizes = [32, 16], strides = [1, 1]} : vector<48x16xbf16> to vector<32x16xbf16>
    %12 = vector.extract_strided_slice %9 {offsets = [6, 0], sizes = [32, 16], strides = [1, 1]} : vector<48x16xbf16> to vector<32x16xbf16>
    %13 = tpu.concatenate %10, %11, %12 in 1 : vector<32x16xbf16>, vector<32x16xbf16>, vector<32x16xbf16> -> vector<32x48xbf16>
    %c0_6 = arith.constant 0 : index
    %c0_7 = arith.constant 0 : index
    %14 = vector.load %arg4[%c0_6, %c0_7] : memref<48x16xbf16, #tpu.memory_space<vmem>>, vector<48x16xbf16>
    %cst_8 = arith.constant dense<0.000000e+00> : vector<32x16xf32>
    %15 = tpu.matmul %13, %14, %cst_8 {dimension_numbers = #tpu.dot_dimension_numbers<[1], [0], [0], [1], [0, 0, 1, 1], [], []>} : vector<32x48xbf16>, vector<48x16xbf16>, vector<32x16xf32> -> vector<32x16xf32>
    %c0_9 = arith.constant 0 : index
    %c0_10 = arith.constant 0 : index
    %16 = vector.load %arg5[%c0_9, %c0_10] : memref<1x16xf32, #tpu.memory_space<vmem>>, vector<1x16xf32>
    %17 = vector.broadcast %16 : vector<1x16xf32> to vector<32x16xf32>
    %18 = arith.addf %15, %17 : vector<32x16xf32>
    %19 = arith.truncf %18 : vector<32x16xf32> to vector<32x16xbf16>
    %c0_11 = arith.constant 0 : index
    %c0_12 = arith.constant 0 : index
    %c0_13 = arith.constant 0 : index
    %20 = vector.load %arg6[%c0_11, %c0_12, %c0_13] : memref<1x32x16xbf16, #tpu.memory_space<vmem>>, vector<1x32x16xbf16>
    %21 = vector.shape_cast %20 : vector<1x32x16xbf16> to vector<32x16xbf16>
    %22 = vector.shape_cast %19 : vector<32x16xbf16> to vector<1x32x16xbf16>
    tpu.vector_store %arg6[%c0_11, %c0_12, %c0_13], %22 {strides = array<i32>} : memref<1x32x16xbf16, #tpu.memory_space<vmem>>, vector<1x32x16xbf16>,
    return
  }
  func.func @transform_0(%arg0: i32, %arg1: i32) -> (i32, i32, i32) {
    %c0_i32 = arith.constant 0 : i32
    %c0_i32_0 = arith.constant 0 : i32
    return %arg0, %arg1, %c0_i32 : i32, i32, i32
  }
  func.func @transform_1(%arg0: i32, %arg1: i32) -> (i32, i32, i32) {
    %c1_i32 = arith.constant 1 : i32
    %0 = arith.addi %arg1, %c1_i32 : i32
    %c2_i32 = arith.constant 2 : i32
    %1 = arith.muli %0, %c2_i32 : i32
    %c0_i32 = arith.constant 0 : i32
    %c0_i32_0 = arith.constant 0 : i32
    return %arg0, %1, %c0_i32 : i32, i32, i32
  }
  func.func @transform_2(%arg0: i32, %arg1: i32) -> (i32, i32) {
    %c0_i32 = arith.constant 0 : i32
    %c0_i32_0 = arith.constant 0 : i32
    %c0_i32_1 = arith.constant 0 : i32
    return %c0_i32, %c0_i32_0 : i32, i32
  }
  func.func @transform_3(%arg0: i32, %arg1: i32) -> (i32, i32) {
    %c0_i32 = arith.constant 0 : i32
    %c0_i32_0 = arith.constant 0 : i32
    %c0_i32_1 = arith.constant 0 : i32
    return %c0_i32, %c0_i32_0 : i32, i32
  }
  func.func @transform_4(%arg0: i32, %arg1: i32) -> (i32, i32, i32) {
    %c0_i32 = arith.constant 0 : i32
    %c0_i32_0 = arith.constant 0 : i32
    return %arg0, %arg1, %c0_i32 : i32, i32, i32
  }
}

module attributes {stable_mosaic.version = 11 : i64} {
  func.func @_conv1d_kernel(%arg0: i32, %arg1: i32, %arg2: memref<1x32x16xbf16, #tpu.memory_space<vmem>>, %arg3: memref<1x16x16xbf16, #tpu.memory_space<vmem>>, %arg4: memref<48x16xbf16, #tpu.memory_space<vmem>>, %arg5: memref<1x16xf32, #tpu.memory_space<vmem>>, %arg6: memref<1x32x16xbf16, #tpu.memory_space<vmem>>) attributes {dimension_semantics = [#tpu.dimension_semantics<parallel>, #tpu.dimension_semantics<parallel>], iteration_bounds = array<i64: 2, 1>, scalar_prefetch = 0 : i64, scratch_operands = 0 : i64, tpu.core_type = #tpu.core_type<tc>, window_params = [{transform_indices = @transform_0, window_bounds = array<i64: 1, 32, 16>}, {transform_indices = @transform_1, window_bounds = array<i64: 1, 16, 16>}, {pipeline_mode = #tpu.pipeline_mode<synchronous>, transform_indices = @transform_2, window_bounds = array<i64: 48, 16>}, {pipeline_mode = #tpu.pipeline_mode<synchronous>, transform_indices = @transform_3, window_bounds = array<i64: 1, 16>}, {transform_indices = @transform_4, window_bounds = array<i64: 1, 32, 16>}]} {
    %c0 = arith.constant 0 : index
    %c0_0 = arith.constant 0 : index
    %c0_1 = arith.constant 0 : index
    %0 = vector.load %arg2[%c0, %c0_0, %c0_1] : memref<1x32x16xbf16, #tpu.memory_space<vmem>>, vector<1x32x16xbf16>
    %1 = vector.shape_cast %0 : vector<1x32x16xbf16> to vector<32x16xbf16>
    %c0_2 = arith.constant 0 : index
    %c0_3 = arith.constant 0 : index
    %c0_4 = arith.constant 0 : index
    %2 = vector.load %arg3[%c0_2, %c0_3, %c0_4] : memref<1x16x16xbf16, #tpu.memory_space<vmem>>, vector<1x16x16xbf16>
    %3 = vector.shape_cast %2 : vector<1x16x16xbf16> to vector<16x16xbf16>
    %4 = tpu.concatenate %1, %3 in 0 : vector<32x16xbf16>, vector<16x16xbf16> -> vector<48x16xbf16>
    %cst = arith.constant 0.000000e+00 : bf16
    %5 = vector.broadcast %cst : bf16 to vector<48x16xbf16>
    %6 = arith.cmpf oge, %4, %5 : vector<48x16xbf16>
    %cst_5 = arith.constant 1.000980e-01 : bf16
    %7 = vector.broadcast %cst_5 : bf16 to vector<48x16xbf16>
    %8 = arith.mulf %4, %7 : vector<48x16xbf16>
    %9 = arith.select %6, %4, %8 : vector<48x16xi1>, vector<48x16xbf16>
    %10 = vector.extract_strided_slice %9 {offsets = [0, 0], sizes = [32, 16], strides = [1, 1]} : vector<48x16xbf16> to vector<32x16xbf16>
    %11 = vector.extract_strided_slice %9 {offsets = [5, 0], sizes = [32, 16], strides = [1, 1]} : vector<48x16xbf16> to vector<32x16xbf16>
    %12 = vector.extract_strided_slice %9 {offsets = [10, 0], sizes = [32, 16], strides = [1, 1]} : vector<48x16xbf16> to vector<32x16xbf16>
    %13 = tpu.concatenate %10, %11, %12 in 1 : vector<32x16xbf16>, vector<32x16xbf16>, vector<32x16xbf16> -> vector<32x48xbf16>
    %c0_6 = arith.constant 0 : index
    %c0_7 = arith.constant 0 : index
    %14 = vector.load %arg4[%c0_6, %c0_7] : memref<48x16xbf16, #tpu.memory_space<vmem>>, vector<48x16xbf16>
    %cst_8 = arith.constant dense<0.000000e+00> : vector<32x16xf32>
    %15 = tpu.matmul %13, %14, %cst_8 {dimension_numbers = #tpu.dot_dimension_numbers<[1], [0], [0], [1], [0, 0, 1, 1], [], []>} : vector<32x48xbf16>, vector<48x16xbf16>, vector<32x16xf32> -> vector<32x16xf32>
    %c0_9 = arith.constant 0 : index
    %c0_10 = arith.constant 0 : index
    %16 = vector.load %arg5[%c0_9, %c0_10] : memref<1x16xf32, #tpu.memory_space<vmem>>, vector<1x16xf32>
    %17 = vector.broadcast %16 : vector<1x16xf32> to vector<32x16xf32>
    %18 = arith.addf %15, %17 : vector<32x16xf32>
    %19 = arith.truncf %18 : vector<32x16xf32> to vector<32x16xbf16>
    %c0_11 = arith.constant 0 : index
    %c0_12 = arith.constant 0 : index
    %c0_13 = arith.constant 0 : index
    %20 = vector.load %arg6[%c0_11, %c0_12, %c0_13] : memref<1x32x16xbf16, #tpu.memory_space<vmem>>, vector<1x32x16xbf16>
    %21 = vector.shape_cast %20 : vector<1x32x16xbf16> to vector<32x16xbf16>
    %22 = vector.shape_cast %19 : vector<32x16xbf16> to vector<1x32x16xbf16>
    tpu.vector_store %arg6[%c0_11, %c0_12, %c0_13], %22 {strides = array<i32>} : memref<1x32x16xbf16, #tpu.memory_space<vmem>>, vector<1x32x16xbf16>,
    return
  }
  func.func @transform_0(%arg0: i32, %arg1: i32) -> (i32, i32, i32) {
    %c0_i32 = arith.constant 0 : i32
    %c0_i32_0 = arith.constant 0 : i32
    return %arg0, %arg1, %c0_i32 : i32, i32, i32
  }
  func.func @transform_1(%arg0: i32, %arg1: i32) -> (i32, i32, i32) {
    %c1_i32 = arith.constant 1 : i32
    %0 = arith.addi %arg1, %c1_i32 : i32
    %c2_i32 = arith.constant 2 : i32
    %1 = arith.muli %0, %c2_i32 : i32
    %c0_i32 = arith.constant 0 : i32
    %c0_i32_0 = arith.constant 0 : i32
    return %arg0, %1, %c0_i32 : i32, i32, i32
  }
  func.func @transform_2(%arg0: i32, %arg1: i32) -> (i32, i32) {
    %c0_i32 = arith.constant 0 : i32
    %c0_i32_0 = arith.constant 0 : i32
    %c0_i32_1 = arith.constant 0 : i32
    return %c0_i32, %c0_i32_0 : i32, i32
  }
  func.func @transform_3(%arg0: i32, %arg1: i32) -> (i32, i32) {
    %c0_i32 = arith.constant 0 : i32
    %c0_i32_0 = arith.constant 0 : i32
    %c0_i32_1 = arith.constant 0 : i32
    return %c0_i32, %c0_i32_0 : i32, i32
  }
  func.func @transform_4(%arg0: i32, %arg1: i32) -> (i32, i32, i32) {
    %c0_i32 = arith.constant 0 : i32
    %c0_i32_0 = arith.constant 0 : i32
    return %arg0, %arg1, %c0_i32 : i32, i32, i32
  }
}

module attributes {stable_mosaic.version = 11 : i64} {
  func.func @_conv1d_kernel(%arg0: i32, %arg1: i32, %arg2: memref<1x32x16xbf16, #tpu.memory_space<vmem>>, %arg3: memref<1x16x16xbf16, #tpu.memory_space<vmem>>, %arg4: memref<48x16xbf16, #tpu.memory_space<vmem>>, %arg5: memref<1x16xf32, #tpu.memory_space<vmem>>, %arg6: memref<1x32x16xbf16, #tpu.memory_space<vmem>>, %arg7: memref<1x32x16xbf16, #tpu.memory_space<vmem>>, %arg8: memref<1x32x16xbf16, #tpu.memory_space<vmem>>) attributes {dimension_semantics = [#tpu.dimension_semantics<parallel>, #tpu.dimension_semantics<parallel>], iteration_bounds = array<i64: 2, 1>, scalar_prefetch = 0 : i64, scratch_operands = 0 : i64, tpu.core_type = #tpu.core_type<tc>, window_params = [{transform_indices = @transform_0, window_bounds = array<i64: 1, 32, 16>}, {transform_indices = @transform_1, window_bounds = array<i64: 1, 16, 16>}, {pipeline_mode = #tpu.pipeline_mode<synchronous>, transform_indices = @transform_2, window_bounds = array<i64: 48, 16>}, {pipeline_mode = #tpu.pipeline_mode<synchronous>, transform_indices = @transform_3, window_bounds = array<i64: 1, 16>}, {transform_indices = @transform_4, window_bounds = array<i64: 1, 32, 16>}, {transform_indices = @transform_5, window_bounds = array<i64: 1, 32, 16>}, {transform_indices = @transform_6, window_bounds = array<i64: 1, 32, 16>}]} {
    %c0 = arith.constant 0 : index
    %c0_0 = arith.constant 0 : index
    %c0_1 = arith.constant 0 : index
    %0 = vector.load %arg2[%c0, %c0_0, %c0_1] : memref<1x32x16xbf16, #tpu.memory_space<vmem>>, vector<1x32x16xbf16>
    %1 = vector.shape_cast %0 : vector<1x32x16xbf16> to vector<32x16xbf16>
    %c0_2 = arith.constant 0 : index
    %c0_3 = arith.constant 0 : index
    %c0_4 = arith.constant 0 : index
    %2 = vector.load %arg3[%c0_2, %c0_3, %c0_4] : memref<1x16x16xbf16, #tpu.memory_space<vmem>>, vector<1x16x16xbf16>
    %3 = vector.shape_cast %2 : vector<1x16x16xbf16> to vector<16x16xbf16>
    %4 = tpu.concatenate %1, %3 in 0 : vector<32x16xbf16>, vector<16x16xbf16> -> vector<48x16xbf16>
    %cst = arith.constant 0.000000e+00 : bf16
    %5 = vector.broadcast %cst : bf16 to vector<48x16xbf16>
    %6 = arith.cmpf oge, %4, %5 : vector<48x16xbf16>
    %cst_5 = arith.constant 1.000980e-01 : bf16
    %7 = vector.broadcast %cst_5 : bf16 to vector<48x16xbf16>
    %8 = arith.mulf %4, %7 : vector<48x16xbf16>
    %9 = arith.select %6, %4, %8 : vector<48x16xi1>, vector<48x16xbf16>
    %10 = vector.extract_strided_slice %9 {offsets = [0, 0], sizes = [32, 16], strides = [1, 1]} : vector<48x16xbf16> to vector<32x16xbf16>
    %11 = vector.extract_strided_slice %9 {offsets = [1, 0], sizes = [32, 16], strides = [1, 1]} : vector<48x16xbf16> to vector<32x16xbf16>
    %12 = vector.extract_strided_slice %9 {offsets = [2, 0], sizes = [32, 16], strides = [1, 1]} : vector<48x16xbf16> to vector<32x16xbf16>
    %13 = tpu.concatenate %10, %11, %12 in 1 : vector<32x16xbf16>, vector<32x16xbf16>, vector<32x16xbf16> -> vector<32x48xbf16>
    %c0_6 = arith.constant 0 : index
    %c0_7 = arith.constant 0 : index
    %14 = vector.load %arg4[%c0_6, %c0_7] : memref<48x16xbf16, #tpu.memory_space<vmem>>, vector<48x16xbf16>
    %cst_8 = arith.constant dense<0.000000e+00> : vector<32x16xf32>
    %15 = tpu.matmul %13, %14, %cst_8 {dimension_numbers = #tpu.dot_dimension_numbers<[1], [0], [0], [1], [0, 0, 1, 1], [], []>} : vector<32x48xbf16>, vector<48x16xbf16>, vector<32x16xf32> -> vector<32x16xf32>
    %c0_9 = arith.constant 0 : index
    %c0_10 = arith.constant 0 : index
    %16 = vector.load %arg5[%c0_9, %c0_10] : memref<1x16xf32, #tpu.memory_space<vmem>>, vector<1x16xf32>
    %17 = vector.broadcast %16 : vector<1x16xf32> to vector<32x16xf32>
    %18 = arith.addf %15, %17 : vector<32x16xf32>
    %c0_11 = arith.constant 0 : index
    %c0_12 = arith.constant 0 : index
    %c0_13 = arith.constant 0 : index
    %19 = vector.load %arg6[%c0_11, %c0_12, %c0_13] : memref<1x32x16xbf16, #tpu.memory_space<vmem>>, vector<1x32x16xbf16>
    %20 = vector.shape_cast %19 : vector<1x32x16xbf16> to vector<32x16xbf16>
    %21 = arith.extf %20 : vector<32x16xbf16> to vector<32x16xf32>
    %22 = arith.addf %18, %21 : vector<32x16xf32>
    %c0_14 = arith.constant 0 : index
    %c0_15 = arith.constant 0 : index
    %c0_16 = arith.constant 0 : index
    %23 = vector.load %arg7[%c0_14, %c0_15, %c0_16] : memref<1x32x16xbf16, #tpu.memory_space<vmem>>, vector<1x32x16xbf16>
    %24 = vector.shape_cast %23 : vector<1x32x16xbf16> to vector<32x16xbf16>
    %25 = arith.extf %24 : vector<32x16xbf16> to vector<32x16xf32>
    %26 = arith.addf %22, %25 : vector<32x16xf32>
    %27 = arith.truncf %26 : vector<32x16xf32> to vector<32x16xbf16>
    %c0_17 = arith.constant 0 : index
    %c0_18 = arith.constant 0 : index
    %c0_19 = arith.constant 0 : index
    %28 = vector.load %arg8[%c0_17, %c0_18, %c0_19] : memref<1x32x16xbf16, #tpu.memory_space<vmem>>, vector<1x32x16xbf16>
    %29 = vector.shape_cast %28 : vector<1x32x16xbf16> to vector<32x16xbf16>
    %30 = vector.shape_cast %27 : vector<32x16xbf16> to vector<1x32x16xbf16>
    tpu.vector_store %arg8[%c0_17, %c0_18, %c0_19], %30 {strides = array<i32>} : memref<1x32x16xbf16, #tpu.memory_space<vmem>>, vector<1x32x16xbf16>,
    return
  }
  func.func @transform_0(%arg0: i32, %arg1: i32) -> (i32, i32, i32) {
    %c0_i32 = arith.constant 0 : i32
    %c0_i32_0 = arith.constant 0 : i32
    return %arg0, %arg1, %c0_i32 : i32, i32, i32
  }
  func.func @transform_1(%arg0: i32, %arg1: i32) -> (i32, i32, i32) {
    %c1_i32 = arith.constant 1 : i32
    %0 = arith.addi %arg1, %c1_i32 : i32
    %c2_i32 = arith.constant 2 : i32
    %1 = arith.muli %0, %c2_i32 : i32
    %c0_i32 = arith.constant 0 : i32
    %c0_i32_0 = arith.constant 0 : i32
    return %arg0, %1, %c0_i32 : i32, i32, i32
  }
  func.func @transform_2(%arg0: i32, %arg1: i32) -> (i32, i32) {
    %c0_i32 = arith.constant 0 : i32
    %c0_i32_0 = arith.constant 0 : i32
    %c0_i32_1 = arith.constant 0 : i32
    return %c0_i32, %c0_i32_0 : i32, i32
  }
  func.func @transform_3(%arg0: i32, %arg1: i32) -> (i32, i32) {
    %c0_i32 = arith.constant 0 : i32
    %c0_i32_0 = arith.constant 0 : i32
    %c0_i32_1 = arith.constant 0 : i32
    return %c0_i32, %c0_i32_0 : i32, i32
  }
  func.func @transform_4(%arg0: i32, %arg1: i32) -> (i32, i32, i32) {
    %c0_i32 = arith.constant 0 : i32
    %c0_i32_0 = arith.constant 0 : i32
    return %arg0, %arg1, %c0_i32 : i32, i32, i32
  }
  func.func @transform_5(%arg0: i32, %arg1: i32) -> (i32, i32, i32) {
    %c0_i32 = arith.constant 0 : i32
    %c0_i32_0 = arith.constant 0 : i32
    return %arg0, %arg1, %c0_i32 : i32, i32, i32
  }
  func.func @transform_6(%arg0: i32, %arg1: i32) -> (i32, i32, i32) {
    %c0_i32 = arith.constant 0 : i32
    %c0_i32_0 = arith.constant 0 : i32
    return %arg0, %arg1, %c0_i32 : i32, i32, i32
  }
}

module attributes {stable_mosaic.version = 11 : i64} {
  func.func @_conv1d_kernel(%arg0: i32, %arg1: i32, %arg2: memref<1x64x8xbf16, #tpu.memory_space<vmem>>, %arg3: memref<1x16x8xbf16, #tpu.memory_space<vmem>>, %arg4: memref<24x8xbf16, #tpu.memory_space<vmem>>, %arg5: memref<1x8xf32, #tpu.memory_space<vmem>>, %arg6: memref<1x64x8xbf16, #tpu.memory_space<vmem>>) attributes {dimension_semantics = [#tpu.dimension_semantics<parallel>, #tpu.dimension_semantics<parallel>], iteration_bounds = array<i64: 2, 1>, scalar_prefetch = 0 : i64, scratch_operands = 0 : i64, tpu.core_type = #tpu.core_type<tc>, window_params = [{transform_indices = @transform_0, window_bounds = array<i64: 1, 64, 8>}, {transform_indices = @transform_1, window_bounds = array<i64: 1, 16, 8>}, {pipeline_mode = #tpu.pipeline_mode<synchronous>, transform_indices = @transform_2, window_bounds = array<i64: 24, 8>}, {pipeline_mode = #tpu.pipeline_mode<synchronous>, transform_indices = @transform_3, window_bounds = array<i64: 1, 8>}, {transform_indices = @transform_4, window_bounds = array<i64: 1, 64, 8>}]} {
    %c0 = arith.constant 0 : index
    %c0_0 = arith.constant 0 : index
    %c0_1 = arith.constant 0 : index
    %0 = vector.load %arg2[%c0, %c0_0, %c0_1] : memref<1x64x8xbf16, #tpu.memory_space<vmem>>, vector<1x64x8xbf16>
    %1 = vector.shape_cast %0 : vector<1x64x8xbf16> to vector<64x8xbf16>
    %c0_2 = arith.constant 0 : index
    %c0_3 = arith.constant 0 : index
    %c0_4 = arith.constant 0 : index
    %2 = vector.load %arg3[%c0_2, %c0_3, %c0_4] : memref<1x16x8xbf16, #tpu.memory_space<vmem>>, vector<1x16x8xbf16>
    %3 = vector.shape_cast %2 : vector<1x16x8xbf16> to vector<16x8xbf16>
    %4 = tpu.concatenate %1, %3 in 0 : vector<64x8xbf16>, vector<16x8xbf16> -> vector<80x8xbf16>
    %cst = arith.constant 0.000000e+00 : bf16
    %5 = vector.broadcast %cst : bf16 to vector<80x8xbf16>
    %6 = arith.cmpf oge, %4, %5 : vector<80x8xbf16>
    %cst_5 = arith.constant 1.000980e-01 : bf16
    %7 = vector.broadcast %cst_5 : bf16 to vector<80x8xbf16>
    %8 = arith.mulf %4, %7 : vector<80x8xbf16>
    %9 = arith.select %6, %4, %8 : vector<80x8xi1>, vector<80x8xbf16>
    %10 = vector.extract_strided_slice %9 {offsets = [0, 0], sizes = [64, 8], strides = [1, 1]} : vector<80x8xbf16> to vector<64x8xbf16>
    %11 = vector.extract_strided_slice %9 {offsets = [1, 0], sizes = [64, 8], strides = [1, 1]} : vector<80x8xbf16> to vector<64x8xbf16>
    %12 = vector.extract_strided_slice %9 {offsets = [2, 0], sizes = [64, 8], strides = [1, 1]} : vector<80x8xbf16> to vector<64x8xbf16>
    %13 = tpu.concatenate %10, %11, %12 in 1 : vector<64x8xbf16>, vector<64x8xbf16>, vector<64x8xbf16> -> vector<64x24xbf16>
    %c0_6 = arith.constant 0 : index
    %c0_7 = arith.constant 0 : index
    %14 = vector.load %arg4[%c0_6, %c0_7] : memref<24x8xbf16, #tpu.memory_space<vmem>>, vector<24x8xbf16>
    %cst_8 = arith.constant dense<0.000000e+00> : vector<64x8xf32>
    %15 = tpu.matmul %13, %14, %cst_8 {dimension_numbers = #tpu.dot_dimension_numbers<[1], [0], [0], [1], [0, 0, 1, 1], [], []>} : vector<64x24xbf16>, vector<24x8xbf16>, vector<64x8xf32> -> vector<64x8xf32>
    %c0_9 = arith.constant 0 : index
    %c0_10 = arith.constant 0 : index
    %16 = vector.load %arg5[%c0_9, %c0_10] : memref<1x8xf32, #tpu.memory_space<vmem>>, vector<1x8xf32>
    %17 = vector.broadcast %16 : vector<1x8xf32> to vector<64x8xf32>
    %18 = arith.addf %15, %17 : vector<64x8xf32>
    %19 = arith.truncf %18 : vector<64x8xf32> to vector<64x8xbf16>
    %c0_11 = arith.constant 0 : index
    %c0_12 = arith.constant 0 : index
    %c0_13 = arith.constant 0 : index
    %20 = vector.load %arg6[%c0_11, %c0_12, %c0_13] : memref<1x64x8xbf16, #tpu.memory_space<vmem>>, vector<1x64x8xbf16>
    %21 = vector.shape_cast %20 : vector<1x64x8xbf16> to vector<64x8xbf16>
    %22 = vector.shape_cast %19 : vector<64x8xbf16> to vector<1x64x8xbf16>
    tpu.vector_store %arg6[%c0_11, %c0_12, %c0_13], %22 {strides = array<i32>} : memref<1x64x8xbf16, #tpu.memory_space<vmem>>, vector<1x64x8xbf16>,
    return
  }
  func.func @transform_0(%arg0: i32, %arg1: i32) -> (i32, i32, i32) {
    %c0_i32 = arith.constant 0 : i32
    %c0_i32_0 = arith.constant 0 : i32
    return %arg0, %arg1, %c0_i32 : i32, i32, i32
  }
  func.func @transform_1(%arg0: i32, %arg1: i32) -> (i32, i32, i32) {
    %c1_i32 = arith.constant 1 : i32
    %0 = arith.addi %arg1, %c1_i32 : i32
    %c4_i32 = arith.constant 4 : i32
    %1 = arith.muli %0, %c4_i32 : i32
    %c0_i32 = arith.constant 0 : i32
    %c0_i32_0 = arith.constant 0 : i32
    return %arg0, %1, %c0_i32 : i32, i32, i32
  }
  func.func @transform_2(%arg0: i32, %arg1: i32) -> (i32, i32) {
    %c0_i32 = arith.constant 0 : i32
    %c0_i32_0 = arith.constant 0 : i32
    %c0_i32_1 = arith.constant 0 : i32
    return %c0_i32, %c0_i32_0 : i32, i32
  }
  func.func @transform_3(%arg0: i32, %arg1: i32) -> (i32, i32) {
    %c0_i32 = arith.constant 0 : i32
    %c0_i32_0 = arith.constant 0 : i32
    %c0_i32_1 = arith.constant 0 : i32
    return %c0_i32, %c0_i32_0 : i32, i32
  }
  func.func @transform_4(%arg0: i32, %arg1: i32) -> (i32, i32, i32) {
    %c0_i32 = arith.constant 0 : i32
    %c0_i32_0 = arith.constant 0 : i32
    return %arg0, %arg1, %c0_i32 : i32, i32, i32
  }
}

module attributes {stable_mosaic.version = 11 : i64} {
  func.func @_conv1d_kernel(%arg0: i32, %arg1: i32, %arg2: memref<1x64x8xbf16, #tpu.memory_space<vmem>>, %arg3: memref<1x16x8xbf16, #tpu.memory_space<vmem>>, %arg4: memref<24x8xbf16, #tpu.memory_space<vmem>>, %arg5: memref<1x8xf32, #tpu.memory_space<vmem>>, %arg6: memref<1x64x8xbf16, #tpu.memory_space<vmem>>, %arg7: memref<1x64x8xbf16, #tpu.memory_space<vmem>>) attributes {dimension_semantics = [#tpu.dimension_semantics<parallel>, #tpu.dimension_semantics<parallel>], iteration_bounds = array<i64: 2, 1>, scalar_prefetch = 0 : i64, scratch_operands = 0 : i64, tpu.core_type = #tpu.core_type<tc>, window_params = [{transform_indices = @transform_0, window_bounds = array<i64: 1, 64, 8>}, {transform_indices = @transform_1, window_bounds = array<i64: 1, 16, 8>}, {pipeline_mode = #tpu.pipeline_mode<synchronous>, transform_indices = @transform_2, window_bounds = array<i64: 24, 8>}, {pipeline_mode = #tpu.pipeline_mode<synchronous>, transform_indices = @transform_3, window_bounds = array<i64: 1, 8>}, {transform_indices = @transform_4, window_bounds = array<i64: 1, 64, 8>}, {transform_indices = @transform_5, window_bounds = array<i64: 1, 64, 8>}]} {
    %c0 = arith.constant 0 : index
    %c0_0 = arith.constant 0 : index
    %c0_1 = arith.constant 0 : index
    %0 = vector.load %arg2[%c0, %c0_0, %c0_1] : memref<1x64x8xbf16, #tpu.memory_space<vmem>>, vector<1x64x8xbf16>
    %1 = vector.shape_cast %0 : vector<1x64x8xbf16> to vector<64x8xbf16>
    %c0_2 = arith.constant 0 : index
    %c0_3 = arith.constant 0 : index
    %c0_4 = arith.constant 0 : index
    %2 = vector.load %arg3[%c0_2, %c0_3, %c0_4] : memref<1x16x8xbf16, #tpu.memory_space<vmem>>, vector<1x16x8xbf16>
    %3 = vector.shape_cast %2 : vector<1x16x8xbf16> to vector<16x8xbf16>
    %4 = tpu.concatenate %1, %3 in 0 : vector<64x8xbf16>, vector<16x8xbf16> -> vector<80x8xbf16>
    %cst = arith.constant 0.000000e+00 : bf16
    %5 = vector.broadcast %cst : bf16 to vector<80x8xbf16>
    %6 = arith.cmpf oge, %4, %5 : vector<80x8xbf16>
    %cst_5 = arith.constant 1.000980e-01 : bf16
    %7 = vector.broadcast %cst_5 : bf16 to vector<80x8xbf16>
    %8 = arith.mulf %4, %7 : vector<80x8xbf16>
    %9 = arith.select %6, %4, %8 : vector<80x8xi1>, vector<80x8xbf16>
    %10 = vector.extract_strided_slice %9 {offsets = [0, 0], sizes = [64, 8], strides = [1, 1]} : vector<80x8xbf16> to vector<64x8xbf16>
    %11 = vector.extract_strided_slice %9 {offsets = [1, 0], sizes = [64, 8], strides = [1, 1]} : vector<80x8xbf16> to vector<64x8xbf16>
    %12 = vector.extract_strided_slice %9 {offsets = [2, 0], sizes = [64, 8], strides = [1, 1]} : vector<80x8xbf16> to vector<64x8xbf16>
    %13 = tpu.concatenate %10, %11, %12 in 1 : vector<64x8xbf16>, vector<64x8xbf16>, vector<64x8xbf16> -> vector<64x24xbf16>
    %c0_6 = arith.constant 0 : index
    %c0_7 = arith.constant 0 : index
    %14 = vector.load %arg4[%c0_6, %c0_7] : memref<24x8xbf16, #tpu.memory_space<vmem>>, vector<24x8xbf16>
    %cst_8 = arith.constant dense<0.000000e+00> : vector<64x8xf32>
    %15 = tpu.matmul %13, %14, %cst_8 {dimension_numbers = #tpu.dot_dimension_numbers<[1], [0], [0], [1], [0, 0, 1, 1], [], []>} : vector<64x24xbf16>, vector<24x8xbf16>, vector<64x8xf32> -> vector<64x8xf32>
    %c0_9 = arith.constant 0 : index
    %c0_10 = arith.constant 0 : index
    %16 = vector.load %arg5[%c0_9, %c0_10] : memref<1x8xf32, #tpu.memory_space<vmem>>, vector<1x8xf32>
    %17 = vector.broadcast %16 : vector<1x8xf32> to vector<64x8xf32>
    %18 = arith.addf %15, %17 : vector<64x8xf32>
    %c0_11 = arith.constant 0 : index
    %c0_12 = arith.constant 0 : index
    %c0_13 = arith.constant 0 : index
    %19 = vector.load %arg6[%c0_11, %c0_12, %c0_13] : memref<1x64x8xbf16, #tpu.memory_space<vmem>>, vector<1x64x8xbf16>
    %20 = vector.shape_cast %19 : vector<1x64x8xbf16> to vector<64x8xbf16>
    %21 = arith.extf %20 : vector<64x8xbf16> to vector<64x8xf32>
    %22 = arith.addf %18, %21 : vector<64x8xf32>
    %23 = arith.truncf %22 : vector<64x8xf32> to vector<64x8xbf16>
    %c0_14 = arith.constant 0 : index
    %c0_15 = arith.constant 0 : index
    %c0_16 = arith.constant 0 : index
    %24 = vector.load %arg7[%c0_14, %c0_15, %c0_16] : memref<1x64x8xbf16, #tpu.memory_space<vmem>>, vector<1x64x8xbf16>
    %25 = vector.shape_cast %24 : vector<1x64x8xbf16> to vector<64x8xbf16>
    %26 = vector.shape_cast %23 : vector<64x8xbf16> to vector<1x64x8xbf16>
    tpu.vector_store %arg7[%c0_14, %c0_15, %c0_16], %26 {strides = array<i32>} : memref<1x64x8xbf16, #tpu.memory_space<vmem>>, vector<1x64x8xbf16>,
    return
  }
  func.func @transform_0(%arg0: i32, %arg1: i32) -> (i32, i32, i32) {
    %c0_i32 = arith.constant 0 : i32
    %c0_i32_0 = arith.constant 0 : i32
    return %arg0, %arg1, %c0_i32 : i32, i32, i32
  }
  func.func @transform_1(%arg0: i32, %arg1: i32) -> (i32, i32, i32) {
    %c1_i32 = arith.constant 1 : i32
    %0 = arith.addi %arg1, %c1_i32 : i32
    %c4_i32 = arith.constant 4 : i32
    %1 = arith.muli %0, %c4_i32 : i32
    %c0_i32 = arith.constant 0 : i32
    %c0_i32_0 = arith.constant 0 : i32
    return %arg0, %1, %c0_i32 : i32, i32, i32
  }
  func.func @transform_2(%arg0: i32, %arg1: i32) -> (i32, i32) {
    %c0_i32 = arith.constant 0 : i32
    %c0_i32_0 = arith.constant 0 : i32
    %c0_i32_1 = arith.constant 0 : i32
    return %c0_i32, %c0_i32_0 : i32, i32
  }
  func.func @transform_3(%arg0: i32, %arg1: i32) -> (i32, i32) {
    %c0_i32 = arith.constant 0 : i32
    %c0_i32_0 = arith.constant 0 : i32
    %c0_i32_1 = arith.constant 0 : i32
    return %c0_i32, %c0_i32_0 : i32, i32
  }
  func.func @transform_4(%arg0: i32, %arg1: i32) -> (i32, i32, i32) {
    %c0_i32 = arith.constant 0 : i32
    %c0_i32_0 = arith.constant 0 : i32
    return %arg0, %arg1, %c0_i32 : i32, i32, i32
  }
  func.func @transform_5(%arg0: i32, %arg1: i32) -> (i32, i32, i32) {
    %c0_i32 = arith.constant 0 : i32
    %c0_i32_0 = arith.constant 0 : i32
    return %arg0, %arg1, %c0_i32 : i32, i32, i32
  }
}

module attributes {stable_mosaic.version = 11 : i64} {
  func.func @_conv1d_kernel(%arg0: i32, %arg1: i32, %arg2: memref<1x64x8xbf16, #tpu.memory_space<vmem>>, %arg3: memref<1x16x8xbf16, #tpu.memory_space<vmem>>, %arg4: memref<24x8xbf16, #tpu.memory_space<vmem>>, %arg5: memref<1x8xf32, #tpu.memory_space<vmem>>, %arg6: memref<1x64x8xbf16, #tpu.memory_space<vmem>>) attributes {dimension_semantics = [#tpu.dimension_semantics<parallel>, #tpu.dimension_semantics<parallel>], iteration_bounds = array<i64: 2, 1>, scalar_prefetch = 0 : i64, scratch_operands = 0 : i64, tpu.core_type = #tpu.core_type<tc>, window_params = [{transform_indices = @transform_0, window_bounds = array<i64: 1, 64, 8>}, {transform_indices = @transform_1, window_bounds = array<i64: 1, 16, 8>}, {pipeline_mode = #tpu.pipeline_mode<synchronous>, transform_indices = @transform_2, window_bounds = array<i64: 24, 8>}, {pipeline_mode = #tpu.pipeline_mode<synchronous>, transform_indices = @transform_3, window_bounds = array<i64: 1, 8>}, {transform_indices = @transform_4, window_bounds = array<i64: 1, 64, 8>}]} {
    %c0 = arith.constant 0 : index
    %c0_0 = arith.constant 0 : index
    %c0_1 = arith.constant 0 : index
    %0 = vector.load %arg2[%c0, %c0_0, %c0_1] : memref<1x64x8xbf16, #tpu.memory_space<vmem>>, vector<1x64x8xbf16>
    %1 = vector.shape_cast %0 : vector<1x64x8xbf16> to vector<64x8xbf16>
    %c0_2 = arith.constant 0 : index
    %c0_3 = arith.constant 0 : index
    %c0_4 = arith.constant 0 : index
    %2 = vector.load %arg3[%c0_2, %c0_3, %c0_4] : memref<1x16x8xbf16, #tpu.memory_space<vmem>>, vector<1x16x8xbf16>
    %3 = vector.shape_cast %2 : vector<1x16x8xbf16> to vector<16x8xbf16>
    %4 = tpu.concatenate %1, %3 in 0 : vector<64x8xbf16>, vector<16x8xbf16> -> vector<80x8xbf16>
    %cst = arith.constant 0.000000e+00 : bf16
    %5 = vector.broadcast %cst : bf16 to vector<80x8xbf16>
    %6 = arith.cmpf oge, %4, %5 : vector<80x8xbf16>
    %cst_5 = arith.constant 1.000980e-01 : bf16
    %7 = vector.broadcast %cst_5 : bf16 to vector<80x8xbf16>
    %8 = arith.mulf %4, %7 : vector<80x8xbf16>
    %9 = arith.select %6, %4, %8 : vector<80x8xi1>, vector<80x8xbf16>
    %10 = vector.extract_strided_slice %9 {offsets = [0, 0], sizes = [64, 8], strides = [1, 1]} : vector<80x8xbf16> to vector<64x8xbf16>
    %11 = vector.extract_strided_slice %9 {offsets = [5, 0], sizes = [64, 8], strides = [1, 1]} : vector<80x8xbf16> to vector<64x8xbf16>
    %12 = vector.extract_strided_slice %9 {offsets = [10, 0], sizes = [64, 8], strides = [1, 1]} : vector<80x8xbf16> to vector<64x8xbf16>
    %13 = tpu.concatenate %10, %11, %12 in 1 : vector<64x8xbf16>, vector<64x8xbf16>, vector<64x8xbf16> -> vector<64x24xbf16>
    %c0_6 = arith.constant 0 : index
    %c0_7 = arith.constant 0 : index
    %14 = vector.load %arg4[%c0_6, %c0_7] : memref<24x8xbf16, #tpu.memory_space<vmem>>, vector<24x8xbf16>
    %cst_8 = arith.constant dense<0.000000e+00> : vector<64x8xf32>
    %15 = tpu.matmul %13, %14, %cst_8 {dimension_numbers = #tpu.dot_dimension_numbers<[1], [0], [0], [1], [0, 0, 1, 1], [], []>} : vector<64x24xbf16>, vector<24x8xbf16>, vector<64x8xf32> -> vector<64x8xf32>
    %c0_9 = arith.constant 0 : index
    %c0_10 = arith.constant 0 : index
    %16 = vector.load %arg5[%c0_9, %c0_10] : memref<1x8xf32, #tpu.memory_space<vmem>>, vector<1x8xf32>
    %17 = vector.broadcast %16 : vector<1x8xf32> to vector<64x8xf32>
    %18 = arith.addf %15, %17 : vector<64x8xf32>
    %19 = arith.truncf %18 : vector<64x8xf32> to vector<64x8xbf16>
    %c0_11 = arith.constant 0 : index
    %c0_12 = arith.constant 0 : index
    %c0_13 = arith.constant 0 : index
    %20 = vector.load %arg6[%c0_11, %c0_12, %c0_13] : memref<1x64x8xbf16, #tpu.memory_space<vmem>>, vector<1x64x8xbf16>
    %21 = vector.shape_cast %20 : vector<1x64x8xbf16> to vector<64x8xbf16>
    %22 = vector.shape_cast %19 : vector<64x8xbf16> to vector<1x64x8xbf16>
    tpu.vector_store %arg6[%c0_11, %c0_12, %c0_13], %22 {strides = array<i32>} : memref<1x64x8xbf16, #tpu.memory_space<vmem>>, vector<1x64x8xbf16>,
    return
  }
  func.func @transform_0(%arg0: i32, %arg1: i32) -> (i32, i32, i32) {
    %c0_i32 = arith.constant 0 : i32
    %c0_i32_0 = arith.constant 0 : i32
    return %arg0, %arg1, %c0_i32 : i32, i32, i32
  }
  func.func @transform_1(%arg0: i32, %arg1: i32) -> (i32, i32, i32) {
    %c1_i32 = arith.constant 1 : i32
    %0 = arith.addi %arg1, %c1_i32 : i32
    %c4_i32 = arith.constant 4 : i32
    %1 = arith.muli %0, %c4_i32 : i32
    %c0_i32 = arith.constant 0 : i32
    %c0_i32_0 = arith.constant 0 : i32
    return %arg0, %1, %c0_i32 : i32, i32, i32
  }
  func.func @transform_2(%arg0: i32, %arg1: i32) -> (i32, i32) {
    %c0_i32 = arith.constant 0 : i32
    %c0_i32_0 = arith.constant 0 : i32
    %c0_i32_1 = arith.constant 0 : i32
    return %c0_i32, %c0_i32_0 : i32, i32
  }
  func.func @transform_3(%arg0: i32, %arg1: i32) -> (i32, i32) {
    %c0_i32 = arith.constant 0 : i32
    %c0_i32_0 = arith.constant 0 : i32
    %c0_i32_1 = arith.constant 0 : i32
    return %c0_i32, %c0_i32_0 : i32, i32
  }
  func.func @transform_4(%arg0: i32, %arg1: i32) -> (i32, i32, i32) {
    %c0_i32 = arith.constant 0 : i32
    %c0_i32_0 = arith.constant 0 : i32
    return %arg0, %arg1, %c0_i32 : i32, i32, i32
  }
}

module attributes {stable_mosaic.version = 11 : i64} {
  func.func @_conv1d_kernel(%arg0: i32, %arg1: i32, %arg2: memref<1x64x8xbf16, #tpu.memory_space<vmem>>, %arg3: memref<1x16x8xbf16, #tpu.memory_space<vmem>>, %arg4: memref<24x8xbf16, #tpu.memory_space<vmem>>, %arg5: memref<1x8xf32, #tpu.memory_space<vmem>>, %arg6: memref<1x64x8xbf16, #tpu.memory_space<vmem>>) attributes {dimension_semantics = [#tpu.dimension_semantics<parallel>, #tpu.dimension_semantics<parallel>], iteration_bounds = array<i64: 2, 1>, scalar_prefetch = 0 : i64, scratch_operands = 0 : i64, tpu.core_type = #tpu.core_type<tc>, window_params = [{transform_indices = @transform_0, window_bounds = array<i64: 1, 64, 8>}, {transform_indices = @transform_1, window_bounds = array<i64: 1, 16, 8>}, {pipeline_mode = #tpu.pipeline_mode<synchronous>, transform_indices = @transform_2, window_bounds = array<i64: 24, 8>}, {pipeline_mode = #tpu.pipeline_mode<synchronous>, transform_indices = @transform_3, window_bounds = array<i64: 1, 8>}, {transform_indices = @transform_4, window_bounds = array<i64: 1, 64, 8>}]} {
    %c0 = arith.constant 0 : index
    %c0_0 = arith.constant 0 : index
    %c0_1 = arith.constant 0 : index
    %0 = vector.load %arg2[%c0, %c0_0, %c0_1] : memref<1x64x8xbf16, #tpu.memory_space<vmem>>, vector<1x64x8xbf16>
    %1 = vector.shape_cast %0 : vector<1x64x8xbf16> to vector<64x8xbf16>
    %c0_2 = arith.constant 0 : index
    %c0_3 = arith.constant 0 : index
    %c0_4 = arith.constant 0 : index
    %2 = vector.load %arg3[%c0_2, %c0_3, %c0_4] : memref<1x16x8xbf16, #tpu.memory_space<vmem>>, vector<1x16x8xbf16>
    %3 = vector.shape_cast %2 : vector<1x16x8xbf16> to vector<16x8xbf16>
    %4 = tpu.concatenate %1, %3 in 0 : vector<64x8xbf16>, vector<16x8xbf16> -> vector<80x8xbf16>
    %cst = arith.constant 0.000000e+00 : bf16
    %5 = vector.broadcast %cst : bf16 to vector<80x8xbf16>
    %6 = arith.cmpf oge, %4, %5 : vector<80x8xbf16>
    %cst_5 = arith.constant 1.000980e-01 : bf16
    %7 = vector.broadcast %cst_5 : bf16 to vector<80x8xbf16>
    %8 = arith.mulf %4, %7 : vector<80x8xbf16>
    %9 = arith.select %6, %4, %8 : vector<80x8xi1>, vector<80x8xbf16>
    %10 = vector.extract_strided_slice %9 {offsets = [0, 0], sizes = [64, 8], strides = [1, 1]} : vector<80x8xbf16> to vector<64x8xbf16>
    %11 = vector.extract_strided_slice %9 {offsets = [3, 0], sizes = [64, 8], strides = [1, 1]} : vector<80x8xbf16> to vector<64x8xbf16>
    %12 = vector.extract_strided_slice %9 {offsets = [6, 0], sizes = [64, 8], strides = [1, 1]} : vector<80x8xbf16> to vector<64x8xbf16>
    %13 = tpu.concatenate %10, %11, %12 in 1 : vector<64x8xbf16>, vector<64x8xbf16>, vector<64x8xbf16> -> vector<64x24xbf16>
    %c0_6 = arith.constant 0 : index
    %c0_7 = arith.constant 0 : index
    %14 = vector.load %arg4[%c0_6, %c0_7] : memref<24x8xbf16, #tpu.memory_space<vmem>>, vector<24x8xbf16>
    %cst_8 = arith.constant dense<0.000000e+00> : vector<64x8xf32>
    %15 = tpu.matmul %13, %14, %cst_8 {dimension_numbers = #tpu.dot_dimension_numbers<[1], [0], [0], [1], [0, 0, 1, 1], [], []>} : vector<64x24xbf16>, vector<24x8xbf16>, vector<64x8xf32> -> vector<64x8xf32>
    %c0_9 = arith.constant 0 : index
    %c0_10 = arith.constant 0 : index
    %16 = vector.load %arg5[%c0_9, %c0_10] : memref<1x8xf32, #tpu.memory_space<vmem>>, vector<1x8xf32>
    %17 = vector.broadcast %16 : vector<1x8xf32> to vector<64x8xf32>
    %18 = arith.addf %15, %17 : vector<64x8xf32>
    %19 = arith.truncf %18 : vector<64x8xf32> to vector<64x8xbf16>
    %c0_11 = arith.constant 0 : index
    %c0_12 = arith.constant 0 : index
    %c0_13 = arith.constant 0 : index
    %20 = vector.load %arg6[%c0_11, %c0_12, %c0_13] : memref<1x64x8xbf16, #tpu.memory_space<vmem>>, vector<1x64x8xbf16>
    %21 = vector.shape_cast %20 : vector<1x64x8xbf16> to vector<64x8xbf16>
    %22 = vector.shape_cast %19 : vector<64x8xbf16> to vector<1x64x8xbf16>
    tpu.vector_store %arg6[%c0_11, %c0_12, %c0_13], %22 {strides = array<i32>} : memref<1x64x8xbf16, #tpu.memory_space<vmem>>, vector<1x64x8xbf16>,
    return
  }
  func.func @transform_0(%arg0: i32, %arg1: i32) -> (i32, i32, i32) {
    %c0_i32 = arith.constant 0 : i32
    %c0_i32_0 = arith.constant 0 : i32
    return %arg0, %arg1, %c0_i32 : i32, i32, i32
  }
  func.func @transform_1(%arg0: i32, %arg1: i32) -> (i32, i32, i32) {
    %c1_i32 = arith.constant 1 : i32
    %0 = arith.addi %arg1, %c1_i32 : i32
    %c4_i32 = arith.constant 4 : i32
    %1 = arith.muli %0, %c4_i32 : i32
    %c0_i32 = arith.constant 0 : i32
    %c0_i32_0 = arith.constant 0 : i32
    return %arg0, %1, %c0_i32 : i32, i32, i32
  }
  func.func @transform_2(%arg0: i32, %arg1: i32) -> (i32, i32) {
    %c0_i32 = arith.constant 0 : i32
    %c0_i32_0 = arith.constant 0 : i32
    %c0_i32_1 = arith.constant 0 : i32
    return %c0_i32, %c0_i32_0 : i32, i32
  }
  func.func @transform_3(%arg0: i32, %arg1: i32) -> (i32, i32) {
    %c0_i32 = arith.constant 0 : i32
    %c0_i32_0 = arith.constant 0 : i32
    %c0_i32_1 = arith.constant 0 : i32
    return %c0_i32, %c0_i32_0 : i32, i32
  }
  func.func @transform_4(%arg0: i32, %arg1: i32) -> (i32, i32, i32) {
    %c0_i32 = arith.constant 0 : i32
    %c0_i32_0 = arith.constant 0 : i32
    return %arg0, %arg1, %c0_i32 : i32, i32, i32
  }
}

module attributes {stable_mosaic.version = 11 : i64} {
  func.func @_conv1d_kernel(%arg0: i32, %arg1: i32, %arg2: memref<1x64x8xbf16, #tpu.memory_space<vmem>>, %arg3: memref<1x16x8xbf16, #tpu.memory_space<vmem>>, %arg4: memref<24x8xbf16, #tpu.memory_space<vmem>>, %arg5: memref<1x8xf32, #tpu.memory_space<vmem>>, %arg6: memref<1x64x8xbf16, #tpu.memory_space<vmem>>, %arg7: memref<1x64x8xbf16, #tpu.memory_space<vmem>>, %arg8: memref<1x64x8xbf16, #tpu.memory_space<vmem>>) attributes {dimension_semantics = [#tpu.dimension_semantics<parallel>, #tpu.dimension_semantics<parallel>], iteration_bounds = array<i64: 2, 1>, scalar_prefetch = 0 : i64, scratch_operands = 0 : i64, tpu.core_type = #tpu.core_type<tc>, window_params = [{transform_indices = @transform_0, window_bounds = array<i64: 1, 64, 8>}, {transform_indices = @transform_1, window_bounds = array<i64: 1, 16, 8>}, {pipeline_mode = #tpu.pipeline_mode<synchronous>, transform_indices = @transform_2, window_bounds = array<i64: 24, 8>}, {pipeline_mode = #tpu.pipeline_mode<synchronous>, transform_indices = @transform_3, window_bounds = array<i64: 1, 8>}, {transform_indices = @transform_4, window_bounds = array<i64: 1, 64, 8>}, {transform_indices = @transform_5, window_bounds = array<i64: 1, 64, 8>}, {transform_indices = @transform_6, window_bounds = array<i64: 1, 64, 8>}]} {
    %c0 = arith.constant 0 : index
    %c0_0 = arith.constant 0 : index
    %c0_1 = arith.constant 0 : index
    %0 = vector.load %arg2[%c0, %c0_0, %c0_1] : memref<1x64x8xbf16, #tpu.memory_space<vmem>>, vector<1x64x8xbf16>
    %1 = vector.shape_cast %0 : vector<1x64x8xbf16> to vector<64x8xbf16>
    %c0_2 = arith.constant 0 : index
    %c0_3 = arith.constant 0 : index
    %c0_4 = arith.constant 0 : index
    %2 = vector.load %arg3[%c0_2, %c0_3, %c0_4] : memref<1x16x8xbf16, #tpu.memory_space<vmem>>, vector<1x16x8xbf16>
    %3 = vector.shape_cast %2 : vector<1x16x8xbf16> to vector<16x8xbf16>
    %4 = tpu.concatenate %1, %3 in 0 : vector<64x8xbf16>, vector<16x8xbf16> -> vector<80x8xbf16>
    %cst = arith.constant 0.000000e+00 : bf16
    %5 = vector.broadcast %cst : bf16 to vector<80x8xbf16>
    %6 = arith.cmpf oge, %4, %5 : vector<80x8xbf16>
    %cst_5 = arith.constant 1.000980e-01 : bf16
    %7 = vector.broadcast %cst_5 : bf16 to vector<80x8xbf16>
    %8 = arith.mulf %4, %7 : vector<80x8xbf16>
    %9 = arith.select %6, %4, %8 : vector<80x8xi1>, vector<80x8xbf16>
    %10 = vector.extract_strided_slice %9 {offsets = [0, 0], sizes = [64, 8], strides = [1, 1]} : vector<80x8xbf16> to vector<64x8xbf16>
    %11 = vector.extract_strided_slice %9 {offsets = [1, 0], sizes = [64, 8], strides = [1, 1]} : vector<80x8xbf16> to vector<64x8xbf16>
    %12 = vector.extract_strided_slice %9 {offsets = [2, 0], sizes = [64, 8], strides = [1, 1]} : vector<80x8xbf16> to vector<64x8xbf16>
    %13 = tpu.concatenate %10, %11, %12 in 1 : vector<64x8xbf16>, vector<64x8xbf16>, vector<64x8xbf16> -> vector<64x24xbf16>
    %c0_6 = arith.constant 0 : index
    %c0_7 = arith.constant 0 : index
    %14 = vector.load %arg4[%c0_6, %c0_7] : memref<24x8xbf16, #tpu.memory_space<vmem>>, vector<24x8xbf16>
    %cst_8 = arith.constant dense<0.000000e+00> : vector<64x8xf32>
    %15 = tpu.matmul %13, %14, %cst_8 {dimension_numbers = #tpu.dot_dimension_numbers<[1], [0], [0], [1], [0, 0, 1, 1], [], []>} : vector<64x24xbf16>, vector<24x8xbf16>, vector<64x8xf32> -> vector<64x8xf32>
    %c0_9 = arith.constant 0 : index
    %c0_10 = arith.constant 0 : index
    %16 = vector.load %arg5[%c0_9, %c0_10] : memref<1x8xf32, #tpu.memory_space<vmem>>, vector<1x8xf32>
    %17 = vector.broadcast %16 : vector<1x8xf32> to vector<64x8xf32>
    %18 = arith.addf %15, %17 : vector<64x8xf32>
    %c0_11 = arith.constant 0 : index
    %c0_12 = arith.constant 0 : index
    %c0_13 = arith.constant 0 : index
    %19 = vector.load %arg6[%c0_11, %c0_12, %c0_13] : memref<1x64x8xbf16, #tpu.memory_space<vmem>>, vector<1x64x8xbf16>
    %20 = vector.shape_cast %19 : vector<1x64x8xbf16> to vector<64x8xbf16>
    %21 = arith.extf %20 : vector<64x8xbf16> to vector<64x8xf32>
    %22 = arith.addf %18, %21 : vector<64x8xf32>
    %c0_14 = arith.constant 0 : index
    %c0_15 = arith.constant 0 : index
    %c0_16 = arith.constant 0 : index
    %23 = vector.load %arg7[%c0_14, %c0_15, %c0_16] : memref<1x64x8xbf16, #tpu.memory_space<vmem>>, vector<1x64x8xbf16>
    %24 = vector.shape_cast %23 : vector<1x64x8xbf16> to vector<64x8xbf16>
    %25 = arith.extf %24 : vector<64x8xbf16> to vector<64x8xf32>
    %26 = arith.addf %22, %25 : vector<64x8xf32>
    %27 = arith.truncf %26 : vector<64x8xf32> to vector<64x8xbf16>
    %c0_17 = arith.constant 0 : index
    %c0_18 = arith.constant 0 : index
    %c0_19 = arith.constant 0 : index
    %28 = vector.load %arg8[%c0_17, %c0_18, %c0_19] : memref<1x64x8xbf16, #tpu.memory_space<vmem>>, vector<1x64x8xbf16>
    %29 = vector.shape_cast %28 : vector<1x64x8xbf16> to vector<64x8xbf16>
    %30 = vector.shape_cast %27 : vector<64x8xbf16> to vector<1x64x8xbf16>
    tpu.vector_store %arg8[%c0_17, %c0_18, %c0_19], %30 {strides = array<i32>} : memref<1x64x8xbf16, #tpu.memory_space<vmem>>, vector<1x64x8xbf16>,
    return
  }
  func.func @transform_0(%arg0: i32, %arg1: i32) -> (i32, i32, i32) {
    %c0_i32 = arith.constant 0 : i32
    %c0_i32_0 = arith.constant 0 : i32
    return %arg0, %arg1, %c0_i32 : i32, i32, i32
  }
  func.func @transform_1(%arg0: i32, %arg1: i32) -> (i32, i32, i32) {
    %c1_i32 = arith.constant 1 : i32
    %0 = arith.addi %arg1, %c1_i32 : i32
    %c4_i32 = arith.constant 4 : i32
    %1 = arith.muli %0, %c4_i32 : i32
    %c0_i32 = arith.constant 0 : i32
    %c0_i32_0 = arith.constant 0 : i32
    return %arg0, %1, %c0_i32 : i32, i32, i32
  }
  func.func @transform_2(%arg0: i32, %arg1: i32) -> (i32, i32) {
    %c0_i32 = arith.constant 0 : i32
    %c0_i32_0 = arith.constant 0 : i32
    %c0_i32_1 = arith.constant 0 : i32
    return %c0_i32, %c0_i32_0 : i32, i32
  }
  func.func @transform_3(%arg0: i32, %arg1: i32) -> (i32, i32) {
    %c0_i32 = arith.constant 0 : i32
    %c0_i32_0 = arith.constant 0 : i32
    %c0_i32_1 = arith.constant 0 : i32
    return %c0_i32, %c0_i32_0 : i32, i32
  }
  func.func @transform_4(%arg0: i32, %arg1: i32) -> (i32, i32, i32) {
    %c0_i32 = arith.constant 0 : i32
    %c0_i32_0 = arith.constant 0 : i32
    return %arg0, %arg1, %c0_i32 : i32, i32, i32
  }
  func.func @transform_5(%arg0: i32, %arg1: i32) -> (i32, i32, i32) {
    %c0_i32 = arith.constant 0 : i32
    %c0_i32_0 = arith.constant 0 : i32
    return %arg0, %arg1, %c0_i32 : i32, i32, i32
  }
  func.func @transform_6(%arg0: i32, %arg1: i32) -> (i32, i32, i32) {
    %c0_i32 = arith.constant 0 : i32
    %c0_i32_0 = arith.constant 0 : i32
    return %arg0, %arg1, %c0_i32 : i32, i32, i32
  }
}

module attributes {stable_mosaic.version = 11 : i64} {
  func.func @_conv1d_kernel(%arg0: i32, %arg1: i32, %arg2: memref<1x64x8xbf16, #tpu.memory_space<vmem>>, %arg3: memref<1x16x8xbf16, #tpu.memory_space<vmem>>, %arg4: memref<56x1xbf16, #tpu.memory_space<vmem>>, %arg5: memref<1x1xf32, #tpu.memory_space<vmem>>, %arg6: memref<1x64x1xf32, #tpu.memory_space<vmem>>) attributes {dimension_semantics = [#tpu.dimension_semantics<parallel>, #tpu.dimension_semantics<parallel>], iteration_bounds = array<i64: 2, 1>, scalar_prefetch = 0 : i64, scratch_operands = 0 : i64, tpu.core_type = #tpu.core_type<tc>, window_params = [{transform_indices = @transform_0, window_bounds = array<i64: 1, 64, 8>}, {transform_indices = @transform_1, window_bounds = array<i64: 1, 16, 8>}, {pipeline_mode = #tpu.pipeline_mode<synchronous>, transform_indices = @transform_2, window_bounds = array<i64: 56, 1>}, {pipeline_mode = #tpu.pipeline_mode<synchronous>, transform_indices = @transform_3, window_bounds = array<i64: 1, 1>}, {transform_indices = @transform_4, window_bounds = array<i64: 1, 64, 1>}]} {
    %c0 = arith.constant 0 : index
    %c0_0 = arith.constant 0 : index
    %c0_1 = arith.constant 0 : index
    %0 = vector.load %arg2[%c0, %c0_0, %c0_1] : memref<1x64x8xbf16, #tpu.memory_space<vmem>>, vector<1x64x8xbf16>
    %1 = vector.shape_cast %0 : vector<1x64x8xbf16> to vector<64x8xbf16>
    %c0_2 = arith.constant 0 : index
    %c0_3 = arith.constant 0 : index
    %c0_4 = arith.constant 0 : index
    %2 = vector.load %arg3[%c0_2, %c0_3, %c0_4] : memref<1x16x8xbf16, #tpu.memory_space<vmem>>, vector<1x16x8xbf16>
    %3 = vector.shape_cast %2 : vector<1x16x8xbf16> to vector<16x8xbf16>
    %4 = tpu.concatenate %1, %3 in 0 : vector<64x8xbf16>, vector<16x8xbf16> -> vector<80x8xbf16>
    %cst = arith.constant 0.000000e+00 : bf16
    %5 = vector.broadcast %cst : bf16 to vector<80x8xbf16>
    %6 = arith.cmpf oge, %4, %5 : vector<80x8xbf16>
    %cst_5 = arith.constant 1.000980e-02 : bf16
    %7 = vector.broadcast %cst_5 : bf16 to vector<80x8xbf16>
    %8 = arith.mulf %4, %7 : vector<80x8xbf16>
    %9 = arith.select %6, %4, %8 : vector<80x8xi1>, vector<80x8xbf16>
    %10 = vector.extract_strided_slice %9 {offsets = [0, 0], sizes = [64, 8], strides = [1, 1]} : vector<80x8xbf16> to vector<64x8xbf16>
    %11 = vector.extract_strided_slice %9 {offsets = [1, 0], sizes = [64, 8], strides = [1, 1]} : vector<80x8xbf16> to vector<64x8xbf16>
    %12 = vector.extract_strided_slice %9 {offsets = [2, 0], sizes = [64, 8], strides = [1, 1]} : vector<80x8xbf16> to vector<64x8xbf16>
    %13 = vector.extract_strided_slice %9 {offsets = [3, 0], sizes = [64, 8], strides = [1, 1]} : vector<80x8xbf16> to vector<64x8xbf16>
    %14 = vector.extract_strided_slice %9 {offsets = [4, 0], sizes = [64, 8], strides = [1, 1]} : vector<80x8xbf16> to vector<64x8xbf16>
    %15 = vector.extract_strided_slice %9 {offsets = [5, 0], sizes = [64, 8], strides = [1, 1]} : vector<80x8xbf16> to vector<64x8xbf16>
    %16 = vector.extract_strided_slice %9 {offsets = [6, 0], sizes = [64, 8], strides = [1, 1]} : vector<80x8xbf16> to vector<64x8xbf16>
    %17 = tpu.concatenate %10, %11, %12, %13, %14, %15, %16 in 1 : vector<64x8xbf16>, vector<64x8xbf16>, vector<64x8xbf16>, vector<64x8xbf16>, vector<64x8xbf16>, vector<64x8xbf16>, vector<64x8xbf16> -> vector<64x56xbf16>
    %c0_6 = arith.constant 0 : index
    %c0_7 = arith.constant 0 : index
    %18 = vector.load %arg4[%c0_6, %c0_7] : memref<56x1xbf16, #tpu.memory_space<vmem>>, vector<56x1xbf16>
    %cst_8 = arith.constant dense<0.000000e+00> : vector<64x1xf32>
    %19 = tpu.matmul %17, %18, %cst_8 {dimension_numbers = #tpu.dot_dimension_numbers<[1], [0], [0], [1], [0, 0, 1, 1], [], []>} : vector<64x56xbf16>, vector<56x1xbf16>, vector<64x1xf32> -> vector<64x1xf32>
    %c0_9 = arith.constant 0 : index
    %c0_10 = arith.constant 0 : index
    %20 = vector.load %arg5[%c0_9, %c0_10] : memref<1x1xf32, #tpu.memory_space<vmem>>, vector<1x1xf32>
    %21 = vector.broadcast %20 : vector<1x1xf32> to vector<64x1xf32>
    %22 = arith.addf %19, %21 : vector<64x1xf32>
    %23 = math.tanh %22 : vector<64x1xf32>
    %c0_11 = arith.constant 0 : index
    %c0_12 = arith.constant 0 : index
    %c0_13 = arith.constant 0 : index
    %24 = vector.load %arg6[%c0_11, %c0_12, %c0_13] : memref<1x64x1xf32, #tpu.memory_space<vmem>>, vector<1x64x1xf32>
    %25 = vector.shape_cast %24 : vector<1x64x1xf32> to vector<64x1xf32>
    %26 = vector.shape_cast %23 : vector<64x1xf32> to vector<1x64x1xf32>
    tpu.vector_store %arg6[%c0_11, %c0_12, %c0_13], %26 {strides = array<i32>} : memref<1x64x1xf32, #tpu.memory_space<vmem>>, vector<1x64x1xf32>,
    return
  }
  func.func @transform_0(%arg0: i32, %arg1: i32) -> (i32, i32, i32) {
    %c0_i32 = arith.constant 0 : i32
    %c0_i32_0 = arith.constant 0 : i32
    return %arg0, %arg1, %c0_i32 : i32, i32, i32
  }
  func.func @transform_1(%arg0: i32, %arg1: i32) -> (i32, i32, i32) {
    %c1_i32 = arith.constant 1 : i32
    %0 = arith.addi %arg1, %c1_i32 : i32
    %c4_i32 = arith.constant 4 : i32
    %1 = arith.muli %0, %c4_i32 : i32
    %c0_i32 = arith.constant 0 : i32
    %c0_i32_0 = arith.constant 0 : i32
    return %arg0, %1, %c0_i32 : i32, i32, i32
  }
  func.func @transform_2(%arg0: i32, %arg1: i32) -> (i32, i32) {
    %c0_i32 = arith.constant 0 : i32
    %c0_i32_0 = arith.constant 0 : i32
    %c0_i32_1 = arith.constant 0 : i32
    return %c0_i32, %c0_i32_0 : i32, i32
  }
  func.func @transform_3(%arg0: i32, %arg1: i32) -> (i32, i32) {
    %c0_i32 = arith.constant 0 : i32
    %c0_i32_0 = arith.constant 0 : i32
    %c0_i32_1 = arith.constant 0 : i32
    return %c0_i32, %c0_i32_0 : i32, i32
  }
  func.func @transform_4(%arg0: i32, %arg1: i32) -> (i32, i32, i32) {
    %c0_i32 = arith.constant 0 : i32
    %c0_i32_0 = arith.constant 0 : i32
    return %arg0, %arg1, %c0_i32 : i32, i32, i32
  }
}

</mosaic_0001>

<bundles_post_ra>
// kernel: _lambda_.28
= control target key start
LH: loop header
LB: loop body
LE: loop exit
PB: predicated region body
PF: predicated region fallthrough
CT: control target
= control target key end

     0   :  { %s748_s15 = smov 0   ;;  %s750_s16 = smov 0   ;;  %s833_s0 = inlined_call_operand.vmem [shape: bf16[2,32,16], index: 0, kind: input, shape index: {}, may-alias: {0,1}]   ;;  %s834_s1 = inlined_call_operand.vmem [shape: bf16[2,32,16], index: 1, kind: input, shape index: {}, may-alias: {0,1}]   ;;  %s835_s2 = inlined_call_operand.vmem [shape: bf16[112,32], index: 2, kind: input, shape index: {}]   ;;  %s836_s3 = inlined_call_operand.vmem [shape: f32[1,32], index: 3, kind: input, shape index: {}]   ;;  %s837_s4 = inlined_call_operand.vmem [shape: bf16[2,16,32], index: 4, kind: output, shape index: {}]  }
   0x1   :  { %s752_s17 = smov 0  }
   0x2 LB: > { %s26_s18 = sadd.s32 1, %s709_s16  ;;  %p595_p0 = scmp.ge.s32.totalorder %s713_s17, 1  ;;  %s713_s17 = sphi %s752_s17, %s14_s17   ;;  %s709_s16 = sphi %s750_s16, %s839_s16   ;;  %s705_s15 = sphi %s748_s15, %s838_s15  }
   0x3   : > { %p28_p1 = scmp.ge.s32.totalorder %s26_s18, 2  ;;  %p204_p2 = scmp.lt.s32.totalorder %s713_s17, 3 }
   0x5   : > { %s841_s18 = smov (%p28_p1, %s26_s18), 0  ;;  %p205_p3 = pnand %p595_p0, %p204_p2 }
   0x6   : > { %p249_p4 = scmp.lt.s32.totalorder (!%p205_p3), %s705_s15, 1  ;;  %v684_v0 = vld [vmem:[%s835_s2] sm:$0xff] (!%p205_p3)   ;;  %v715_v1 = vmov (!%p205_p3), 0.0   ;;  %vm295_vm0 = vsmask.f32 (!%p205_p3), 7424  ;;  %v685_v2 = vld [vmem:[%s835_s2 + $0x8] sm:$0xff] (!%p205_p3)  }
   0x7   : > { %208 = sbr.rel (%p205_p3) target bundleno = 366 (0x16e), region = 36  ;;  %632 = vmatprep.subr.bf16.mxu0 (!%p205_p3), %v715_v1  ;;  %vm310_vm1 = vcmask (!%p205_p3), 1046528   ;;  %vm316_vm2 = vsmask.f32 (!%p205_p3), 6400  ;;  %vm328_vm3 = vcmask (!%p205_p3), 1045504   ;;  %v686_v5 = vld [vmem:[%s835_s2 + $0x10] sm:$0xff] (!%p205_p3)  }
   0x8   : > { %633 = vmatpush3.bf16.msra.mxu0 (!%p205_p3), %v684_v0  ;;  %vm334_vm4 = vsmask.f32 (!%p205_p3), 5376  ;;  %s716_s7 = smov (!%p205_p3), 32   ;;  %s717_s8 = smov (!%p205_p3), 64   ;;  %v687_v29 = vld [vmem:[%s835_s2 + $0x18] sm:$0xff] (!%p205_p3)   ;;  %vm344_vm5 = vcmask (!%p205_p3), 1044480  }
   0x9   : > { %634 = vmatprep.subr.bf16.mxu0 (!%p205_p3), %v715_v1  ;;  %s718_s11 = smov (!%p205_p3), 16   ;;  %s719_s12 = smov (!%p205_p3), 48   ;;  %v688_v37 = vld [vmem:[%s835_s2 + $0x20] sm:$0xff] (!%p205_p3)   ;;  %vm720_vm6 = vmmov (!%p205_p3), 0   ;;  %v689_v39 = vld [vmem:[%s835_s2 + $0x28] sm:$0xff] (!%p205_p3)   ;;  %v690_v40 = vld [vmem:[%s835_s2 + $0x30] sm:$0xff] (!%p205_p3)  }
   0xa   : > { %646 = vmatprep.mubr.msk.bf16.mxu0 (!%p205_p3), %vm720_vm6, %v715_v1  ;;  %s721_s19 = smov (!%p205_p3), 80   ;;  %s722_s20 = smov (!%p205_p3), 96   ;;  %vm350_vm7 = vcmask (!%p205_p3), 130048   ;;  %vm353_vm8 = vcmask (!%p205_p3), 261120   ;;  %vm356_vm9 = vcmask (!%p205_p3), 392192   ;;  %vm359_vm10 = vcmask (!%p205_p3), 523264  }
   0xb   : > { %vm362_vm11 = vcmask (!%p205_p3), 654336   ;;  %vm365_vm12 = vcmask (!%p205_p3), 785408   ;;  %vm431_vm13 = vcmask (!%p205_p3), 916480   ;;  %v604_v53 = vld [vmem:[%s836_s3] ss:$0 sm:$0xff] (!%p205_p3)  ;;  %vm483_vm14 = vcmask (!%p205_p3), 257024  }
   0xc   : > { %635 = vmatpush3.bf16.msra.mxu0 (!%p205_p3), %v685_v2 }
   0xd   : > { %636 = vmatprep.subr.bf16.mxu0 (!%p205_p3), %v715_v1 }
   0xe   : > { %s843_s15 = smov (!%p249_p4, %s705_s15), 1 }
   0xf   : > { %s617_s21 = sshll.u32 %s843_s15, 4 }
  0x10   : > { %s256_s26 = scalar_lea.vmem %s833_s0, %s617_s21  ;;  %s619_s27 = sadd.s32 8, %s617_s21  ;;  %637 = vmatpush3.bf16.msra.mxu0 %v686_v5 }
  0x11   : > { %s267_s30 = scalar_lea.vmem %s834_s1, %s619_s27  ;;  %v783_v3 = vld [vmem:[%s256_s26] sm:$0xff]   ;;  %638 = vmatprep.subr.bf16.mxu0 %v715_v1  ;;  %s620_s27 = sshll.u32 %s843_s15, 3 }
  0x12   : > { %v683_v4 = vld [vmem:[%s267_s30] sm:$0xff]   ;;  %v311_v6 = vrot.slane %v783_v3, 1  ;;  %v329_v7 = vrot.slane %v783_v3, 2  ;;  %v297_v8 = vshrl.u32 %v783_v3, 16  ;;  %v299_v9 = vshll.u32 %v783_v3, 16  ;;  %s278_s30 = scalar_lea.vmem %s837_s4, %s620_s27 }
  0x13   : > { %v312_v10 = vrot.slane %v683_v4, 1  ;;  %v330_v11 = vrot.slane %v683_v4, 2  ;;  %v304_v12 = vshll.u32 %v683_v4, 16  ;;  %v320_v13 = vshrl.u32 %v683_v4, 16 }
  0x14   : > { %v301_v14 = vrot.slane %v299_v9, 1  ;;  %v317_v15 = vrot.slane %v297_v8, 1  ;;  %v318_v16 = vrot.slane %v299_v9, 2  ;;  %v335_v17 = vrot.slane %v297_v8, 2  ;;  %639 = vmatpush3.bf16.msra.mxu0 %v687_v29 }
  0x15   : > { %v313_v18 = vsel %vm310_vm1, %v311_v6, %v312_v10  ;;  %v331_v19 = vsel %vm328_vm3, %v329_v7, %v330_v11  ;;  %v306_v20 = vrot.slane %v304_v12, 1  ;;  %v322_v21 = vrot.slane %v320_v13, 1  ;;  %640 = vmatprep.subr.bf16.mxu0 %v715_v1 }
  0x16   : > { %314 = vrot.lane.b32.xlu0 %v313_v18, %s716_s7  ;;  %332 = vrot.lane.b32.xlu1 %v331_v19, %s717_s8  ;;  %v302_v22 = vor.u32 %v301_v14, %v297_v8  ;;  %v319_v23 = vor.u32 %v318_v16, %v317_v15  ;;  %v323_v24 = vrot.slane %v304_v12, 2  ;;  %v336_v25 = vrot.slane %v299_v9, 3 }
  0x17   : > { %v338_v26 = vrot.slane %v320_v13, 2  ;;  %v339_v27 = vrot.slane %v304_v12, 3  ;;  %v345_v28 = vrot.slane %v783_v3, 3  ;;  %v346_v33 = vrot.slane %v683_v4, 3 }
  0x18   : > { %v307_v30 = vsel %vm295_vm0, %v302_v22, %v306_v20  ;;  %v324_v31 = vor.u32 %v323_v24, %v322_v21  ;;  %v337_v32 = vor.u32 %v336_v25, %v335_v17  ;;  %641 = vmatpush3.bf16.msra.mxu0 %v688_v37 }
  0x19   : > { %v340_v34 = vor.u32 %v339_v27, %v338_v26  ;;  %v347_v38 = vsel %vm344_vm5, %v345_v28, %v346_v33  ;;  %642 = vmatprep.subr.bf16.mxu0 %v715_v1 }
  0x1a   : > { %308 = vrot.lane.b32.xlu0 %v307_v30, %s718_s11  ;;  %v325_v35 = vsel %vm316_vm2, %v319_v23, %v324_v31 }
  0x1b   : > { %326 = vrot.lane.b32.xlu1 %v325_v35, %s719_s12  ;;  %v341_v36 = vsel %vm334_vm4, %v337_v32, %v340_v34 }
  0x1c   : > { %643 = vmatpush3.bf16.msra.mxu0 %v689_v39 }
  0x1d   : > { %644 = vmatprep.subr.bf16.mxu0 %v715_v1 }
  0x1e   : > { %342 = vrot.lane.b32.xlu0 %v341_v36, %s721_s19 }
  0x1f   : > { %348 = vrot.lane.b32.xlu1 %v347_v38, %s722_s20 }
  0x20   : > { %645 = vmatpush3.bf16.msra.mxu0 %v690_v40 }
  0x88   : > { %v315_v41 = vpop.permute.xlu0 %314  ;;  %v333_v42 = vpop.permute.xlu1 %332 }
  0x8c   : > { %v309_v43 = vpop.permute.xlu0 %308 }
  0x8d   : > { %v352_v44 = vsel %vm350_vm7, %v783_v3, %v309_v43  ;;  %v327_v45 = vpop.permute.xlu1 %326 }
  0x8e   : > { %v355_v46 = vsel %vm353_vm8, %v352_v44, %v315_v41 }
  0x8f   : > { %v358_v47 = vsel %vm356_vm9, %v355_v46, %v327_v45 }
  0x90   : > { %v361_v48 = vsel %vm359_vm10, %v358_v47, %v333_v42  ;;  %v343_v49 = vpop.permute.xlu0 %342 }
  0x91   : > { %v364_v50 = vsel %vm362_vm11, %v361_v48, %v343_v49  ;;  %v349_v51 = vpop.permute.xlu1 %348 }
  0x92   : > { %v367_v52 = vsel %vm365_vm12, %v364_v50, %v349_v51 }
  0x93   : > { %647 = vmatmul.mubr.msk.bf16.vlgmr.msra.gmra.mrb[0].mxu0 %vm431_vm13, %v367_v52 }
 0x166   : > { %v468_v54 = vpop.f32.mrb[0].mxu0 }
 0x167   : > { %v469_v55 = vadd.f32 %v604_v53, %v468_v54  ;;  %v648_v56 = vpop.f32.mrb[1].mxu0 }
 0x168   : > { %v471_v57 = vpop.f32.mrb[2].mxu0 }
 0x169   : > { %v621_v58 = vpack.c.bf16 %v469_v55, %v469_v55  ;;  %v472_v59 = vadd.f32 %v604_v53, %v471_v57  ;;  %v649_v60 = vpop.f32.mrb[3].mxu0 }
 0x16b   : > { %484 = vst.msk [vmem:[%s278_s30] sm:$0xf] %vm483_vm14, %v621_v58  ;;  %v622_v61 = vpack.c.bf16 %v472_v59, %v472_v59 }
 0x16d   : > { %485 = vst.msk [vmem:[%s278_s30 + $0x4] sm:$0xf] %vm483_vm14, %v622_v61 }
 0x16e PF: > { %s14_s17 = sadd.s32 1, %s713_s17   ;;  %s838_s15 = smov %s709_s16 }
 0x16f   : > { %p11_p5 = scmp.ge.s32.totalorder %s14_s17, 4   ;;  %s839_s16 = smov %s841_s18 }
 0x171   :  { %13 = sbr.rel (!%p11_p5) target bundleno = 2 (0x2), region = 69 }

// kernel: _lambda_.29
= control target key start
LH: loop header
LB: loop body
LE: loop exit
PB: predicated region body
PF: predicated region fallthrough
CT: control target
= control target key end

     0   :  { %s692_s15 = smov 0   ;;  %s694_s16 = smov 0   ;;  %s753_s0 = inlined_call_operand.vmem [shape: bf16[2,32,32], index: 0, kind: input, shape index: {}, may-alias: {0,1}]   ;;  %s754_s1 = inlined_call_operand.vmem [shape: bf16[2,32,32], index: 1, kind: input, shape index: {}, may-alias: {0,1}]   ;;  %s755_s2 = inlined_call_operand.vmem [shape: bf16[96,32], index: 2, kind: input, shape index: {}]   ;;  %s756_s3 = inlined_call_operand.vmem [shape: f32[1,32], index: 3, kind: input, shape index: {}]   ;;  %s757_s4 = inlined_call_operand.vmem [shape: bf16[2,16,32], index: 4, kind: output, shape index: {}]  }
   0x1   :  { %s696_s17 = smov 0  }
   0x2 LB: > { %s26_s18 = sadd.s32 1, %s657_s16  ;;  %p552_p0 = scmp.ge.s32.totalorder %s661_s17, 1  ;;  %s661_s17 = sphi %s696_s17, %s14_s17   ;;  %s657_s16 = sphi %s694_s16, %s759_s16   ;;  %s653_s15 = sphi %s692_s15, %s758_s15  }
   0x3   : > { %p28_p1 = scmp.ge.s32.totalorder %s26_s18, 2  ;;  %p204_p2 = scmp.lt.s32.totalorder %s661_s17, 3 }
   0x5   : > { %s761_s18 = smov (%p28_p1, %s26_s18), 0  ;;  %p205_p3 = pnand %p552_p0, %p204_p2 }
   0x6   : > { %p249_p4 = scmp.lt.s32.totalorder (!%p205_p3), %s653_s15, 1  ;;  %v663_v0 = vmov (!%p205_p3), 0.0   ;;  %v633_v1 = vld [vmem:[%s755_s2] sm:$0xff] (!%p205_p3)   ;;  %v634_v2 = vld [vmem:[%s755_s2 + $0x8] sm:$0xff] (!%p205_p3)   ;;  %v635_v3 = vld [vmem:[%s755_s2 + $0x10] sm:$0xff] (!%p205_p3)   ;;  %vm664_vm2 = vmmov (!%p205_p3), 0  }
   0x7   : > { %208 = sbr.rel (%p205_p3) target bundleno = 367 (0x16f), region = 36  ;;  %587 = vmatprep.subr.bf16.mxu0 (!%p205_p3), %v663_v0  ;;  %599 = vmatprep.mubr.msk.bf16.mxu0 (!%p205_p3), %vm664_vm2, %v663_v0  ;;  %v636_v12 = vld [vmem:[%s755_s2 + $0x18] sm:$0xff] (!%p205_p3)   ;;  %vm304_vm3 = vsmask.f32 (!%p205_p3), 7424  ;;  %v637_v19 = vld [vmem:[%s755_s2 + $0x20] sm:$0xff] (!%p205_p3)   ;;  %vm321_vm4 = vcmask (!%p205_p3), 1046528  }
   0x8   : > { %588 = vmatpush3.bf16.msra.mxu0 (!%p205_p3), %v633_v1  ;;  %s665_s11 = smov (!%p205_p3), 32   ;;  %v638_v22 = vld [vmem:[%s755_s2 + $0x28] sm:$0xff] (!%p205_p3)   ;;  %s666_s14 = smov (!%p205_p3), 64   ;;  %vm327_vm5 = vcmask (!%p205_p3), 261120   ;;  %vm330_vm6 = vcmask (!%p205_p3), 523264   ;;  %vm388_vm7 = vcmask (!%p205_p3), 785408  }
   0x9   : > { %589 = vmatprep.subr.bf16.mxu0 (!%p205_p3), %v663_v0  ;;  %v561_v27 = vld [vmem:[%s756_s3] ss:$0 sm:$0xff] (!%p205_p3)  ;;  %vm440_vm8 = vcmask (!%p205_p3), 257024  }
   0xc   : > { %590 = vmatpush3.bf16.msra.mxu0 (!%p205_p3), %v634_v2 }
   0xd   : > { %591 = vmatprep.subr.bf16.mxu0 (!%p205_p3), %v663_v0 }
   0xe   : > { %s763_s15 = smov (!%p249_p4, %s653_s15), 1 }
   0xf   : > { %s573_s23 = sshll.u32 %s763_s15, 4  ;;  %s576_s21 = sshll.u32 %s763_s15, 3 }
  0x10   : > { %s256_s26 = scalar_lea.vmem %s753_s0, %s573_s23  ;;  %s575_s27 = sadd.s32 8, %s573_s23  ;;  %592 = vmatpush3.bf16.msra.mxu0 %v635_v3 }
  0x11   : > { %s267_s6 = scalar_lea.vmem %s754_s1, %s575_s27  ;;  %v631_v4 = vld [vmem:[%s256_s26] sm:$0xff]   ;;  %593 = vmatprep.subr.bf16.mxu0 %v663_v0  ;;  %s278_s24 = scalar_lea.vmem %s757_s4, %s576_s21 }
  0x12   : > { %v632_v5 = vld [vmem:[%s267_s6] sm:$0xff]   ;;  %vm298_vm0 = vcmp.ge.bf16.partialorder %v631_v4, 0  ;;  %v300_v6 = vmul.bf16 1036860877, %v631_v4 }
  0x13   : > { %vm299_vm1 = vcmp.ge.bf16.partialorder %v632_v5, 0  ;;  %v301_v7 = vmul.bf16 1036860877, %v632_v5 }
  0x14   : > { %v302_v8 = vsel %vm298_vm0, %v631_v4, %v300_v6  ;;  %594 = vmatpush3.bf16.msra.mxu0 %v636_v12 }
  0x15   : > { %v303_v9 = vsel %vm299_vm1, %v632_v5, %v301_v7  ;;  %v306_v10 = vshrl.u32 %v302_v8, 16  ;;  %v308_v11 = vshll.u32 %v302_v8, 16  ;;  %v322_v17 = vrot.slane %v302_v8, 1  ;;  %595 = vmatprep.subr.bf16.mxu0 %v663_v0 }
  0x16   : > { %v313_v13 = vshll.u32 %v303_v9, 16  ;;  %v323_v18 = vrot.slane %v303_v9, 1 }
  0x17   : > { %v310_v14 = vrot.slane %v308_v11, 1 }
  0x18   : > { %v315_v15 = vrot.slane %v313_v13, 1  ;;  %v324_v21 = vsel %vm321_vm4, %v322_v17, %v323_v18  ;;  %596 = vmatpush3.bf16.msra.mxu0 %v637_v19 }
  0x19   : > { %v311_v16 = vor.u32 %v310_v14, %v306_v10  ;;  %597 = vmatprep.subr.bf16.mxu0 %v663_v0 }
  0x1b   : > { %v316_v20 = vsel %vm304_vm3, %v311_v16, %v315_v15 }
  0x1c   : > { %317 = vrot.lane.b32.xlu0 %v316_v20, %s665_s11  ;;  %598 = vmatpush3.bf16.msra.mxu0 %v638_v22 }
  0x20   : > { %325 = vrot.lane.b32.xlu0 %v324_v21, %s666_s14 }
  0x8e   : > { %v318_v23 = vpop.permute.xlu0 %317 }
  0x8f   : > { %v329_v24 = vsel %vm327_vm5, %v302_v8, %v318_v23 }
  0x92   : > { %v326_v25 = vpop.permute.xlu0 %325 }
  0x93   : > { %v332_v26 = vsel %vm330_vm6, %v329_v24, %v326_v25 }
  0x94   : > { %600 = vmatmul.mubr.msk.bf16.vlgmr.msra.gmra.mrb[0].mxu0 %vm388_vm7, %v332_v26 }
 0x167   : > { %v425_v28 = vpop.f32.mrb[0].mxu0 }
 0x168   : > { %v426_v29 = vadd.f32 %v561_v27, %v425_v28  ;;  %v601_v30 = vpop.f32.mrb[1].mxu0 }
 0x169   : > { %v428_v31 = vpop.f32.mrb[2].mxu0 }
 0x16a   : > { %v577_v32 = vpack.c.bf16 %v426_v29, %v426_v29  ;;  %v429_v33 = vadd.f32 %v561_v27, %v428_v31  ;;  %v602_v34 = vpop.f32.mrb[3].mxu0 }
 0x16c   : > { %441 = vst.msk [vmem:[%s278_s24] sm:$0xf] %vm440_vm8, %v577_v32  ;;  %v578_v35 = vpack.c.bf16 %v429_v33, %v429_v33 }
 0x16e   : > { %442 = vst.msk [vmem:[%s278_s24 + $0x4] sm:$0xf] %vm440_vm8, %v578_v35 }
 0x16f PF: > { %s14_s17 = sadd.s32 1, %s661_s17   ;;  %s758_s15 = smov %s657_s16 }
 0x170   : > { %p11_p5 = scmp.ge.s32.totalorder %s14_s17, 4   ;;  %s759_s16 = smov %s761_s18 }
 0x172   :  { %13 = sbr.rel (!%p11_p5) target bundleno = 2 (0x2), region = 69 }

// kernel: _lambda_.30
= control target key start
LH: loop header
LB: loop body
LE: loop exit
PB: predicated region body
PF: predicated region fallthrough
CT: control target
= control target key end

     0   :  { %s733_s15 = smov 0   ;;  %s735_s16 = smov 0   ;;  %s787_s0 = inlined_call_operand.vmem [shape: bf16[2,48,16], index: 0, kind: input, shape index: {}, may-alias: {0,1}]   ;;  %s788_s1 = inlined_call_operand.vmem [shape: bf16[2,48,16], index: 1, kind: input, shape index: {}, may-alias: {0,1}]   ;;  %s789_s2 = inlined_call_operand.vmem [shape: bf16[48,16], index: 2, kind: input, shape index: {}]   ;;  %s790_s3 = inlined_call_operand.vmem [shape: f32[1,16], index: 3, kind: input, shape index: {}]   ;;  %s791_s4 = inlined_call_operand.vmem [shape: bf16[2,32,16], index: 4, kind: output, shape index: {}]  }
   0x1   :  { %s737_s17 = smov 0  }
   0x2 LB: > { %s26_s18 = sadd.s32 1, %s700_s16  ;;  %p605_p0 = scmp.ge.s32.totalorder %s704_s17, 1  ;;  %s704_s17 = sphi %s737_s17, %s14_s17   ;;  %s700_s16 = sphi %s735_s16, %s793_s16   ;;  %s696_s15 = sphi %s733_s15, %s792_s15  }
   0x3   : > { %p28_p1 = scmp.ge.s32.totalorder %s26_s18, 2  ;;  %p216_p2 = scmp.lt.s32.totalorder %s704_s17, 3 }
   0x5   : > { %s795_s18 = smov (%p28_p1, %s26_s18), 0  ;;  %p217_p3 = pnand %p605_p0, %p216_p2 }
   0x6   : > { %p270_p4 = scmp.lt.s32.totalorder (!%p217_p3), %s696_s15, 1  ;;  %v679_v0 = vld [vmem:[%s789_s2] sm:$0xff] (!%p217_p3)   ;;  %v680_v1 = vld [vmem:[%s789_s2 + $0x8] sm:$0xff] (!%p217_p3)   ;;  %v681_v8 = vld [vmem:[%s789_s2 + $0x10] sm:$0xff] (!%p217_p3)   ;;  %vm370_vm3 = vcmask (!%p217_p3), 1046528   ;;  %s706_s7 = smov (!%p217_p3), 32  }
   0x7   : > { %220 = sbr.rel (%p217_p3) target bundleno = 370 (0x172), region = 36  ;;  %637 = vmatprep.subr.bf16.mxu0 (!%p217_p3), %v679_v0  ;;  %vm342_vm4 = vsmask.f32 (!%p217_p3), 7424  ;;  %s707_s8 = smov (!%p217_p3), 16   ;;  %vm380_vm5 = vcmask (!%p217_p3), 130048   ;;  %vm385_vm6 = vcmask (!%p217_p3), 261120  }
   0x8   : > { %638 = vmatpush3.bf16.msra.mxu0 (!%p217_p3), %v679_v0  ;;  %vm421_vm7 = vcmask (!%p217_p3), 392192   ;;  %v613_v37 = vld [vmem:[%s790_s3] ss:$0 sm:$0xff] (!%p217_p3)  ;;  %vm491_vm8 = vcmask (!%p217_p3), 125952  }
   0x9   : > { %639 = vmatprep.subr.bf16.mxu0 (!%p217_p3), %v680_v1 }
   0xc   : > { %640 = vmatpush3.bf16.msra.mxu0 (!%p217_p3), %v680_v1 }
   0xd   : > { %641 = vmatprep.subr.bf16.mxu0 (!%p217_p3), %v681_v8 }
   0xe   : > { %s797_s15 = smov (!%p270_p4, %s696_s15), 1 }
   0xf   : > { %s647_s23 = smul.u32 24, %s797_s15  ;;  %s627_s11 = sshll.u32 %s797_s15, 4 }
  0x10   : > { %642 = vmatpush3.bf16.msra.mxu0 %v681_v8  ;;  %s305_s14 = scalar_lea.vmem %s791_s4, %s627_s11 }
  0x11   : > { %s277_s26 = scalar_lea.vmem %s787_s0, %s647_s23  ;;  %s626_s27 = sadd.s32 16, %s647_s23 }
  0x12   : > { %s293_s30 = scalar_lea.vmem %s788_s1, %s626_s27  ;;  %v676_v2 = vld [vmem:[%s277_s26] sm:$0xff]   ;;  %v677_v3 = vld [vmem:[%s277_s26 + $0x8] sm:$0xff]  }
  0x13   : > { %v678_v4 = vld [vmem:[%s293_s30] sm:$0xff]   ;;  %vm333_vm0 = vcmp.ge.bf16.partialorder %v676_v2, 0  ;;  %vm334_vm1 = vcmp.ge.bf16.partialorder %v677_v3, 0  ;;  %v336_v5 = vmul.bf16 1036860877, %v676_v2 }
  0x14   : > { %v337_v6 = vmul.bf16 1036860877, %v677_v3  ;;  %vm335_vm2 = vcmp.ge.bf16.partialorder %v678_v4, 0  ;;  %v338_v7 = vmul.bf16 1036860877, %v678_v4 }
  0x15   : > { %v339_v9 = vsel %vm333_vm0, %v676_v2, %v336_v5 }
  0x16   : > { %v340_v10 = vsel %vm334_vm1, %v677_v3, %v337_v6  ;;  %v344_v11 = vshrl.u32 %v339_v9, 16  ;;  %v346_v12 = vshll.u32 %v339_v9, 16  ;;  %v371_v14 = vrot.slane %v339_v9, 1 }
  0x17   : > { %v351_v13 = vshll.u32 %v340_v10, 16  ;;  %v372_v15 = vrot.slane %v340_v10, 1  ;;  %v341_v16 = vsel %vm335_vm2, %v678_v4, %v338_v7  ;;  %v355_v17 = vshrl.u32 %v340_v10, 16 }
  0x18   : > { %v348_v18 = vrot.slane %v346_v12, 1  ;;  %v359_v20 = vshll.u32 %v341_v16, 16  ;;  %v374_v21 = vrot.slane %v341_v16, 1 }
  0x19   : > { %v353_v19 = vrot.slane %v351_v13, 1  ;;  %v373_v22 = vsel %vm370_vm3, %v371_v14, %v372_v15 }
  0x1a   : > { %v349_v23 = vor.u32 %v348_v18, %v344_v11  ;;  %376 = vrot.lane.b32.xlu1 %v373_v22, %s706_s7  ;;  %v361_v25 = vrot.slane %v359_v20, 1  ;;  %v375_v26 = vsel %vm370_vm3, %v372_v15, %v374_v21 }
  0x1b   : > { %v357_v24 = vor.u32 %v355_v17, %v353_v19 }
  0x1c   : > { %v354_v27 = vsel %vm342_vm4, %v349_v23, %v353_v19 }
  0x1d   : > { %363 = vrot.lane.b32.xlu0 %v354_v27, %s707_s8  ;;  %v362_v28 = vsel %vm342_vm4, %v357_v24, %v361_v25 }
  0x1e   : > { %378 = vrot.lane.b32.xlu1 %v375_v26, %s706_s7 }
  0x21   : > { %365 = vrot.lane.b32.xlu0 %v362_v28, %s707_s8 }
  0x8c   : > { %v377_v29 = vpop.permute.xlu1 %376 }
  0x8f   : > { %v364_v30 = vpop.permute.xlu0 %363 }
  0x90   : > { %v382_v31 = vsel %vm380_vm5, %v339_v9, %v364_v30  ;;  %v379_v33 = vpop.permute.xlu1 %378 }
  0x91   : > { %v387_v32 = vsel %vm385_vm6, %v382_v31, %v377_v29 }
  0x92   : > { %643 = vmatprep.mubr.msk.bf16.mxu0 %vm421_vm7, %v387_v32 }
  0x93   : > { %v366_v34 = vpop.permute.xlu0 %365 }
  0x94   : > { %v384_v35 = vsel %vm380_vm5, %v340_v10, %v366_v34 }
  0x95   : > { %v389_v36 = vsel %vm385_vm6, %v384_v35, %v379_v33 }
  0x96   : > { %644 = vmatmul.mubr.msk.bf16.vlgmr.msra.gmra.mrb[0].mxu0 %vm421_vm7, %v389_v36 }
 0x169   : > { %v645_v38 = vpop.f32.mrb[0].mxu0 }
 0x16a   : > { %v469_v39 = vadd.f32 %v645_v38, %v613_v37  ;;  %v460_v40 = vpop.f32.mrb[1].mxu0 }
 0x16b   : > { %v461_v41 = vadd.f32 %v613_v37, %v460_v40  ;;  %v646_v42 = vpop.f32.mrb[2].mxu0 }
 0x16c   : > { %v630_v43 = vpack.c.bf16 %v469_v39, %v469_v39  ;;  %v472_v44 = vadd.f32 %v646_v42, %v613_v37  ;;  %v463_v45 = vpop.f32.mrb[3].mxu0 }
 0x16d   : > { %v628_v46 = vpack.c.bf16 %v461_v41, %v461_v41  ;;  %v464_v47 = vadd.f32 %v613_v37, %v463_v45 }
 0x16e   : > { %494 = vst.msk [vmem:[%s305_s14 + $0x8] sm:$0xf] %vm491_vm8, %v630_v43  ;;  %v631_v48 = vpack.c.bf16 %v472_v44, %v472_v44 }
 0x16f   : > { %492 = vst.msk [vmem:[%s305_s14] sm:$0xf] %vm491_vm8, %v628_v46  ;;  %v629_v49 = vpack.c.bf16 %v464_v47, %v464_v47 }
 0x170   : > { %495 = vst.msk [vmem:[%s305_s14 + $0xc] sm:$0xf] %vm491_vm8, %v631_v48 }
 0x171   : > { %493 = vst.msk [vmem:[%s305_s14 + $0x4] sm:$0xf] %vm491_vm8, %v629_v49 }
 0x172 PF: > { %s14_s17 = sadd.s32 1, %s704_s17   ;;  %s792_s15 = smov %s700_s16 }
 0x173   : > { %p11_p5 = scmp.ge.s32.totalorder %s14_s17, 4   ;;  %s793_s16 = smov %s795_s18 }
 0x175   :  { %13 = sbr.rel (!%p11_p5) target bundleno = 2 (0x2), region = 69 }

// kernel: _lambda_.37
= control target key start
LH: loop header
LB: loop body
LE: loop exit
PB: predicated region body
PF: predicated region fallthrough
CT: control target
= control target key end

     0   :  { %s843_s18 = smov 0   ;;  %s845_s19 = smov 0   ;;  %s900_s0 = inlined_call_operand.vmem [shape: bf16[2,48,16], index: 0, kind: input, shape index: {}, may-alias: {0,1}]   ;;  %s901_s1 = inlined_call_operand.vmem [shape: bf16[2,48,16], index: 1, kind: input, shape index: {}, may-alias: {0,1}]   ;;  %s902_s2 = inlined_call_operand.vmem [shape: bf16[48,16], index: 2, kind: input, shape index: {}]   ;;  %s903_s3 = inlined_call_operand.vmem [shape: f32[1,16], index: 3, kind: input, shape index: {}]   ;;  %s904_s4 = inlined_call_operand.vmem [shape: bf16[2,32,16], index: 4, kind: input, shape index: {}]   ;;  %s905_s5 = inlined_call_operand.vmem [shape: bf16[2,32,16], index: 5, kind: output, shape index: {}]  }
   0x1   :  { %s847_s20 = smov 0  }
   0x2 LB: > { %s27_s21 = sadd.s32 1, %s805_s19  ;;  %p698_p0 = scmp.ge.s32.totalorder %s809_s20, 1  ;;  %s809_s20 = sphi %s847_s20, %s15_s20   ;;  %s805_s19 = sphi %s845_s19, %s907_s19   ;;  %s801_s18 = sphi %s843_s18, %s906_s18  }
   0x3   : > { %p29_p1 = scmp.ge.s32.totalorder %s27_s21, 2  ;;  %p258_p2 = scmp.lt.s32.totalorder %s809_s20, 3 }
   0x5   : > { %s909_s21 = smov (%p29_p1, %s27_s21), 0  ;;  %p259_p3 = pnand %p698_p0, %p258_p2 }
   0x6   : > { %p323_p4 = scmp.lt.s32.totalorder (!%p259_p3), %s801_s18, 1  ;;  %v784_v0 = vld [vmem:[%s902_s2] sm:$0xff] (!%p259_p3)   ;;  %v785_v1 = vld [vmem:[%s902_s2 + $0x8] sm:$0xff] (!%p259_p3)   ;;  %v786_v8 = vld [vmem:[%s902_s2 + $0x10] sm:$0xff] (!%p259_p3)   ;;  %vm433_vm3 = vcmask (!%p259_p3), 1046528   ;;  %s811_s11 = smov (!%p259_p3), 32  }
   0x7   : > { %262 = sbr.rel (%p259_p3) target bundleno = 372 (0x174), region = 40  ;;  %742 = vmatprep.subr.bf16.mxu0 (!%p259_p3), %v784_v0  ;;  %vm405_vm4 = vsmask.f32 (!%p259_p3), 7424  ;;  %s812_s12 = smov (!%p259_p3), 16   ;;  %vm443_vm5 = vcmask (!%p259_p3), 130048   ;;  %vm448_vm6 = vcmask (!%p259_p3), 261120  }
   0x8   : > { %743 = vmatpush3.bf16.msra.mxu0 (!%p259_p3), %v784_v0  ;;  %vm484_vm7 = vcmask (!%p259_p3), 392192   ;;  %v708_v39 = vld [vmem:[%s903_s3] ss:$0 sm:$0xff] (!%p259_p3)  ;;  %vm566_vm8 = vcmask (!%p259_p3), 125952  }
   0x9   : > { %744 = vmatprep.subr.bf16.mxu0 (!%p259_p3), %v785_v1 }
   0xc   : > { %745 = vmatpush3.bf16.msra.mxu0 (!%p259_p3), %v785_v1 }
   0xd   : > { %746 = vmatprep.subr.bf16.mxu0 (!%p259_p3), %v786_v8 }
   0xe   : > { %s911_s18 = smov (!%p323_p4, %s801_s18), 1 }
   0xf   : > { %s752_s26 = smul.u32 24, %s911_s18  ;;  %s722_s13 = sshll.u32 %s911_s18, 4 }
  0x10   : > { %747 = vmatpush3.bf16.msra.mxu0 %v786_v8  ;;  %s358_s16 = scalar_lea.vmem %s904_s4, %s722_s13  ;;  %s368_s24 = scalar_lea.vmem %s905_s5, %s722_s13 }
  0x11   : > { %s330_s29 = scalar_lea.vmem %s900_s0, %s752_s26  ;;  %s721_s30 = sadd.s32 16, %s752_s26  ;;  %v736_v37 = vld [vmem:[%s358_s16 + $0x8] sm:$0xff]   ;;  %v729_v38 = vld [vmem:[%s358_s16] sm:$0xff]  }
  0x12   : > { %s346_s8 = scalar_lea.vmem %s901_s1, %s721_s30  ;;  %v781_v2 = vld [vmem:[%s330_s29] sm:$0xff]   ;;  %v782_v3 = vld [vmem:[%s330_s29 + $0x8] sm:$0xff]   ;;  %v734_v40 = vunpack.c.l.bf16 %v736_v37  ;;  %v730_v42 = vunpack.c.l.bf16 %v729_v38  ;;  %v735_v45 = vunpack.c.h.bf16 %v736_v37  ;;  %v731_v48 = vunpack.c.h.bf16 %v729_v38 }
  0x13   : > { %v783_v4 = vld [vmem:[%s346_s8] sm:$0xff]   ;;  %vm396_vm0 = vcmp.ge.bf16.partialorder %v781_v2, 0  ;;  %vm397_vm1 = vcmp.ge.bf16.partialorder %v782_v3, 0  ;;  %v399_v5 = vmul.bf16 1036860877, %v781_v2 }
  0x14   : > { %v400_v6 = vmul.bf16 1036860877, %v782_v3  ;;  %vm398_vm2 = vcmp.ge.bf16.partialorder %v783_v4, 0  ;;  %v401_v7 = vmul.bf16 1036860877, %v783_v4 }
  0x15   : > { %v402_v9 = vsel %vm396_vm0, %v781_v2, %v399_v5 }
  0x16   : > { %v403_v10 = vsel %vm397_vm1, %v782_v3, %v400_v6  ;;  %v407_v11 = vshrl.u32 %v402_v9, 16  ;;  %v409_v12 = vshll.u32 %v402_v9, 16  ;;  %v434_v14 = vrot.slane %v402_v9, 1 }
  0x17   : > { %v414_v13 = vshll.u32 %v403_v10, 16  ;;  %v435_v15 = vrot.slane %v403_v10, 1  ;;  %v404_v16 = vsel %vm398_vm2, %v783_v4, %v401_v7  ;;  %v418_v17 = vshrl.u32 %v403_v10, 16 }
  0x18   : > { %v411_v18 = vrot.slane %v409_v12, 1  ;;  %v422_v20 = vshll.u32 %v404_v16, 16  ;;  %v437_v21 = vrot.slane %v404_v16, 1 }
  0x19   : > { %v416_v19 = vrot.slane %v414_v13, 1  ;;  %v436_v22 = vsel %vm433_vm3, %v434_v14, %v435_v15 }
  0x1a   : > { %v412_v23 = vor.u32 %v411_v18, %v407_v11  ;;  %439 = vrot.lane.b32.xlu1 %v436_v22, %s811_s11  ;;  %v424_v25 = vrot.slane %v422_v20, 1  ;;  %v438_v26 = vsel %vm433_vm3, %v435_v15, %v437_v21 }
  0x1b   : > { %v420_v24 = vor.u32 %v418_v17, %v416_v19 }
  0x1c   : > { %v417_v27 = vsel %vm405_vm4, %v412_v23, %v416_v19 }
  0x1d   : > { %426 = vrot.lane.b32.xlu0 %v417_v27, %s812_s12  ;;  %v425_v28 = vsel %vm405_vm4, %v420_v24, %v424_v25 }
  0x1e   : > { %441 = vrot.lane.b32.xlu1 %v438_v26, %s811_s11 }
  0x21   : > { %428 = vrot.lane.b32.xlu0 %v425_v28, %s812_s12 }
  0x8c   : > { %v440_v29 = vpop.permute.xlu1 %439 }
  0x8f   : > { %v427_v30 = vpop.permute.xlu0 %426 }
  0x90   : > { %v445_v31 = vsel %vm443_vm5, %v402_v9, %v427_v30  ;;  %v442_v33 = vpop.permute.xlu1 %441 }
  0x91   : > { %v450_v32 = vsel %vm448_vm6, %v445_v31, %v440_v29 }
  0x92   : > { %748 = vmatprep.mubr.msk.bf16.mxu0 %vm484_vm7, %v450_v32 }
  0x93   : > { %v429_v34 = vpop.permute.xlu0 %428 }
  0x94   : > { %v447_v35 = vsel %vm443_vm5, %v403_v10, %v429_v34 }
  0x95   : > { %v452_v36 = vsel %vm448_vm6, %v447_v35, %v442_v33 }
  0x96   : > { %749 = vmatmul.mubr.msk.bf16.vlgmr.msra.gmra.mrb[0].mxu0 %vm484_vm7, %v452_v36 }
 0x169   : > { %v750_v41 = vpop.f32.mrb[0].mxu0 }
 0x16a   : > { %v532_v43 = vadd.f32 %v750_v41, %v708_v39  ;;  %v523_v44 = vpop.f32.mrb[1].mxu0 }
 0x16b   : > { %v524_v46 = vadd.f32 %v708_v39, %v523_v44  ;;  %v751_v47 = vpop.f32.mrb[2].mxu0 }
 0x16c   : > { %v548_v49 = vadd.f32 %v734_v40, %v532_v43  ;;  %v535_v50 = vadd.f32 %v751_v47, %v708_v39  ;;  %v526_v51 = vpop.f32.mrb[3].mxu0 }
 0x16d   : > { %v546_v52 = vadd.f32 %v730_v42, %v524_v46  ;;  %v527_v53 = vadd.f32 %v708_v39, %v526_v51 }
 0x16e   : > { %v726_v54 = vpack.c.bf16 %v548_v49, %v548_v49  ;;  %v549_v55 = vadd.f32 %v735_v45, %v535_v50 }
 0x16f   : > { %v724_v56 = vpack.c.bf16 %v546_v52, %v546_v52  ;;  %v547_v57 = vadd.f32 %v731_v48, %v527_v53 }
 0x170   : > { %569 = vst.msk [vmem:[%s368_s24 + $0x8] sm:$0xf] %vm566_vm8, %v726_v54  ;;  %v727_v58 = vpack.c.bf16 %v549_v55, %v549_v55 }
 0x171   : > { %567 = vst.msk [vmem:[%s368_s24] sm:$0xf] %vm566_vm8, %v724_v56  ;;  %v725_v59 = vpack.c.bf16 %v547_v57, %v547_v57 }
 0x172   : > { %570 = vst.msk [vmem:[%s368_s24 + $0xc] sm:$0xf] %vm566_vm8, %v727_v58 }
 0x173   : > { %568 = vst.msk [vmem:[%s368_s24 + $0x4] sm:$0xf] %vm566_vm8, %v725_v59 }
 0x174 PF: > { %s15_s20 = sadd.s32 1, %s809_s20   ;;  %s906_s18 = smov %s805_s19 }
 0x175   : > { %p12_p5 = scmp.ge.s32.totalorder %s15_s20, 4   ;;  %s907_s19 = smov %s909_s21 }
 0x177   :  { %14 = sbr.rel (!%p12_p5) target bundleno = 2 (0x2), region = 76 }

// kernel: _lambda_.34
= control target key start
LH: loop header
LB: loop body
LE: loop exit
PB: predicated region body
PF: predicated region fallthrough
CT: control target
= control target key end

     0   :  { %s739_s15 = smov 0   ;;  %s741_s16 = smov 0   ;;  %s795_s0 = inlined_call_operand.vmem [shape: bf16[2,48,16], index: 0, kind: input, shape index: {}, may-alias: {0,1}]   ;;  %s796_s1 = inlined_call_operand.vmem [shape: bf16[2,48,16], index: 1, kind: input, shape index: {}, may-alias: {0,1}]   ;;  %s797_s2 = inlined_call_operand.vmem [shape: bf16[48,16], index: 2, kind: input, shape index: {}]   ;;  %s798_s3 = inlined_call_operand.vmem [shape: f32[1,16], index: 3, kind: input, shape index: {}]   ;;  %s799_s4 = inlined_call_operand.vmem [shape: bf16[2,32,16], index: 4, kind: output, shape index: {}]  }
   0x1   :  { %s743_s17 = smov 0  }
   0x2 LB: > { %s26_s18 = sadd.s32 1, %s706_s16  ;;  %p611_p0 = scmp.ge.s32.totalorder %s710_s17, 1  ;;  %s710_s17 = sphi %s743_s17, %s14_s17   ;;  %s706_s16 = sphi %s741_s16, %s801_s16   ;;  %s702_s15 = sphi %s739_s15, %s800_s15  }
   0x3   : > { %p28_p1 = scmp.ge.s32.totalorder %s26_s18, 2  ;;  %p216_p2 = scmp.lt.s32.totalorder %s710_s17, 3 }
   0x5   : > { %s803_s18 = smov (%p28_p1, %s26_s18), 0  ;;  %p217_p3 = pnand %p611_p0, %p216_p2 }
   0x6   : > { %p270_p4 = scmp.lt.s32.totalorder (!%p217_p3), %s702_s15, 1  ;;  %v685_v0 = vld [vmem:[%s797_s2] sm:$0xff] (!%p217_p3)   ;;  %v686_v1 = vld [vmem:[%s797_s2 + $0x8] sm:$0xff] (!%p217_p3)   ;;  %v687_v8 = vld [vmem:[%s797_s2 + $0x10] sm:$0xff] (!%p217_p3)   ;;  %vm376_vm3 = vcmask (!%p217_p3), 1042432   ;;  %s712_s7 = smov (!%p217_p3), 32  }
   0x7   : > { %220 = sbr.rel (%p217_p3) target bundleno = 371 (0x173), region = 36  ;;  %643 = vmatprep.subr.bf16.mxu0 (!%p217_p3), %v685_v0  ;;  %vm342_vm4 = vsmask.f32 (!%p217_p3), 5376  ;;  %s713_s8 = smov (!%p217_p3), 16   ;;  %vm386_vm5 = vcmask (!%p217_p3), 130048   ;;  %vm391_vm6 = vcmask (!%p217_p3), 261120  }
   0x8   : > { %644 = vmatpush3.bf16.msra.mxu0 (!%p217_p3), %v685_v0  ;;  %vm427_vm7 = vcmask (!%p217_p3), 392192   ;;  %v619_v42 = vld [vmem:[%s798_s3] ss:$0 sm:$0xff] (!%p217_p3)  ;;  %vm497_vm8 = vcmask (!%p217_p3), 125952  }
   0x9   : > { %645 = vmatprep.subr.bf16.mxu0 (!%p217_p3), %v686_v1 }
   0xc   : > { %646 = vmatpush3.bf16.msra.mxu0 (!%p217_p3), %v686_v1 }
   0xd   : > { %647 = vmatprep.subr.bf16.mxu0 (!%p217_p3), %v687_v8 }
   0xe   : > { %s805_s15 = smov (!%p270_p4, %s702_s15), 1 }
   0xf   : > { %s653_s23 = smul.u32 24, %s805_s15  ;;  %s633_s11 = sshll.u32 %s805_s15, 4 }
  0x10   : > { %648 = vmatpush3.bf16.msra.mxu0 %v687_v8  ;;  %s305_s14 = scalar_lea.vmem %s799_s4, %s633_s11 }
  0x11   : > { %s277_s26 = scalar_lea.vmem %s795_s0, %s653_s23  ;;  %s632_s27 = sadd.s32 16, %s653_s23 }
  0x12   : > { %s293_s30 = scalar_lea.vmem %s796_s1, %s632_s27  ;;  %v682_v2 = vld [vmem:[%s277_s26] sm:$0xff]   ;;  %v683_v3 = vld [vmem:[%s277_s26 + $0x8] sm:$0xff]  }
  0x13   : > { %v684_v4 = vld [vmem:[%s293_s30] sm:$0xff]   ;;  %vm333_vm0 = vcmp.ge.bf16.partialorder %v682_v2, 0  ;;  %vm334_vm1 = vcmp.ge.bf16.partialorder %v683_v3, 0  ;;  %v336_v5 = vmul.bf16 1036860877, %v682_v2 }
  0x14   : > { %v337_v6 = vmul.bf16 1036860877, %v683_v3  ;;  %vm335_vm2 = vcmp.ge.bf16.partialorder %v684_v4, 0  ;;  %v338_v7 = vmul.bf16 1036860877, %v684_v4 }
  0x15   : > { %v339_v9 = vsel %vm333_vm0, %v682_v2, %v336_v5 }
  0x16   : > { %v340_v10 = vsel %vm334_vm1, %v683_v3, %v337_v6  ;;  %v344_v11 = vshrl.u32 %v339_v9, 16  ;;  %v347_v12 = vshll.u32 %v339_v9, 16  ;;  %v377_v15 = vrot.slane %v339_v9, 5 }
  0x17   : > { %v352_v13 = vshrl.u32 %v340_v10, 16  ;;  %v355_v14 = vshll.u32 %v340_v10, 16  ;;  %v378_v16 = vrot.slane %v340_v10, 5  ;;  %v341_v17 = vsel %vm335_vm2, %v684_v4, %v338_v7 }
  0x18   : > { %v346_v18 = vrot.slane %v344_v11, 2  ;;  %v349_v19 = vrot.slane %v347_v12, 3  ;;  %v361_v23 = vshrl.u32 %v341_v17, 16  ;;  %v364_v24 = vshll.u32 %v341_v17, 16 }
  0x19   : > { %v354_v20 = vrot.slane %v352_v13, 2  ;;  %v357_v21 = vrot.slane %v355_v14, 3  ;;  %v379_v22 = vsel %vm376_vm3, %v377_v15, %v378_v16  ;;  %v380_v25 = vrot.slane %v341_v17, 5 }
  0x1a   : > { %v350_v26 = vor.u32 %v349_v19, %v346_v18  ;;  %382 = vrot.lane.b32.xlu1 %v379_v22, %s712_s7  ;;  %v363_v28 = vrot.slane %v361_v23, 2  ;;  %v366_v29 = vrot.slane %v364_v24, 3 }
  0x1b   : > { %v358_v27 = vor.u32 %v357_v21, %v354_v20  ;;  %v381_v30 = vsel %vm376_vm3, %v378_v16, %v380_v25 }
  0x1c   : > { %v367_v32 = vor.u32 %v366_v29, %v363_v28 }
  0x1d   : > { %v359_v31 = vsel %vm342_vm4, %v350_v26, %v358_v27 }
  0x1e   : > { %369 = vrot.lane.b32.xlu0 %v359_v31, %s713_s8  ;;  %384 = vrot.lane.b32.xlu1 %v381_v30, %s712_s7  ;;  %v368_v33 = vsel %vm342_vm4, %v358_v27, %v367_v32 }
  0x22   : > { %371 = vrot.lane.b32.xlu0 %v368_v33, %s713_s8 }
  0x8c   : > { %v383_v34 = vpop.permute.xlu1 %382 }
  0x90   : > { %v370_v35 = vpop.permute.xlu0 %369  ;;  %v385_v38 = vpop.permute.xlu1 %384 }
  0x91   : > { %v388_v36 = vsel %vm386_vm5, %v339_v9, %v370_v35 }
  0x92   : > { %v393_v37 = vsel %vm391_vm6, %v388_v36, %v383_v34 }
  0x93   : > { %649 = vmatprep.mubr.msk.bf16.mxu0 %vm427_vm7, %v393_v37 }
  0x94   : > { %v372_v39 = vpop.permute.xlu0 %371 }
  0x95   : > { %v390_v40 = vsel %vm386_vm5, %v340_v10, %v372_v39 }
  0x96   : > { %v395_v41 = vsel %vm391_vm6, %v390_v40, %v385_v38 }
  0x97   : > { %650 = vmatmul.mubr.msk.bf16.vlgmr.msra.gmra.mrb[0].mxu0 %vm427_vm7, %v395_v41 }
 0x16a   : > { %v651_v43 = vpop.f32.mrb[0].mxu0 }
 0x16b   : > { %v475_v44 = vadd.f32 %v651_v43, %v619_v42  ;;  %v466_v45 = vpop.f32.mrb[1].mxu0 }
 0x16c   : > { %v467_v46 = vadd.f32 %v619_v42, %v466_v45  ;;  %v652_v47 = vpop.f32.mrb[2].mxu0 }
 0x16d   : > { %v636_v48 = vpack.c.bf16 %v475_v44, %v475_v44  ;;  %v478_v49 = vadd.f32 %v652_v47, %v619_v42  ;;  %v469_v50 = vpop.f32.mrb[3].mxu0 }
 0x16e   : > { %v634_v51 = vpack.c.bf16 %v467_v46, %v467_v46  ;;  %v470_v52 = vadd.f32 %v619_v42, %v469_v50 }
 0x16f   : > { %500 = vst.msk [vmem:[%s305_s14 + $0x8] sm:$0xf] %vm497_vm8, %v636_v48  ;;  %v637_v53 = vpack.c.bf16 %v478_v49, %v478_v49 }
 0x170   : > { %498 = vst.msk [vmem:[%s305_s14] sm:$0xf] %vm497_vm8, %v634_v51  ;;  %v635_v54 = vpack.c.bf16 %v470_v52, %v470_v52 }
 0x171   : > { %501 = vst.msk [vmem:[%s305_s14 + $0xc] sm:$0xf] %vm497_vm8, %v637_v53 }
 0x172   : > { %499 = vst.msk [vmem:[%s305_s14 + $0x4] sm:$0xf] %vm497_vm8, %v635_v54 }
 0x173 PF: > { %s14_s17 = sadd.s32 1, %s710_s17   ;;  %s800_s15 = smov %s706_s16 }
 0x174   : > { %p11_p5 = scmp.ge.s32.totalorder %s14_s17, 4   ;;  %s801_s16 = smov %s803_s18 }
 0x176   :  { %13 = sbr.rel (!%p11_p5) target bundleno = 2 (0x2), region = 69 }

// kernel: _lambda_.32
= control target key start
LH: loop header
LB: loop body
LE: loop exit
PB: predicated region body
PF: predicated region fallthrough
CT: control target
= control target key end

     0   :  { %s739_s15 = smov 0   ;;  %s741_s16 = smov 0   ;;  %s795_s0 = inlined_call_operand.vmem [shape: bf16[2,48,16], index: 0, kind: input, shape index: {}, may-alias: {0,1}]   ;;  %s796_s1 = inlined_call_operand.vmem [shape: bf16[2,48,16], index: 1, kind: input, shape index: {}, may-alias: {0,1}]   ;;  %s797_s2 = inlined_call_operand.vmem [shape: bf16[48,16], index: 2, kind: input, shape index: {}]   ;;  %s798_s3 = inlined_call_operand.vmem [shape: f32[1,16], index: 3, kind: input, shape index: {}]   ;;  %s799_s4 = inlined_call_operand.vmem [shape: bf16[2,32,16], index: 4, kind: output, shape index: {}]  }
   0x1   :  { %s743_s17 = smov 0  }
   0x2 LB: > { %s26_s18 = sadd.s32 1, %s706_s16  ;;  %p611_p0 = scmp.ge.s32.totalorder %s710_s17, 1  ;;  %s710_s17 = sphi %s743_s17, %s14_s17   ;;  %s706_s16 = sphi %s741_s16, %s801_s16   ;;  %s702_s15 = sphi %s739_s15, %s800_s15  }
   0x3   : > { %p28_p1 = scmp.ge.s32.totalorder %s26_s18, 2  ;;  %p216_p2 = scmp.lt.s32.totalorder %s710_s17, 3 }
   0x5   : > { %s803_s18 = smov (%p28_p1, %s26_s18), 0  ;;  %p217_p3 = pnand %p611_p0, %p216_p2 }
   0x6   : > { %p270_p4 = scmp.lt.s32.totalorder (!%p217_p3), %s702_s15, 1  ;;  %v685_v0 = vld [vmem:[%s797_s2] sm:$0xff] (!%p217_p3)   ;;  %v686_v1 = vld [vmem:[%s797_s2 + $0x8] sm:$0xff] (!%p217_p3)   ;;  %v687_v8 = vld [vmem:[%s797_s2 + $0x10] sm:$0xff] (!%p217_p3)   ;;  %vm376_vm3 = vcmask (!%p217_p3), 1044480   ;;  %s712_s7 = smov (!%p217_p3), 32  }
   0x7   : > { %220 = sbr.rel (%p217_p3) target bundleno = 371 (0x173), region = 36  ;;  %643 = vmatprep.subr.bf16.mxu0 (!%p217_p3), %v685_v0  ;;  %vm342_vm4 = vsmask.f32 (!%p217_p3), 6400  ;;  %s713_s8 = smov (!%p217_p3), 16   ;;  %vm386_vm5 = vcmask (!%p217_p3), 130048   ;;  %vm391_vm6 = vcmask (!%p217_p3), 261120  }
   0x8   : > { %644 = vmatpush3.bf16.msra.mxu0 (!%p217_p3), %v685_v0  ;;  %vm427_vm7 = vcmask (!%p217_p3), 392192   ;;  %v619_v42 = vld [vmem:[%s798_s3] ss:$0 sm:$0xff] (!%p217_p3)  ;;  %vm497_vm8 = vcmask (!%p217_p3), 125952  }
   0x9   : > { %645 = vmatprep.subr.bf16.mxu0 (!%p217_p3), %v686_v1 }
   0xc   : > { %646 = vmatpush3.bf16.msra.mxu0 (!%p217_p3), %v686_v1 }
   0xd   : > { %647 = vmatprep.subr.bf16.mxu0 (!%p217_p3), %v687_v8 }
   0xe   : > { %s805_s15 = smov (!%p270_p4, %s702_s15), 1 }
   0xf   : > { %s653_s23 = smul.u32 24, %s805_s15  ;;  %s633_s11 = sshll.u32 %s805_s15, 4 }
  0x10   : > { %648 = vmatpush3.bf16.msra.mxu0 %v687_v8  ;;  %s305_s14 = scalar_lea.vmem %s799_s4, %s633_s11 }
  0x11   : > { %s277_s26 = scalar_lea.vmem %s795_s0, %s653_s23  ;;  %s632_s27 = sadd.s32 16, %s653_s23 }
  0x12   : > { %s293_s30 = scalar_lea.vmem %s796_s1, %s632_s27  ;;  %v682_v2 = vld [vmem:[%s277_s26] sm:$0xff]   ;;  %v683_v3 = vld [vmem:[%s277_s26 + $0x8] sm:$0xff]  }
  0x13   : > { %v684_v4 = vld [vmem:[%s293_s30] sm:$0xff]   ;;  %vm333_vm0 = vcmp.ge.bf16.partialorder %v682_v2, 0  ;;  %vm334_vm1 = vcmp.ge.bf16.partialorder %v683_v3, 0  ;;  %v336_v5 = vmul.bf16 1036860877, %v682_v2 }
  0x14   : > { %v337_v6 = vmul.bf16 1036860877, %v683_v3  ;;  %vm335_vm2 = vcmp.ge.bf16.partialorder %v684_v4, 0  ;;  %v338_v7 = vmul.bf16 1036860877, %v684_v4 }
  0x15   : > { %v339_v9 = vsel %vm333_vm0, %v682_v2, %v336_v5 }
  0x16   : > { %v340_v10 = vsel %vm334_vm1, %v683_v3, %v337_v6  ;;  %v344_v11 = vshrl.u32 %v339_v9, 16  ;;  %v347_v12 = vshll.u32 %v339_v9, 16  ;;  %v377_v15 = vrot.slane %v339_v9, 3 }
  0x17   : > { %v352_v13 = vshrl.u32 %v340_v10, 16  ;;  %v355_v14 = vshll.u32 %v340_v10, 16  ;;  %v378_v16 = vrot.slane %v340_v10, 3  ;;  %v341_v17 = vsel %vm335_vm2, %v684_v4, %v338_v7 }
  0x18   : > { %v346_v18 = vrot.slane %v344_v11, 1  ;;  %v349_v19 = vrot.slane %v347_v12, 2  ;;  %v361_v23 = vshrl.u32 %v341_v17, 16  ;;  %v364_v24 = vshll.u32 %v341_v17, 16 }
  0x19   : > { %v354_v20 = vrot.slane %v352_v13, 1  ;;  %v357_v21 = vrot.slane %v355_v14, 2  ;;  %v379_v22 = vsel %vm376_vm3, %v377_v15, %v378_v16  ;;  %v380_v25 = vrot.slane %v341_v17, 3 }
  0x1a   : > { %v350_v26 = vor.u32 %v349_v19, %v346_v18  ;;  %382 = vrot.lane.b32.xlu1 %v379_v22, %s712_s7  ;;  %v363_v28 = vrot.slane %v361_v23, 1  ;;  %v366_v29 = vrot.slane %v364_v24, 2 }
  0x1b   : > { %v358_v27 = vor.u32 %v357_v21, %v354_v20  ;;  %v381_v30 = vsel %vm376_vm3, %v378_v16, %v380_v25 }
  0x1c   : > { %v367_v32 = vor.u32 %v366_v29, %v363_v28 }
  0x1d   : > { %v359_v31 = vsel %vm342_vm4, %v350_v26, %v358_v27 }
  0x1e   : > { %369 = vrot.lane.b32.xlu0 %v359_v31, %s713_s8  ;;  %384 = vrot.lane.b32.xlu1 %v381_v30, %s712_s7  ;;  %v368_v33 = vsel %vm342_vm4, %v358_v27, %v367_v32 }
  0x22   : > { %371 = vrot.lane.b32.xlu0 %v368_v33, %s713_s8 }
  0x8c   : > { %v383_v34 = vpop.permute.xlu1 %382 }
  0x90   : > { %v370_v35 = vpop.permute.xlu0 %369  ;;  %v385_v38 = vpop.permute.xlu1 %384 }
  0x91   : > { %v388_v36 = vsel %vm386_vm5, %v339_v9, %v370_v35 }
  0x92   : > { %v393_v37 = vsel %vm391_vm6, %v388_v36, %v383_v34 }
  0x93   : > { %649 = vmatprep.mubr.msk.bf16.mxu0 %vm427_vm7, %v393_v37 }
  0x94   : > { %v372_v39 = vpop.permute.xlu0 %371 }
  0x95   : > { %v390_v40 = vsel %vm386_vm5, %v340_v10, %v372_v39 }
  0x96   : > { %v395_v41 = vsel %vm391_vm6, %v390_v40, %v385_v38 }
  0x97   : > { %650 = vmatmul.mubr.msk.bf16.vlgmr.msra.gmra.mrb[0].mxu0 %vm427_vm7, %v395_v41 }
 0x16a   : > { %v651_v43 = vpop.f32.mrb[0].mxu0 }
 0x16b   : > { %v475_v44 = vadd.f32 %v651_v43, %v619_v42  ;;  %v466_v45 = vpop.f32.mrb[1].mxu0 }
 0x16c   : > { %v467_v46 = vadd.f32 %v619_v42, %v466_v45  ;;  %v652_v47 = vpop.f32.mrb[2].mxu0 }
 0x16d   : > { %v636_v48 = vpack.c.bf16 %v475_v44, %v475_v44  ;;  %v478_v49 = vadd.f32 %v652_v47, %v619_v42  ;;  %v469_v50 = vpop.f32.mrb[3].mxu0 }
 0x16e   : > { %v634_v51 = vpack.c.bf16 %v467_v46, %v467_v46  ;;  %v470_v52 = vadd.f32 %v619_v42, %v469_v50 }
 0x16f   : > { %500 = vst.msk [vmem:[%s305_s14 + $0x8] sm:$0xf] %vm497_vm8, %v636_v48  ;;  %v637_v53 = vpack.c.bf16 %v478_v49, %v478_v49 }
 0x170   : > { %498 = vst.msk [vmem:[%s305_s14] sm:$0xf] %vm497_vm8, %v634_v51  ;;  %v635_v54 = vpack.c.bf16 %v470_v52, %v470_v52 }
 0x171   : > { %501 = vst.msk [vmem:[%s305_s14 + $0xc] sm:$0xf] %vm497_vm8, %v637_v53 }
 0x172   : > { %499 = vst.msk [vmem:[%s305_s14 + $0x4] sm:$0xf] %vm497_vm8, %v635_v54 }
 0x173 PF: > { %s14_s17 = sadd.s32 1, %s710_s17   ;;  %s800_s15 = smov %s706_s16 }
 0x174   : > { %p11_p5 = scmp.ge.s32.totalorder %s14_s17, 4   ;;  %s801_s16 = smov %s803_s18 }
 0x176   :  { %13 = sbr.rel (!%p11_p5) target bundleno = 2 (0x2), region = 69 }

// kernel: _lambda_.41
= control target key start
LH: loop header
LB: loop body
LE: loop exit
PB: predicated region body
PF: predicated region fallthrough
CT: control target
= control target key end

     0   :  { %s953_s21 = smov 0   ;;  %s955_s22 = smov 0   ;;  %s1013_s0 = inlined_call_operand.vmem [shape: bf16[2,48,16], index: 0, kind: input, shape index: {}, may-alias: {0,1}]   ;;  %s1014_s1 = inlined_call_operand.vmem [shape: bf16[2,48,16], index: 1, kind: input, shape index: {}, may-alias: {0,1}]   ;;  %s1015_s2 = inlined_call_operand.vmem [shape: bf16[48,16], index: 2, kind: input, shape index: {}]   ;;  %s1016_s3 = inlined_call_operand.vmem [shape: f32[1,16], index: 3, kind: input, shape index: {}]   ;;  %s1017_s4 = inlined_call_operand.vmem [shape: bf16[2,32,16], index: 4, kind: input, shape index: {}]   ;;  %s1018_s5 = inlined_call_operand.vmem [shape: bf16[2,32,16], index: 5, kind: input, shape index: {}]   ;;  %s1019_s6 = inlined_call_operand.vmem [shape: bf16[2,32,16], index: 6, kind: output, shape index: {}]  }
   0x1   :  { %s957_s23 = smov 0  }
   0x2 LB: > { %s28_s24 = sadd.s32 1, %s910_s22  ;;  %p791_p0 = scmp.ge.s32.totalorder %s914_s23, 1  ;;  %s914_s23 = sphi %s957_s23, %s16_s23   ;;  %s910_s22 = sphi %s955_s22, %s1021_s22   ;;  %s906_s21 = sphi %s953_s21, %s1020_s21  }
   0x3   : > { %p30_p1 = scmp.ge.s32.totalorder %s28_s24, 2  ;;  %p300_p2 = scmp.lt.s32.totalorder %s914_s23, 3 }
   0x5   : > { %s1023_s24 = smov (%p30_p1, %s28_s24), 0  ;;  %p301_p3 = pnand %p791_p0, %p300_p2 }
   0x6   : > { %p376_p4 = scmp.lt.s32.totalorder (!%p301_p3), %s906_s21, 1  ;;  %v889_v0 = vld [vmem:[%s1015_s2] sm:$0xff] (!%p301_p3)   ;;  %v890_v1 = vld [vmem:[%s1015_s2 + $0x8] sm:$0xff] (!%p301_p3)   ;;  %v891_v8 = vld [vmem:[%s1015_s2 + $0x10] sm:$0xff] (!%p301_p3)   ;;  %vm496_vm3 = vcmask (!%p301_p3), 1046528   ;;  %s916_s15 = smov (!%p301_p3), 32  }
   0x7   : > { %304 = sbr.rel (%p301_p3) target bundleno = 374 (0x176), region = 44  ;;  %847 = vmatprep.subr.bf16.mxu0 (!%p301_p3), %v889_v0  ;;  %vm468_vm4 = vsmask.f32 (!%p301_p3), 7424  ;;  %s917_s16 = smov (!%p301_p3), 16   ;;  %vm506_vm5 = vcmask (!%p301_p3), 130048   ;;  %vm511_vm6 = vcmask (!%p301_p3), 261120  }
   0x8   : > { %848 = vmatpush3.bf16.msra.mxu0 (!%p301_p3), %v889_v0  ;;  %vm547_vm7 = vcmask (!%p301_p3), 392192   ;;  %v803_v39 = vld [vmem:[%s1016_s3] ss:$0 sm:$0xff] (!%p301_p3)  ;;  %vm641_vm8 = vcmask (!%p301_p3), 125952  }
   0x9   : > { %849 = vmatprep.subr.bf16.mxu0 (!%p301_p3), %v890_v1 }
   0xc   : > { %850 = vmatpush3.bf16.msra.mxu0 (!%p301_p3), %v890_v1 }
   0xd   : > { %851 = vmatprep.subr.bf16.mxu0 (!%p301_p3), %v891_v8 }
   0xe   : > { %s1025_s21 = smov (!%p376_p4, %s906_s21), 1 }
   0xf   : > { %s857_s29 = smul.u32 24, %s1025_s21  ;;  %s817_s17 = sshll.u32 %s1025_s21, 4 }
  0x10   : > { %852 = vmatpush3.bf16.msra.mxu0 %v891_v8  ;;  %s411_s20 = scalar_lea.vmem %s1017_s4, %s817_s17  ;;  %s421_s27 = scalar_lea.vmem %s1018_s5, %s817_s17 }
  0x11   : > { %s383_s8 = scalar_lea.vmem %s1013_s0, %s857_s29  ;;  %s816_s9 = sadd.s32 16, %s857_s29  ;;  %v840_v37 = vld [vmem:[%s411_s20 + $0x8] sm:$0xff]   ;;  %v825_v38 = vld [vmem:[%s411_s20] sm:$0xff]  }
  0x12   : > { %s399_s12 = scalar_lea.vmem %s1014_s1, %s816_s9  ;;  %v886_v2 = vld [vmem:[%s383_s8] sm:$0xff]   ;;  %v887_v3 = vld [vmem:[%s383_s8 + $0x8] sm:$0xff]   ;;  %v830_v41 = vunpack.c.l.bf16 %v840_v37  ;;  %v826_v44 = vunpack.c.l.bf16 %v825_v38  ;;  %v831_v48 = vunpack.c.h.bf16 %v840_v37  ;;  %v827_v52 = vunpack.c.h.bf16 %v825_v38  ;;  %s431_s7 = scalar_lea.vmem %s1019_s6, %s817_s17 }
  0x13   : > { %v888_v4 = vld [vmem:[%s399_s12] sm:$0xff]   ;;  %vm459_vm0 = vcmp.ge.bf16.partialorder %v886_v2, 0  ;;  %vm460_vm1 = vcmp.ge.bf16.partialorder %v887_v3, 0  ;;  %v462_v5 = vmul.bf16 1036860877, %v886_v2  ;;  %v841_v40 = vld [vmem:[%s421_s27 + $0x8] sm:$0xff]  }
  0x14   : > { %v463_v6 = vmul.bf16 1036860877, %v887_v3  ;;  %vm461_vm2 = vcmp.ge.bf16.partialorder %v888_v4, 0  ;;  %v464_v7 = vmul.bf16 1036860877, %v888_v4  ;;  %v833_v42 = vld [vmem:[%s421_s27] sm:$0xff]   ;;  %v838_v46 = vunpack.c.l.bf16 %v841_v40 }
  0x15   : > { %v465_v9 = vsel %vm459_vm0, %v886_v2, %v462_v5  ;;  %v834_v50 = vunpack.c.l.bf16 %v833_v42  ;;  %v839_v55 = vunpack.c.h.bf16 %v841_v40  ;;  %v835_v59 = vunpack.c.h.bf16 %v833_v42 }
  0x16   : > { %v466_v10 = vsel %vm460_vm1, %v887_v3, %v463_v6  ;;  %v470_v11 = vshrl.u32 %v465_v9, 16  ;;  %v472_v12 = vshll.u32 %v465_v9, 16  ;;  %v497_v14 = vrot.slane %v465_v9, 1 }
  0x17   : > { %v477_v13 = vshll.u32 %v466_v10, 16  ;;  %v498_v15 = vrot.slane %v466_v10, 1  ;;  %v467_v16 = vsel %vm461_vm2, %v888_v4, %v464_v7  ;;  %v481_v17 = vshrl.u32 %v466_v10, 16 }
  0x18   : > { %v474_v18 = vrot.slane %v472_v12, 1  ;;  %v485_v20 = vshll.u32 %v467_v16, 16  ;;  %v500_v21 = vrot.slane %v467_v16, 1 }
  0x19   : > { %v479_v19 = vrot.slane %v477_v13, 1  ;;  %v499_v22 = vsel %vm496_vm3, %v497_v14, %v498_v15 }
  0x1a   : > { %v475_v23 = vor.u32 %v474_v18, %v470_v11  ;;  %502 = vrot.lane.b32.xlu1 %v499_v22, %s916_s15  ;;  %v487_v25 = vrot.slane %v485_v20, 1  ;;  %v501_v26 = vsel %vm496_vm3, %v498_v15, %v500_v21 }
  0x1b   : > { %v483_v24 = vor.u32 %v481_v17, %v479_v19 }
  0x1c   : > { %v480_v27 = vsel %vm468_vm4, %v475_v23, %v479_v19 }
  0x1d   : > { %489 = vrot.lane.b32.xlu0 %v480_v27, %s917_s16  ;;  %v488_v28 = vsel %vm468_vm4, %v483_v24, %v487_v25 }
  0x1e   : > { %504 = vrot.lane.b32.xlu1 %v501_v26, %s916_s15 }
  0x21   : > { %491 = vrot.lane.b32.xlu0 %v488_v28, %s917_s16 }
  0x8c   : > { %v503_v29 = vpop.permute.xlu1 %502 }
  0x8f   : > { %v490_v30 = vpop.permute.xlu0 %489 }
  0x90   : > { %v508_v31 = vsel %vm506_vm5, %v465_v9, %v490_v30  ;;  %v505_v33 = vpop.permute.xlu1 %504 }
  0x91   : > { %v513_v32 = vsel %vm511_vm6, %v508_v31, %v503_v29 }
  0x92   : > { %853 = vmatprep.mubr.msk.bf16.mxu0 %vm547_vm7, %v513_v32 }
  0x93   : > { %v492_v34 = vpop.permute.xlu0 %491 }
  0x94   : > { %v510_v35 = vsel %vm506_vm5, %v466_v10, %v492_v34 }
  0x95   : > { %v515_v36 = vsel %vm511_vm6, %v510_v35, %v505_v33 }
  0x96   : > { %854 = vmatmul.mubr.msk.bf16.vlgmr.msra.gmra.mrb[0].mxu0 %vm547_vm7, %v515_v36 }
 0x169   : > { %v855_v43 = vpop.f32.mrb[0].mxu0 }
 0x16a   : > { %v595_v45 = vadd.f32 %v855_v43, %v803_v39  ;;  %v586_v47 = vpop.f32.mrb[1].mxu0 }
 0x16b   : > { %v587_v49 = vadd.f32 %v803_v39, %v586_v47  ;;  %v856_v51 = vpop.f32.mrb[2].mxu0 }
 0x16c   : > { %v611_v53 = vadd.f32 %v830_v41, %v595_v45  ;;  %v598_v54 = vadd.f32 %v856_v51, %v803_v39  ;;  %v589_v56 = vpop.f32.mrb[3].mxu0 }
 0x16d   : > { %v609_v57 = vadd.f32 %v826_v44, %v587_v49  ;;  %v590_v58 = vadd.f32 %v803_v39, %v589_v56 }
 0x16e   : > { %v623_v60 = vadd.f32 %v838_v46, %v611_v53  ;;  %v612_v61 = vadd.f32 %v831_v48, %v598_v54 }
 0x16f   : > { %v621_v62 = vadd.f32 %v834_v50, %v609_v57  ;;  %v610_v63 = vadd.f32 %v827_v52, %v590_v58 }
 0x170   : > { %v822_v0 = vpack.c.bf16 %v623_v60, %v623_v60  ;;  %v624_v1 = vadd.f32 %v839_v55, %v612_v61 }
 0x171   : > { %v820_v2 = vpack.c.bf16 %v621_v62, %v621_v62  ;;  %v622_v3 = vadd.f32 %v835_v59, %v610_v63 }
 0x172   : > { %644 = vst.msk [vmem:[%s431_s7 + $0x8] sm:$0xf] %vm641_vm8, %v822_v0  ;;  %v823_v4 = vpack.c.bf16 %v624_v1, %v624_v1 }
 0x173   : > { %642 = vst.msk [vmem:[%s431_s7] sm:$0xf] %vm641_vm8, %v820_v2  ;;  %v821_v5 = vpack.c.bf16 %v622_v3, %v622_v3 }
 0x174   : > { %645 = vst.msk [vmem:[%s431_s7 + $0xc] sm:$0xf] %vm641_vm8, %v823_v4 }
 0x175   : > { %643 = vst.msk [vmem:[%s431_s7 + $0x4] sm:$0xf] %vm641_vm8, %v821_v5 }
 0x176 PF: > { %s16_s23 = sadd.s32 1, %s914_s23   ;;  %s1020_s21 = smov %s910_s22 }
 0x177   : > { %p13_p5 = scmp.ge.s32.totalorder %s16_s23, 4   ;;  %s1021_s22 = smov %s1023_s24 }
 0x179   :  { %15 = sbr.rel (!%p13_p5) target bundleno = 2 (0x2), region = 83 }

// kernel: _lambda_.43
= control target key start
LH: loop header
LB: loop body
LE: loop exit
PB: predicated region body
PF: predicated region fallthrough
CT: control target
= control target key end

     0   :  { %s846_s15 = smov 0   ;;  %s848_s16 = smov 0   ;;  %s942_s0 = inlined_call_operand.vmem [shape: bf16[2,80,8], index: 0, kind: input, shape index: {}, may-alias: {0,1}]   ;;  %s943_s1 = inlined_call_operand.vmem [shape: bf16[2,80,8], index: 1, kind: input, shape index: {}, may-alias: {0,1}]   ;;  %s944_s2 = inlined_call_operand.vmem [shape: bf16[24,8], index: 2, kind: input, shape index: {}]   ;;  %s945_s3 = inlined_call_operand.vmem [shape: f32[1,8], index: 3, kind: input, shape index: {}]   ;;  %s946_s4 = inlined_call_operand.vmem [shape: bf16[2,64,8], index: 4, kind: output, shape index: {}]  }
   0x1   :  { %s850_s17 = smov 0  }
   0x2 LB: > { %s26_s18 = sadd.s32 1, %s813_s16  ;;  %p697_p0 = scmp.ge.s32.totalorder %s817_s17, 1  ;;  %s817_s17 = sphi %s850_s17, %s14_s17   ;;  %s813_s16 = sphi %s848_s16, %s948_s16   ;;  %s809_s15 = sphi %s846_s15, %s947_s15  }
   0x3   : > { %p28_p1 = scmp.ge.s32.totalorder %s26_s18, 2  ;;  %p216_p2 = scmp.lt.s32.totalorder %s817_s17, 3 }
   0x5   : > { %s950_s18 = smov (%p28_p1, %s26_s18), 0  ;;  %p217_p3 = pnand %p697_p0, %p216_p2 }
   0x6   : > { %p270_p4 = scmp.lt.s32.totalorder (!%p217_p3), %s809_s15, 1  ;;  %vm414_vm2 = vcmask (!%p217_p3), 1046528   ;;  %v793_v11 = vld [vmem:[%s944_s2] sm:$0xff] (!%p217_p3)   ;;  %s819_s29 = smov (!%p217_p3), 16   ;;  %v794_v34 = vld [vmem:[%s944_s2 + $0x8] ss:$0 sps:$4 sm:$0xff] (!%p217_p3)  }
   0x7   : > { %220 = sbr.rel (%p217_p3) target bundleno = 377 (0x179), region = 36  ;;  %741 = vmatprep.subr.bf16.mxu0 (!%p217_p3), %v793_v11  ;;  %753 = vmatprep.subr.bf16.mxu1 (!%p217_p3), %v793_v11  ;;  %vm364_vm6 = vsmask.f32 (!%p217_p3), 7424  ;;  %vm478_vm7 = vcmask (!%p217_p3), 1043456   ;;  %s820_s6 = smov (!%p217_p3), 8   ;;  %vm432_vm8 = vcmask (!%p217_p3), 64512  }
   0x8   : > { %742 = vmatpush3.bf16.msra.mxu0 (!%p217_p3), %v793_v11  ;;  %755 = vmatpush3.bf16.msra.mxu1 (!%p217_p3), %v793_v11  ;;  %v480_v42 = vsel (!%p217_p3), %vm478_vm7, %v794_v34, 0  ;;  %vm441_vm9 = vcmask (!%p217_p3), 130048   ;;  %vm469_vm10 = vcmask (!%p217_p3), 195584   ;;  %vm579_vm11 = vcmask (!%p217_p3), 60416  }
   0x9   : > { %757 = vmatprep.subr.msk.bf16.mxu0 (!%p217_p3), %vm478_vm7, %v794_v34  ;;  %758 = vmatprep.subr.msk.bf16.mxu1 (!%p217_p3), %vm478_vm7, %v794_v34 }
   0xc   : > { %744 = vmatpush3.bf16.msra.mxu0 (!%p217_p3), %v480_v42  ;;  %756 = vmatpush3.bf16.msra.mxu1 (!%p217_p3), %v480_v42 }
   0xe   : > { %s952_s15 = smov (!%p270_p4, %s809_s15), 1 }
   0xf   : > { %s759_s19 = smul.u32 40, %s952_s15  ;;  %s726_s9 = sshll.u32 %s952_s15, 5 }
  0x10   : > { %s305_s12 = scalar_lea.vmem %s946_s4, %s726_s9 }
  0x11   : > { %s277_s22 = scalar_lea.vmem %s942_s0, %s759_s19  ;;  %s725_s23 = sadd.s32 32, %s759_s19 }
  0x12   : > { %v788_v0 = vld [vmem:[%s277_s22 + $0x10] sm:$0xff]   ;;  %v789_v1 = vld [vmem:[%s277_s22 + $0x18] sm:$0xff]   ;;  %s293_s26 = scalar_lea.vmem %s943_s1, %s725_s23  ;;  %v790_v4 = vld [vmem:[%s277_s22] sm:$0xff]  }
  0x13   : > { %vm351_vm0 = vcmp.ge.bf16.partialorder %v788_v0, 0  ;;  %vm352_vm1 = vcmp.ge.bf16.partialorder %v789_v1, 0  ;;  %v356_v2 = vmul.bf16 1036860877, %v788_v0  ;;  %v357_v3 = vmul.bf16 1036860877, %v789_v1 }
  0x14   : > { %v791_v5 = vld [vmem:[%s277_s22 + $0x8] sm:$0xff]   ;;  %v792_v8 = vld [vmem:[%s293_s26] sm:$0xff]   ;;  %vm349_vm3 = vcmp.ge.bf16.partialorder %v790_v4, 0  ;;  %v354_v12 = vmul.bf16 1036860877, %v790_v4 }
  0x15   : > { %v873_v6 = vsel %vm351_vm0, %v788_v0, %v356_v2  ;;  %v875_v7 = vsel %vm352_vm1, %v789_v1, %v357_v3  ;;  %vm350_vm4 = vcmp.ge.bf16.partialorder %v791_v5, 0  ;;  %v355_v13 = vmul.bf16 1036860877, %v791_v5  ;;  %v707_v1 = vld [vmem:[%s945_s3] ss:$0 sm:$0xff] }
  0x16   : > { %v418_v9 = vrot.slane %v873_v6, 1  ;;  %v420_v10 = vrot.slane %v875_v7, 1  ;;  %v381_v14 = vshll.u32 %v873_v6, 16  ;;  %vm353_vm5 = vcmp.ge.bf16.partialorder %v792_v8, 0 }
  0x17   : > { %v358_v16 = vmul.bf16 1036860877, %v792_v8  ;;  %v389_v17 = vshll.u32 %v875_v7, 16  ;;  %v359_v18 = vsel %vm349_vm3, %v790_v4, %v354_v12  ;;  %v886_v19 = vsel %vm350_vm4, %v791_v5, %v355_v13 }
  0x18   : > { %v421_v15 = vsel %vm414_vm2, %v418_v9, %v420_v10  ;;  %v393_v20 = vshrl.u32 %v875_v7, 16  ;;  %v385_v21 = vshrl.u32 %v873_v6, 16  ;;  %v415_v22 = vrot.slane %v359_v18, 1 }
  0x19   : > { %428 = vrot.lane.b32.xlu1 %v421_v15, %s819_s29  ;;  %v416_v23 = vrot.slane %v886_v19, 1  ;;  %v373_v24 = vshll.u32 %v886_v19, 16  ;;  %v377_v25 = vshrl.u32 %v886_v19, 16  ;;  %v366_v26 = vshrl.u32 %v359_v18, 16 }
  0x1a   : > { %v368_v27 = vshll.u32 %v359_v18, 16  ;;  %v363_v28 = vsel %vm353_vm5, %v792_v8, %v358_v16  ;;  %v391_v29 = vrot.slane %v389_v17, 1  ;;  %v383_v32 = vrot.slane %v381_v14, 1 }
  0x1b   : > { %v417_v30 = vsel %vm414_vm2, %v415_v22, %v416_v23  ;;  %v375_v31 = vrot.slane %v373_v24, 1  ;;  %v397_v33 = vshll.u32 %v363_v28, 16  ;;  %v422_v45 = vrot.slane %v363_v28, 1 }
  0x1c   : > { %424 = vrot.lane.b32.xlu0 %v417_v30, %s819_s29  ;;  %v370_v35 = vrot.slane %v368_v27, 1  ;;  %v395_v37 = vor.u32 %v393_v20, %v391_v29  ;;  %v387_v40 = vor.u32 %v385_v21, %v383_v32  ;;  %v419_v48 = vsel %vm414_vm2, %v416_v23, %v418_v9 }
  0x1d   : > { %v379_v36 = vor.u32 %v377_v25, %v375_v31  ;;  %v399_v38 = vrot.slane %v397_v33, 1  ;;  %v423_v47 = vsel %vm414_vm2, %v420_v10, %v422_v45 }
  0x1e   : > { %v371_v39 = vor.u32 %v370_v35, %v366_v26  ;;  %v392_v46 = vsel %vm364_vm6, %v387_v40, %v391_v29 }
  0x1f   : > { %v384_v41 = vsel %vm364_vm6, %v379_v36, %v383_v32  ;;  %v400_v44 = vsel %vm364_vm6, %v395_v37, %v399_v38 }
  0x20   : > { %403 = vrot.lane.b32.xlu1 %v384_v41, %s820_s6  ;;  %v376_v43 = vsel %vm364_vm6, %v371_v39, %v375_v31 }
  0x21   : > { %401 = vrot.lane.b32.xlu0 %v376_v43, %s820_s6 }
  0x24   : > { %407 = vrot.lane.b32.xlu1 %v400_v44, %s820_s6 }
  0x25   : > { %405 = vrot.lane.b32.xlu0 %v392_v46, %s820_s6 }
  0x28   : > { %430 = vrot.lane.b32.xlu1 %v423_v47, %s819_s29 }
  0x29   : > { %426 = vrot.lane.b32.xlu0 %v419_v48, %s819_s29 }
  0x8b   : > { %v429_v49 = vpop.permute.xlu1 %428 }
  0x8e   : > { %v425_v50 = vpop.permute.xlu0 %424 }
  0x92   : > { %v404_v51 = vpop.permute.xlu1 %403 }
  0x93   : > { %v402_v52 = vpop.permute.xlu0 %401  ;;  %v436_v61 = vsel %vm432_vm8, %v886_v19, %v404_v51 }
  0x94   : > { %v434_v53 = vsel %vm432_vm8, %v359_v18, %v402_v52 }
  0x95   : > { %v443_v54 = vsel %vm441_vm9, %v434_v53, %v425_v50 }
  0x96   : > { %745 = vmatprep.mubr.msk.bf16.mxu0 %vm469_vm10, %v443_v54  ;;  %v408_v55 = vpop.permute.xlu1 %407 }
  0x97   : > { %v406_v56 = vpop.permute.xlu0 %405  ;;  %v440_v59 = vsel %vm432_vm8, %v875_v7, %v408_v55 }
  0x98   : > { %v438_v57 = vsel %vm432_vm8, %v873_v6, %v406_v56 }
  0x99   : > { %v447_v58 = vsel %vm441_vm9, %v438_v57, %v429_v49 }
  0x9a   : > { %749 = vmatprep.mubr.msk.bf16.mxu1 %vm469_vm10, %v447_v58  ;;  %v431_v60 = vpop.permute.xlu1 %430 }
  0x9b   : > { %v449_v62 = vsel %vm441_vm9, %v440_v59, %v431_v60  ;;  %v427_v63 = vpop.permute.xlu0 %426 }
  0x9c   : > { %v445_v0 = vsel %vm441_vm9, %v436_v61, %v427_v63  ;;  %750 = vmatmul.mubr.msk.bf16.vlgmr.msra.gmra.mrb[0].mxu1 %vm469_vm10, %v449_v62 }
  0x9d   : > { %746 = vmatmul.mubr.msk.bf16.vlgmr.msra.gmra.mrb[0].mxu0 %vm469_vm10, %v445_v0 }
 0x16f   : > { %v751_v2 = vpop.f32.mrb[0].mxu1 }
 0x170   : > { %v747_v3 = vpop.f32.mrb[0].mxu0  ;;  %v541_v4 = vadd.f32 %v751_v2, %v707_v1  ;;  %v532_v5 = vpop.f32.mrb[1].mxu1 }
 0x171   : > { %v525_v6 = vadd.f32 %v747_v3, %v707_v1  ;;  %v516_v7 = vpop.f32.mrb[1].mxu0  ;;  %v533_v8 = vadd.f32 %v707_v1, %v532_v5  ;;  %v752_v9 = vpop.f32.mrb[2].mxu1 }
 0x172   : > { %v733_v10 = vpack.c.bf16 %v541_v4, %v541_v4  ;;  %v517_v11 = vadd.f32 %v707_v1, %v516_v7  ;;  %v748_v12 = vpop.f32.mrb[2].mxu0  ;;  %v544_v13 = vadd.f32 %v752_v9, %v707_v1  ;;  %v535_v14 = vpop.f32.mrb[3].mxu1 }
 0x173   : > { %v729_v15 = vpack.c.bf16 %v525_v6, %v525_v6  ;;  %v731_v16 = vpack.c.bf16 %v533_v8, %v533_v8  ;;  %v528_v17 = vadd.f32 %v748_v12, %v707_v1  ;;  %v519_v18 = vpop.f32.mrb[3].mxu0  ;;  %v536_v19 = vadd.f32 %v707_v1, %v535_v14 }
 0x174   : > { %586 = vst.msk [vmem:[%s305_s12 + $0x18] sm:$0xf] %vm579_vm11, %v733_v10  ;;  %v727_v20 = vpack.c.bf16 %v517_v11, %v517_v11  ;;  %v734_v21 = vpack.c.bf16 %v544_v13, %v544_v13  ;;  %v520_v22 = vadd.f32 %v707_v1, %v519_v18 }
 0x175   : > { %582 = vst.msk [vmem:[%s305_s12 + $0x8] sm:$0xf] %vm579_vm11, %v729_v15  ;;  %584 = vst.msk [vmem:[%s305_s12 + $0x10] sm:$0xf] %vm579_vm11, %v731_v16  ;;  %v730_v23 = vpack.c.bf16 %v528_v17, %v528_v17  ;;  %v732_v24 = vpack.c.bf16 %v536_v19, %v536_v19 }
 0x176   : > { %580 = vst.msk [vmem:[%s305_s12] sm:$0xf] %vm579_vm11, %v727_v20  ;;  %587 = vst.msk [vmem:[%s305_s12 + $0x1c] sm:$0xf] %vm579_vm11, %v734_v21  ;;  %v728_v25 = vpack.c.bf16 %v520_v22, %v520_v22 }
 0x177   : > { %583 = vst.msk [vmem:[%s305_s12 + $0xc] sm:$0xf] %vm579_vm11, %v730_v23  ;;  %585 = vst.msk [vmem:[%s305_s12 + $0x14] sm:$0xf] %vm579_vm11, %v732_v24 }
 0x178   : > { %581 = vst.msk [vmem:[%s305_s12 + $0x4] sm:$0xf] %vm579_vm11, %v728_v25 }
 0x179 PF: > { %s14_s17 = sadd.s32 1, %s817_s17   ;;  %s947_s15 = smov %s813_s16 }
 0x17a   : > { %p11_p5 = scmp.ge.s32.totalorder %s14_s17, 4   ;;  %s948_s16 = smov %s950_s18 }
 0x17c   :  { %13 = sbr.rel (!%p11_p5) target bundleno = 2 (0x2), region = 69 }

// kernel: _lambda_.50
= control target key start
LH: loop header
LB: loop body
LE: loop exit
PB: predicated region body
PF: predicated region fallthrough
CT: control target
= control target key end

     0   :  { %s978_s18 = smov 0   ;;  %s980_s19 = smov 0   ;;  %s1081_s0 = inlined_call_operand.vmem [shape: bf16[2,80,8], index: 0, kind: input, shape index: {}, may-alias: {0,1}]   ;;  %s1082_s1 = inlined_call_operand.vmem [shape: bf16[2,80,8], index: 1, kind: input, shape index: {}, may-alias: {0,1}]   ;;  %s1083_s2 = inlined_call_operand.vmem [shape: bf16[24,8], index: 2, kind: input, shape index: {}]   ;;  %s1084_s3 = inlined_call_operand.vmem [shape: f32[1,8], index: 3, kind: input, shape index: {}]   ;;  %s1085_s4 = inlined_call_operand.vmem [shape: bf16[2,64,8], index: 4, kind: input, shape index: {}]   ;;  %s1086_s5 = inlined_call_operand.vmem [shape: bf16[2,64,8], index: 5, kind: output, shape index: {}]  }
   0x1   :  { %s982_s20 = smov 0  }
   0x2 LB: > { %s27_s21 = sadd.s32 1, %s940_s19  ;;  %p802_p0 = scmp.ge.s32.totalorder %s944_s20, 1  ;;  %s944_s20 = sphi %s982_s20, %s15_s20   ;;  %s940_s19 = sphi %s980_s19, %s1088_s19   ;;  %s936_s18 = sphi %s978_s18, %s1087_s18  }
   0x3   : > { %p29_p1 = scmp.ge.s32.totalorder %s27_s21, 2  ;;  %p258_p2 = scmp.lt.s32.totalorder %s944_s20, 3 }
   0x5   : > { %s1090_s21 = smov (%p29_p1, %s27_s21), 0  ;;  %p259_p3 = pnand %p802_p0, %p258_p2 }
   0x6   : > { %p323_p4 = scmp.lt.s32.totalorder (!%p259_p3), %s936_s18, 1  ;;  %vm477_vm2 = vcmask (!%p259_p3), 1046528   ;;  %v920_v11 = vld [vmem:[%s1083_s2] sm:$0xff] (!%p259_p3)   ;;  %s946_s7 = smov (!%p259_p3), 16   ;;  %v921_v34 = vld [vmem:[%s1083_s2 + $0x8] ss:$0 sps:$4 sm:$0xff] (!%p259_p3)  }
   0x7   : > { %262 = sbr.rel (%p259_p3) target bundleno = 379 (0x17b), region = 40  ;;  %868 = vmatprep.subr.bf16.mxu0 (!%p259_p3), %v920_v11  ;;  %880 = vmatprep.subr.bf16.mxu1 (!%p259_p3), %v920_v11  ;;  %vm427_vm6 = vsmask.f32 (!%p259_p3), 7424  ;;  %vm541_vm7 = vcmask (!%p259_p3), 1043456   ;;  %s947_s10 = smov (!%p259_p3), 8   ;;  %vm495_vm8 = vcmask (!%p259_p3), 64512  }
   0x8   : > { %869 = vmatpush3.bf16.msra.mxu0 (!%p259_p3), %v920_v11  ;;  %882 = vmatpush3.bf16.msra.mxu1 (!%p259_p3), %v920_v11  ;;  %v543_v42 = vsel (!%p259_p3), %vm541_vm7, %v921_v34, 0  ;;  %vm504_vm9 = vcmask (!%p259_p3), 130048   ;;  %vm532_vm10 = vcmask (!%p259_p3), 195584   ;;  %vm666_vm11 = vcmask (!%p259_p3), 60416  }
   0x9   : > { %884 = vmatprep.subr.msk.bf16.mxu0 (!%p259_p3), %vm541_vm7, %v921_v34  ;;  %885 = vmatprep.subr.msk.bf16.mxu1 (!%p259_p3), %vm541_vm7, %v921_v34 }
   0xc   : > { %871 = vmatpush3.bf16.msra.mxu0 (!%p259_p3), %v543_v42  ;;  %883 = vmatpush3.bf16.msra.mxu1 (!%p259_p3), %v543_v42 }
   0xe   : > { %s1092_s18 = smov (!%p323_p4, %s936_s18), 1 }
   0xf   : > { %s886_s22 = smul.u32 40, %s1092_s18  ;;  %s833_s11 = sshll.u32 %s1092_s18, 5 }
  0x10   : > { %s358_s14 = scalar_lea.vmem %s1085_s4, %s833_s11  ;;  %s368_s23 = scalar_lea.vmem %s1086_s5, %s833_s11 }
  0x11   : > { %s330_s25 = scalar_lea.vmem %s1081_s0, %s886_s22  ;;  %s832_s26 = sadd.s32 32, %s886_s22 }
  0x12   : > { %v915_v0 = vld [vmem:[%s330_s25 + $0x10] sm:$0xff]   ;;  %v916_v1 = vld [vmem:[%s330_s25 + $0x18] sm:$0xff]   ;;  %s346_s29 = scalar_lea.vmem %s1082_s1, %s832_s26  ;;  %v917_v4 = vld [vmem:[%s330_s25] sm:$0xff]  }
  0x13   : > { %vm414_vm0 = vcmp.ge.bf16.partialorder %v915_v0, 0  ;;  %vm415_vm1 = vcmp.ge.bf16.partialorder %v916_v1, 0  ;;  %v419_v2 = vmul.bf16 1036860877, %v915_v0  ;;  %v420_v3 = vmul.bf16 1036860877, %v916_v1 }
  0x14   : > { %v918_v5 = vld [vmem:[%s330_s25 + $0x8] sm:$0xff]   ;;  %v919_v8 = vld [vmem:[%s346_s29] sm:$0xff]   ;;  %vm412_vm3 = vcmp.ge.bf16.partialorder %v917_v4, 0  ;;  %v417_v12 = vmul.bf16 1036860877, %v917_v4 }
  0x15   : > { %v1005_v6 = vsel %vm414_vm0, %v915_v0, %v419_v2  ;;  %v1007_v7 = vsel %vm415_vm1, %v916_v1, %v420_v3  ;;  %vm413_vm4 = vcmp.ge.bf16.partialorder %v918_v5, 0  ;;  %v418_v13 = vmul.bf16 1036860877, %v918_v5  ;;  %v861_v1 = vld [vmem:[%s358_s14 + $0x18] sm:$0xff]   ;;  %v859_v2 = vld [vmem:[%s358_s14 + $0x8] sm:$0xff]   ;;  %v860_v3 = vld [vmem:[%s358_s14 + $0x10] sm:$0xff]  }
  0x16   : > { %v481_v9 = vrot.slane %v1005_v6, 1  ;;  %v483_v10 = vrot.slane %v1007_v7, 1  ;;  %v444_v14 = vshll.u32 %v1005_v6, 16  ;;  %vm416_vm5 = vcmp.ge.bf16.partialorder %v919_v8, 0 }
  0x17   : > { %v421_v16 = vmul.bf16 1036860877, %v919_v8  ;;  %v452_v17 = vshll.u32 %v1007_v7, 16  ;;  %v422_v18 = vsel %vm412_vm3, %v917_v4, %v417_v12  ;;  %v1018_v19 = vsel %vm413_vm4, %v918_v5, %v418_v13  ;;  %v814_v4 = vld [vmem:[%s1084_s3] ss:$0 sm:$0xff] }
  0x18   : > { %v484_v15 = vsel %vm477_vm2, %v481_v9, %v483_v10  ;;  %v456_v20 = vshrl.u32 %v1007_v7, 16  ;;  %v448_v21 = vshrl.u32 %v1005_v6, 16  ;;  %v478_v22 = vrot.slane %v422_v18, 1  ;;  %v844_v5 = vld [vmem:[%s358_s14] sm:$0xff]  }
  0x19   : > { %491 = vrot.lane.b32.xlu1 %v484_v15, %s946_s7  ;;  %v479_v23 = vrot.slane %v1018_v19, 1  ;;  %v436_v24 = vshll.u32 %v1018_v19, 16  ;;  %v440_v25 = vshrl.u32 %v1018_v19, 16  ;;  %v429_v26 = vshrl.u32 %v422_v18, 16 }
  0x1a   : > { %v431_v27 = vshll.u32 %v422_v18, 16  ;;  %v426_v28 = vsel %vm416_vm5, %v919_v8, %v421_v16  ;;  %v454_v29 = vrot.slane %v452_v17, 1  ;;  %v446_v32 = vrot.slane %v444_v14, 1 }
  0x1b   : > { %v480_v30 = vsel %vm477_vm2, %v478_v22, %v479_v23  ;;  %v438_v31 = vrot.slane %v436_v24, 1  ;;  %v460_v33 = vshll.u32 %v426_v28, 16  ;;  %v485_v45 = vrot.slane %v426_v28, 1 }
  0x1c   : > { %487 = vrot.lane.b32.xlu0 %v480_v30, %s946_s7  ;;  %v433_v35 = vrot.slane %v431_v27, 1  ;;  %v458_v37 = vor.u32 %v456_v20, %v454_v29  ;;  %v450_v40 = vor.u32 %v448_v21, %v446_v32  ;;  %v482_v48 = vsel %vm477_vm2, %v479_v23, %v481_v9 }
  0x1d   : > { %v442_v36 = vor.u32 %v440_v25, %v438_v31  ;;  %v462_v38 = vrot.slane %v460_v33, 1  ;;  %v486_v47 = vsel %vm477_vm2, %v483_v10, %v485_v45  ;;  %v853_v9 = vunpack.c.l.bf16 %v860_v3 }
  0x1e   : > { %v434_v39 = vor.u32 %v433_v35, %v429_v26  ;;  %v455_v46 = vsel %vm427_vm6, %v450_v40, %v454_v29  ;;  %v845_v12 = vunpack.c.l.bf16 %v844_v5  ;;  %v850_v14 = vunpack.c.h.bf16 %v859_v2 }
  0x1f   : > { %v447_v41 = vsel %vm427_vm6, %v442_v36, %v446_v32  ;;  %v463_v44 = vsel %vm427_vm6, %v458_v37, %v462_v38  ;;  %v858_v15 = vunpack.c.h.bf16 %v861_v1  ;;  %v846_v20 = vunpack.c.h.bf16 %v844_v5 }
  0x20   : > { %466 = vrot.lane.b32.xlu1 %v447_v41, %s947_s10  ;;  %v439_v43 = vsel %vm427_vm6, %v434_v39, %v438_v31  ;;  %v854_v21 = vunpack.c.h.bf16 %v860_v3 }
  0x21   : > { %464 = vrot.lane.b32.xlu0 %v439_v43, %s947_s10 }
  0x24   : > { %470 = vrot.lane.b32.xlu1 %v463_v44, %s947_s10 }
  0x25   : > { %468 = vrot.lane.b32.xlu0 %v455_v46, %s947_s10 }
  0x28   : > { %493 = vrot.lane.b32.xlu1 %v486_v47, %s946_s7 }
  0x29   : > { %489 = vrot.lane.b32.xlu0 %v482_v48, %s946_s7 }
  0x8b   : > { %v492_v49 = vpop.permute.xlu1 %491 }
  0x8e   : > { %v488_v50 = vpop.permute.xlu0 %487 }
  0x92   : > { %v467_v51 = vpop.permute.xlu1 %466 }
  0x93   : > { %v465_v52 = vpop.permute.xlu0 %464  ;;  %v499_v61 = vsel %vm495_vm8, %v1018_v19, %v467_v51 }
  0x94   : > { %v497_v53 = vsel %vm495_vm8, %v422_v18, %v465_v52 }
  0x95   : > { %v506_v54 = vsel %vm504_vm9, %v497_v53, %v488_v50 }
  0x96   : > { %872 = vmatprep.mubr.msk.bf16.mxu0 %vm532_vm10, %v506_v54  ;;  %v471_v55 = vpop.permute.xlu1 %470 }
  0x97   : > { %v469_v56 = vpop.permute.xlu0 %468  ;;  %v503_v59 = vsel %vm495_vm8, %v1007_v7, %v471_v55  ;;  %v849_v7 = vunpack.c.l.bf16 %v859_v2 }
  0x98   : > { %v501_v57 = vsel %vm495_vm8, %v1005_v6, %v469_v56  ;;  %v857_v6 = vunpack.c.l.bf16 %v861_v1 }
  0x99   : > { %v510_v58 = vsel %vm504_vm9, %v501_v57, %v492_v49 }
  0x9a   : > { %876 = vmatprep.mubr.msk.bf16.mxu1 %vm532_vm10, %v510_v58  ;;  %v494_v60 = vpop.permute.xlu1 %493 }
  0x9b   : > { %v512_v62 = vsel %vm504_vm9, %v503_v59, %v494_v60  ;;  %v490_v63 = vpop.permute.xlu0 %489 }
  0x9c   : > { %v508_v0 = vsel %vm504_vm9, %v499_v61, %v490_v63  ;;  %877 = vmatmul.mubr.msk.bf16.vlgmr.msra.gmra.mrb[0].mxu1 %vm532_vm10, %v512_v62 }
  0x9d   : > { %873 = vmatmul.mubr.msk.bf16.vlgmr.msra.gmra.mrb[0].mxu0 %vm532_vm10, %v508_v0 }
 0x16f   : > { %v878_v8 = vpop.f32.mrb[0].mxu1 }
 0x170   : > { %v874_v10 = vpop.f32.mrb[0].mxu0  ;;  %v604_v11 = vadd.f32 %v878_v8, %v814_v4  ;;  %v595_v13 = vpop.f32.mrb[1].mxu1 }
 0x171   : > { %v588_v16 = vadd.f32 %v874_v10, %v814_v4  ;;  %v579_v17 = vpop.f32.mrb[1].mxu0  ;;  %v596_v18 = vadd.f32 %v814_v4, %v595_v13  ;;  %v879_v19 = vpop.f32.mrb[2].mxu1 }
 0x172   : > { %v632_v22 = vadd.f32 %v857_v6, %v604_v11  ;;  %v580_v23 = vadd.f32 %v814_v4, %v579_v17  ;;  %v875_v24 = vpop.f32.mrb[2].mxu0  ;;  %v607_v25 = vadd.f32 %v879_v19, %v814_v4  ;;  %v598_v26 = vpop.f32.mrb[3].mxu1 }
 0x173   : > { %v628_v27 = vadd.f32 %v849_v7, %v588_v16  ;;  %v630_v28 = vadd.f32 %v853_v9, %v596_v18  ;;  %v591_v29 = vadd.f32 %v875_v24, %v814_v4  ;;  %v582_v30 = vpop.f32.mrb[3].mxu0  ;;  %v599_v31 = vadd.f32 %v814_v4, %v598_v26 }
 0x174   : > { %v841_v32 = vpack.c.bf16 %v632_v22, %v632_v22  ;;  %v626_v33 = vadd.f32 %v845_v12, %v580_v23  ;;  %v633_v34 = vadd.f32 %v858_v15, %v607_v25  ;;  %v583_v35 = vadd.f32 %v814_v4, %v582_v30 }
 0x175   : > { %v837_v36 = vpack.c.bf16 %v628_v27, %v628_v27  ;;  %v839_v37 = vpack.c.bf16 %v630_v28, %v630_v28  ;;  %v629_v38 = vadd.f32 %v850_v14, %v591_v29  ;;  %v631_v39 = vadd.f32 %v854_v21, %v599_v31 }
 0x176   : > { %673 = vst.msk [vmem:[%s368_s23 + $0x18] sm:$0xf] %vm666_vm11, %v841_v32  ;;  %v835_v40 = vpack.c.bf16 %v626_v33, %v626_v33  ;;  %v842_v41 = vpack.c.bf16 %v633_v34, %v633_v34  ;;  %v627_v42 = vadd.f32 %v846_v20, %v583_v35 }
 0x177   : > { %669 = vst.msk [vmem:[%s368_s23 + $0x8] sm:$0xf] %vm666_vm11, %v837_v36  ;;  %671 = vst.msk [vmem:[%s368_s23 + $0x10] sm:$0xf] %vm666_vm11, %v839_v37  ;;  %v838_v43 = vpack.c.bf16 %v629_v38, %v629_v38  ;;  %v840_v44 = vpack.c.bf16 %v631_v39, %v631_v39 }
 0x178   : > { %667 = vst.msk [vmem:[%s368_s23] sm:$0xf] %vm666_vm11, %v835_v40  ;;  %674 = vst.msk [vmem:[%s368_s23 + $0x1c] sm:$0xf] %vm666_vm11, %v842_v41  ;;  %v836_v45 = vpack.c.bf16 %v627_v42, %v627_v42 }
 0x179   : > { %670 = vst.msk [vmem:[%s368_s23 + $0xc] sm:$0xf] %vm666_vm11, %v838_v43  ;;  %672 = vst.msk [vmem:[%s368_s23 + $0x14] sm:$0xf] %vm666_vm11, %v840_v44 }
 0x17a   : > { %668 = vst.msk [vmem:[%s368_s23 + $0x4] sm:$0xf] %vm666_vm11, %v836_v45 }
 0x17b PF: > { %s15_s20 = sadd.s32 1, %s944_s20   ;;  %s1087_s18 = smov %s940_s19 }
 0x17c   : > { %p12_p5 = scmp.ge.s32.totalorder %s15_s20, 4   ;;  %s1088_s19 = smov %s1090_s21 }
 0x17e   :  { %14 = sbr.rel (!%p12_p5) target bundleno = 2 (0x2), region = 76 }

// kernel: _lambda_.47
= control target key start
LH: loop header
LB: loop body
LE: loop exit
PB: predicated region body
PF: predicated region fallthrough
CT: control target
= control target key end

     0   :  { %s854_s15 = smov 0   ;;  %s856_s16 = smov 0   ;;  %s958_s0 = inlined_call_operand.vmem [shape: bf16[2,80,8], index: 0, kind: input, shape index: {}, may-alias: {0,1}]   ;;  %s959_s1 = inlined_call_operand.vmem [shape: bf16[2,80,8], index: 1, kind: input, shape index: {}, may-alias: {0,1}]   ;;  %s960_s2 = inlined_call_operand.vmem [shape: bf16[24,8], index: 2, kind: input, shape index: {}]   ;;  %s961_s3 = inlined_call_operand.vmem [shape: f32[1,8], index: 3, kind: input, shape index: {}]   ;;  %s962_s4 = inlined_call_operand.vmem [shape: bf16[2,64,8], index: 4, kind: output, shape index: {}]  }
   0x1   :  { %s858_s17 = smov 0  }
   0x2 LB: > { %s26_s18 = sadd.s32 1, %s821_s16  ;;  %p705_p0 = scmp.ge.s32.totalorder %s825_s17, 1  ;;  %s825_s17 = sphi %s858_s17, %s14_s17   ;;  %s821_s16 = sphi %s856_s16, %s964_s16   ;;  %s817_s15 = sphi %s854_s15, %s963_s15  }
   0x3   : > { %p28_p1 = scmp.ge.s32.totalorder %s26_s18, 2  ;;  %p216_p2 = scmp.lt.s32.totalorder %s825_s17, 3 }
   0x5   : > { %s966_s18 = smov (%p28_p1, %s26_s18), 0  ;;  %p217_p3 = pnand %p705_p0, %p216_p2 }
   0x6   : > { %p270_p4 = scmp.lt.s32.totalorder (!%p217_p3), %s817_s15, 1  ;;  %vm422_vm2 = vcmask (!%p217_p3), 1042432   ;;  %vm364_vm3 = vsmask.f32 (!%p217_p3), 5376  ;;  %v801_v11 = vld [vmem:[%s960_s2] sm:$0xff] (!%p217_p3)   ;;  %s827_s29 = smov (!%p217_p3), 16  }
   0x7   : > { %220 = sbr.rel (%p217_p3) target bundleno = 377 (0x179), region = 36  ;;  %749 = vmatprep.subr.bf16.mxu0 (!%p217_p3), %v801_v11  ;;  %761 = vmatprep.subr.bf16.mxu1 (!%p217_p3), %v801_v11  ;;  %v802_v39 = vld [vmem:[%s960_s2 + $0x8] ss:$0 sps:$4 sm:$0xff] (!%p217_p3)   ;;  %vm486_vm7 = vcmask (!%p217_p3), 1043456   ;;  %s828_s6 = smov (!%p217_p3), 8   ;;  %vm440_vm8 = vcmask (!%p217_p3), 64512  }
   0x8   : > { %750 = vmatpush3.bf16.msra.mxu0 (!%p217_p3), %v801_v11  ;;  %763 = vmatpush3.bf16.msra.mxu1 (!%p217_p3), %v801_v11  ;;  %v488_v49 = vsel (!%p217_p3), %vm486_vm7, %v802_v39, 0  ;;  %vm449_vm9 = vcmask (!%p217_p3), 130048   ;;  %vm477_vm10 = vcmask (!%p217_p3), 195584   ;;  %vm587_vm11 = vcmask (!%p217_p3), 60416  }
   0x9   : > { %765 = vmatprep.subr.msk.bf16.mxu0 (!%p217_p3), %vm486_vm7, %v802_v39  ;;  %766 = vmatprep.subr.msk.bf16.mxu1 (!%p217_p3), %vm486_vm7, %v802_v39 }
   0xc   : > { %752 = vmatpush3.bf16.msra.mxu0 (!%p217_p3), %v488_v49  ;;  %764 = vmatpush3.bf16.msra.mxu1 (!%p217_p3), %v488_v49 }
   0xe   : > { %s968_s15 = smov (!%p270_p4, %s817_s15), 1 }
   0xf   : > { %s767_s19 = smul.u32 40, %s968_s15  ;;  %s734_s9 = sshll.u32 %s968_s15, 5 }
  0x10   : > { %s305_s12 = scalar_lea.vmem %s962_s4, %s734_s9 }
  0x11   : > { %s277_s22 = scalar_lea.vmem %s958_s0, %s767_s19  ;;  %s733_s23 = sadd.s32 32, %s767_s19 }
  0x12   : > { %v796_v0 = vld [vmem:[%s277_s22 + $0x10] sm:$0xff]   ;;  %v797_v1 = vld [vmem:[%s277_s22 + $0x18] sm:$0xff]   ;;  %s293_s26 = scalar_lea.vmem %s959_s1, %s733_s23  ;;  %v798_v4 = vld [vmem:[%s277_s22] sm:$0xff]  }
  0x13   : > { %vm351_vm0 = vcmp.ge.bf16.partialorder %v796_v0, 0  ;;  %vm352_vm1 = vcmp.ge.bf16.partialorder %v797_v1, 0  ;;  %v356_v2 = vmul.bf16 1036860877, %v796_v0  ;;  %v357_v3 = vmul.bf16 1036860877, %v797_v1 }
  0x14   : > { %v799_v5 = vld [vmem:[%s277_s22 + $0x8] sm:$0xff]   ;;  %v800_v8 = vld [vmem:[%s293_s26] sm:$0xff]   ;;  %vm349_vm4 = vcmp.ge.bf16.partialorder %v798_v4, 0  ;;  %v354_v12 = vmul.bf16 1036860877, %v798_v4 }
  0x15   : > { %v881_v6 = vsel %vm351_vm0, %v796_v0, %v356_v2  ;;  %v883_v7 = vsel %vm352_vm1, %v797_v1, %v357_v3  ;;  %vm350_vm5 = vcmp.ge.bf16.partialorder %v799_v5, 0  ;;  %v355_v13 = vmul.bf16 1036860877, %v799_v5 }
  0x16   : > { %v426_v9 = vrot.slane %v881_v6, 5  ;;  %v428_v10 = vrot.slane %v883_v7, 5  ;;  %v383_v14 = vshrl.u32 %v881_v6, 16  ;;  %v386_v15 = vshll.u32 %v881_v6, 16 }
  0x17   : > { %vm353_vm6 = vcmp.ge.bf16.partialorder %v800_v8, 0  ;;  %v358_v17 = vmul.bf16 1036860877, %v800_v8  ;;  %v392_v18 = vshrl.u32 %v883_v7, 16  ;;  %v359_v19 = vsel %vm349_vm4, %v798_v4, %v354_v12 }
  0x18   : > { %v429_v16 = vsel %vm422_vm2, %v426_v9, %v428_v10  ;;  %v899_v20 = vsel %vm350_vm5, %v799_v5, %v355_v13  ;;  %v385_v21 = vrot.slane %v383_v14, 2  ;;  %v388_v22 = vrot.slane %v386_v15, 3 }
  0x19   : > { %436 = vrot.lane.b32.xlu1 %v429_v16, %s827_s29  ;;  %v423_v23 = vrot.slane %v359_v19, 5  ;;  %v424_v24 = vrot.slane %v899_v20, 5  ;;  %v374_v25 = vshrl.u32 %v899_v20, 16  ;;  %v377_v26 = vshll.u32 %v899_v20, 16 }
  0x1a   : > { %v389_v27 = vor.u32 %v388_v22, %v385_v21  ;;  %v366_v28 = vshrl.u32 %v359_v19, 16  ;;  %v369_v29 = vshll.u32 %v359_v19, 16  ;;  %v363_v30 = vsel %vm353_vm6, %v800_v8, %v358_v17 }
  0x1b   : > { %v425_v31 = vsel %vm422_vm2, %v423_v23, %v424_v24  ;;  %v376_v32 = vrot.slane %v374_v25, 2  ;;  %v379_v33 = vrot.slane %v377_v26, 3  ;;  %v394_v34 = vrot.slane %v392_v18, 2 }
  0x1c   : > { %432 = vrot.lane.b32.xlu0 %v425_v31, %s827_s29  ;;  %v368_v35 = vrot.slane %v366_v28, 2  ;;  %v371_v36 = vrot.slane %v369_v29, 3  ;;  %v395_v37 = vshll.u32 %v883_v7, 16  ;;  %v401_v38 = vshrl.u32 %v363_v30, 16 }
  0x1d   : > { %v380_v40 = vor.u32 %v379_v33, %v376_v32  ;;  %v404_v41 = vshll.u32 %v363_v30, 16  ;;  %v430_v51 = vrot.slane %v363_v30, 5  ;;  %v427_v55 = vsel %vm422_vm2, %v424_v24, %v426_v9 }
  0x1e   : > { %v372_v42 = vor.u32 %v371_v36, %v368_v35  ;;  %v397_v43 = vrot.slane %v395_v37, 3  ;;  %v403_v44 = vrot.slane %v401_v38, 2 }
  0x1f   : > { %v390_v45 = vsel %vm364_vm3, %v380_v40, %v389_v27  ;;  %v406_v46 = vrot.slane %v404_v41, 3  ;;  %v431_v54 = vsel %vm422_vm2, %v428_v10, %v430_v51 }
  0x20   : > { %411 = vrot.lane.b32.xlu1 %v390_v45, %s828_s6  ;;  %v381_v47 = vsel %vm364_vm3, %v372_v42, %v380_v40  ;;  %v398_v48 = vor.u32 %v397_v43, %v394_v34 }
  0x21   : > { %409 = vrot.lane.b32.xlu0 %v381_v47, %s828_s6  ;;  %v407_v50 = vor.u32 %v406_v46, %v403_v44 }
  0x22   : > { %v399_v52 = vsel %vm364_vm3, %v389_v27, %v398_v48 }
  0x23   : > { %v408_v53 = vsel %vm364_vm3, %v398_v48, %v407_v50 }
  0x24   : > { %415 = vrot.lane.b32.xlu1 %v408_v53, %s828_s6 }
  0x25   : > { %413 = vrot.lane.b32.xlu0 %v399_v52, %s828_s6 }
  0x28   : > { %438 = vrot.lane.b32.xlu1 %v431_v54, %s827_s29 }
  0x29   : > { %434 = vrot.lane.b32.xlu0 %v427_v55, %s827_s29 }
  0x8b   : > { %v437_v56 = vpop.permute.xlu1 %436 }
  0x8e   : > { %v433_v57 = vpop.permute.xlu0 %432 }
  0x92   : > { %v412_v58 = vpop.permute.xlu1 %411 }
  0x93   : > { %v410_v59 = vpop.permute.xlu0 %409  ;;  %v444_v4 = vsel %vm440_vm8, %v899_v20, %v412_v58 }
  0x94   : > { %v442_v60 = vsel %vm440_vm8, %v359_v19, %v410_v59 }
  0x95   : > { %v451_v61 = vsel %vm449_vm9, %v442_v60, %v433_v57 }
  0x96   : > { %753 = vmatprep.mubr.msk.bf16.mxu0 %vm477_vm10, %v451_v61  ;;  %v416_v62 = vpop.permute.xlu1 %415 }
  0x97   : > { %v414_v63 = vpop.permute.xlu0 %413  ;;  %v448_v2 = vsel %vm440_vm8, %v883_v7, %v416_v62 }
  0x98   : > { %v446_v0 = vsel %vm440_vm8, %v881_v6, %v414_v63  ;;  %v715_v6 = vld [vmem:[%s961_s3] ss:$0 sm:$0xff] }
  0x99   : > { %v455_v1 = vsel %vm449_vm9, %v446_v0, %v437_v56 }
  0x9a   : > { %757 = vmatprep.mubr.msk.bf16.mxu1 %vm477_vm10, %v455_v1  ;;  %v439_v3 = vpop.permute.xlu1 %438 }
  0x9b   : > { %v457_v5 = vsel %vm449_vm9, %v448_v2, %v439_v3  ;;  %v435_v8 = vpop.permute.xlu0 %434 }
  0x9c   : > { %v453_v9 = vsel %vm449_vm9, %v444_v4, %v435_v8  ;;  %758 = vmatmul.mubr.msk.bf16.vlgmr.msra.gmra.mrb[0].mxu1 %vm477_vm10, %v457_v5 }
  0x9d   : > { %754 = vmatmul.mubr.msk.bf16.vlgmr.msra.gmra.mrb[0].mxu0 %vm477_vm10, %v453_v9 }
 0x16f   : > { %v759_v7 = vpop.f32.mrb[0].mxu1 }
 0x170   : > { %v755_v10 = vpop.f32.mrb[0].mxu0  ;;  %v549_v11 = vadd.f32 %v759_v7, %v715_v6  ;;  %v540_v12 = vpop.f32.mrb[1].mxu1 }
 0x171   : > { %v533_v13 = vadd.f32 %v755_v10, %v715_v6  ;;  %v524_v14 = vpop.f32.mrb[1].mxu0  ;;  %v541_v15 = vadd.f32 %v715_v6, %v540_v12  ;;  %v760_v16 = vpop.f32.mrb[2].mxu1 }
 0x172   : > { %v741_v17 = vpack.c.bf16 %v549_v11, %v549_v11  ;;  %v525_v18 = vadd.f32 %v715_v6, %v524_v14  ;;  %v756_v19 = vpop.f32.mrb[2].mxu0  ;;  %v552_v20 = vadd.f32 %v760_v16, %v715_v6  ;;  %v543_v21 = vpop.f32.mrb[3].mxu1 }
 0x173   : > { %v737_v22 = vpack.c.bf16 %v533_v13, %v533_v13  ;;  %v739_v23 = vpack.c.bf16 %v541_v15, %v541_v15  ;;  %v536_v24 = vadd.f32 %v756_v19, %v715_v6  ;;  %v527_v25 = vpop.f32.mrb[3].mxu0  ;;  %v544_v26 = vadd.f32 %v715_v6, %v543_v21 }
 0x174   : > { %594 = vst.msk [vmem:[%s305_s12 + $0x18] sm:$0xf] %vm587_vm11, %v741_v17  ;;  %v735_v27 = vpack.c.bf16 %v525_v18, %v525_v18  ;;  %v742_v28 = vpack.c.bf16 %v552_v20, %v552_v20  ;;  %v528_v29 = vadd.f32 %v715_v6, %v527_v25 }
 0x175   : > { %590 = vst.msk [vmem:[%s305_s12 + $0x8] sm:$0xf] %vm587_vm11, %v737_v22  ;;  %592 = vst.msk [vmem:[%s305_s12 + $0x10] sm:$0xf] %vm587_vm11, %v739_v23  ;;  %v738_v30 = vpack.c.bf16 %v536_v24, %v536_v24  ;;  %v740_v31 = vpack.c.bf16 %v544_v26, %v544_v26 }
 0x176   : > { %588 = vst.msk [vmem:[%s305_s12] sm:$0xf] %vm587_vm11, %v735_v27  ;;  %595 = vst.msk [vmem:[%s305_s12 + $0x1c] sm:$0xf] %vm587_vm11, %v742_v28  ;;  %v736_v32 = vpack.c.bf16 %v528_v29, %v528_v29 }
 0x177   : > { %591 = vst.msk [vmem:[%s305_s12 + $0xc] sm:$0xf] %vm587_vm11, %v738_v30  ;;  %593 = vst.msk [vmem:[%s305_s12 + $0x14] sm:$0xf] %vm587_vm11, %v740_v31 }
 0x178   : > { %589 = vst.msk [vmem:[%s305_s12 + $0x4] sm:$0xf] %vm587_vm11, %v736_v32 }
 0x179 PF: > { %s14_s17 = sadd.s32 1, %s825_s17   ;;  %s963_s15 = smov %s821_s16 }
 0x17a   : > { %p11_p5 = scmp.ge.s32.totalorder %s14_s17, 4   ;;  %s964_s16 = smov %s966_s18 }
 0x17c   :  { %13 = sbr.rel (!%p11_p5) target bundleno = 2 (0x2), region = 69 }

// kernel: _lambda_.45
= control target key start
LH: loop header
LB: loop body
LE: loop exit
PB: predicated region body
PF: predicated region fallthrough
CT: control target
= control target key end

     0   :  { %s854_s15 = smov 0   ;;  %s856_s16 = smov 0   ;;  %s958_s0 = inlined_call_operand.vmem [shape: bf16[2,80,8], index: 0, kind: input, shape index: {}, may-alias: {0,1}]   ;;  %s959_s1 = inlined_call_operand.vmem [shape: bf16[2,80,8], index: 1, kind: input, shape index: {}, may-alias: {0,1}]   ;;  %s960_s2 = inlined_call_operand.vmem [shape: bf16[24,8], index: 2, kind: input, shape index: {}]   ;;  %s961_s3 = inlined_call_operand.vmem [shape: f32[1,8], index: 3, kind: input, shape index: {}]   ;;  %s962_s4 = inlined_call_operand.vmem [shape: bf16[2,64,8], index: 4, kind: output, shape index: {}]  }
   0x1   :  { %s858_s17 = smov 0  }
   0x2 LB: > { %s26_s18 = sadd.s32 1, %s821_s16  ;;  %p705_p0 = scmp.ge.s32.totalorder %s825_s17, 1  ;;  %s825_s17 = sphi %s858_s17, %s14_s17   ;;  %s821_s16 = sphi %s856_s16, %s964_s16   ;;  %s817_s15 = sphi %s854_s15, %s963_s15  }
   0x3   : > { %p28_p1 = scmp.ge.s32.totalorder %s26_s18, 2  ;;  %p216_p2 = scmp.lt.s32.totalorder %s825_s17, 3 }
   0x5   : > { %s966_s18 = smov (%p28_p1, %s26_s18), 0  ;;  %p217_p3 = pnand %p705_p0, %p216_p2 }
   0x6   : > { %p270_p4 = scmp.lt.s32.totalorder (!%p217_p3), %s817_s15, 1  ;;  %vm422_vm2 = vcmask (!%p217_p3), 1044480   ;;  %vm364_vm3 = vsmask.f32 (!%p217_p3), 6400  ;;  %v801_v11 = vld [vmem:[%s960_s2] sm:$0xff] (!%p217_p3)   ;;  %s827_s29 = smov (!%p217_p3), 16  }
   0x7   : > { %220 = sbr.rel (%p217_p3) target bundleno = 377 (0x179), region = 36  ;;  %749 = vmatprep.subr.bf16.mxu0 (!%p217_p3), %v801_v11  ;;  %761 = vmatprep.subr.bf16.mxu1 (!%p217_p3), %v801_v11  ;;  %v802_v39 = vld [vmem:[%s960_s2 + $0x8] ss:$0 sps:$4 sm:$0xff] (!%p217_p3)   ;;  %vm486_vm7 = vcmask (!%p217_p3), 1043456   ;;  %s828_s6 = smov (!%p217_p3), 8   ;;  %vm440_vm8 = vcmask (!%p217_p3), 64512  }
   0x8   : > { %750 = vmatpush3.bf16.msra.mxu0 (!%p217_p3), %v801_v11  ;;  %763 = vmatpush3.bf16.msra.mxu1 (!%p217_p3), %v801_v11  ;;  %v488_v49 = vsel (!%p217_p3), %vm486_vm7, %v802_v39, 0  ;;  %vm449_vm9 = vcmask (!%p217_p3), 130048   ;;  %vm477_vm10 = vcmask (!%p217_p3), 195584   ;;  %vm587_vm11 = vcmask (!%p217_p3), 60416  }
   0x9   : > { %765 = vmatprep.subr.msk.bf16.mxu0 (!%p217_p3), %vm486_vm7, %v802_v39  ;;  %766 = vmatprep.subr.msk.bf16.mxu1 (!%p217_p3), %vm486_vm7, %v802_v39 }
   0xc   : > { %752 = vmatpush3.bf16.msra.mxu0 (!%p217_p3), %v488_v49  ;;  %764 = vmatpush3.bf16.msra.mxu1 (!%p217_p3), %v488_v49 }
   0xe   : > { %s968_s15 = smov (!%p270_p4, %s817_s15), 1 }
   0xf   : > { %s767_s19 = smul.u32 40, %s968_s15  ;;  %s734_s9 = sshll.u32 %s968_s15, 5 }
  0x10   : > { %s305_s12 = scalar_lea.vmem %s962_s4, %s734_s9 }
  0x11   : > { %s277_s22 = scalar_lea.vmem %s958_s0, %s767_s19  ;;  %s733_s23 = sadd.s32 32, %s767_s19 }
  0x12   : > { %v796_v0 = vld [vmem:[%s277_s22 + $0x10] sm:$0xff]   ;;  %v797_v1 = vld [vmem:[%s277_s22 + $0x18] sm:$0xff]   ;;  %s293_s26 = scalar_lea.vmem %s959_s1, %s733_s23  ;;  %v798_v4 = vld [vmem:[%s277_s22] sm:$0xff]  }
  0x13   : > { %vm351_vm0 = vcmp.ge.bf16.partialorder %v796_v0, 0  ;;  %vm352_vm1 = vcmp.ge.bf16.partialorder %v797_v1, 0  ;;  %v356_v2 = vmul.bf16 1036860877, %v796_v0  ;;  %v357_v3 = vmul.bf16 1036860877, %v797_v1 }
  0x14   : > { %v799_v5 = vld [vmem:[%s277_s22 + $0x8] sm:$0xff]   ;;  %v800_v8 = vld [vmem:[%s293_s26] sm:$0xff]   ;;  %vm349_vm4 = vcmp.ge.bf16.partialorder %v798_v4, 0  ;;  %v354_v12 = vmul.bf16 1036860877, %v798_v4 }
  0x15   : > { %v881_v6 = vsel %vm351_vm0, %v796_v0, %v356_v2  ;;  %v883_v7 = vsel %vm352_vm1, %v797_v1, %v357_v3  ;;  %vm350_vm5 = vcmp.ge.bf16.partialorder %v799_v5, 0  ;;  %v355_v13 = vmul.bf16 1036860877, %v799_v5 }
  0x16   : > { %v426_v9 = vrot.slane %v881_v6, 3  ;;  %v428_v10 = vrot.slane %v883_v7, 3  ;;  %v383_v14 = vshrl.u32 %v881_v6, 16  ;;  %v386_v15 = vshll.u32 %v881_v6, 16 }
  0x17   : > { %vm353_vm6 = vcmp.ge.bf16.partialorder %v800_v8, 0  ;;  %v358_v17 = vmul.bf16 1036860877, %v800_v8  ;;  %v392_v18 = vshrl.u32 %v883_v7, 16  ;;  %v359_v19 = vsel %vm349_vm4, %v798_v4, %v354_v12 }
  0x18   : > { %v429_v16 = vsel %vm422_vm2, %v426_v9, %v428_v10  ;;  %v899_v20 = vsel %vm350_vm5, %v799_v5, %v355_v13  ;;  %v385_v21 = vrot.slane %v383_v14, 1  ;;  %v388_v22 = vrot.slane %v386_v15, 2 }
  0x19   : > { %436 = vrot.lane.b32.xlu1 %v429_v16, %s827_s29  ;;  %v423_v23 = vrot.slane %v359_v19, 3  ;;  %v424_v24 = vrot.slane %v899_v20, 3  ;;  %v374_v25 = vshrl.u32 %v899_v20, 16  ;;  %v377_v26 = vshll.u32 %v899_v20, 16 }
  0x1a   : > { %v389_v27 = vor.u32 %v388_v22, %v385_v21  ;;  %v366_v28 = vshrl.u32 %v359_v19, 16  ;;  %v369_v29 = vshll.u32 %v359_v19, 16  ;;  %v363_v30 = vsel %vm353_vm6, %v800_v8, %v358_v17 }
  0x1b   : > { %v425_v31 = vsel %vm422_vm2, %v423_v23, %v424_v24  ;;  %v376_v32 = vrot.slane %v374_v25, 1  ;;  %v379_v33 = vrot.slane %v377_v26, 2  ;;  %v394_v34 = vrot.slane %v392_v18, 1 }
  0x1c   : > { %432 = vrot.lane.b32.xlu0 %v425_v31, %s827_s29  ;;  %v368_v35 = vrot.slane %v366_v28, 1  ;;  %v371_v36 = vrot.slane %v369_v29, 2  ;;  %v395_v37 = vshll.u32 %v883_v7, 16  ;;  %v401_v38 = vshrl.u32 %v363_v30, 16 }
  0x1d   : > { %v380_v40 = vor.u32 %v379_v33, %v376_v32  ;;  %v404_v41 = vshll.u32 %v363_v30, 16  ;;  %v430_v51 = vrot.slane %v363_v30, 3  ;;  %v427_v55 = vsel %vm422_vm2, %v424_v24, %v426_v9 }
  0x1e   : > { %v372_v42 = vor.u32 %v371_v36, %v368_v35  ;;  %v397_v43 = vrot.slane %v395_v37, 2  ;;  %v403_v44 = vrot.slane %v401_v38, 1 }
  0x1f   : > { %v390_v45 = vsel %vm364_vm3, %v380_v40, %v389_v27  ;;  %v406_v46 = vrot.slane %v404_v41, 2  ;;  %v431_v54 = vsel %vm422_vm2, %v428_v10, %v430_v51 }
  0x20   : > { %411 = vrot.lane.b32.xlu1 %v390_v45, %s828_s6  ;;  %v381_v47 = vsel %vm364_vm3, %v372_v42, %v380_v40  ;;  %v398_v48 = vor.u32 %v397_v43, %v394_v34 }
  0x21   : > { %409 = vrot.lane.b32.xlu0 %v381_v47, %s828_s6  ;;  %v407_v50 = vor.u32 %v406_v46, %v403_v44 }
  0x22   : > { %v399_v52 = vsel %vm364_vm3, %v389_v27, %v398_v48 }
  0x23   : > { %v408_v53 = vsel %vm364_vm3, %v398_v48, %v407_v50 }
  0x24   : > { %415 = vrot.lane.b32.xlu1 %v408_v53, %s828_s6 }
  0x25   : > { %413 = vrot.lane.b32.xlu0 %v399_v52, %s828_s6 }
  0x28   : > { %438 = vrot.lane.b32.xlu1 %v431_v54, %s827_s29 }
  0x29   : > { %434 = vrot.lane.b32.xlu0 %v427_v55, %s827_s29 }
  0x8b   : > { %v437_v56 = vpop.permute.xlu1 %436 }
  0x8e   : > { %v433_v57 = vpop.permute.xlu0 %432 }
  0x92   : > { %v412_v58 = vpop.permute.xlu1 %411 }
  0x93   : > { %v410_v59 = vpop.permute.xlu0 %409  ;;  %v444_v4 = vsel %vm440_vm8, %v899_v20, %v412_v58 }
  0x94   : > { %v442_v60 = vsel %vm440_vm8, %v359_v19, %v410_v59 }
  0x95   : > { %v451_v61 = vsel %vm449_vm9, %v442_v60, %v433_v57 }
  0x96   : > { %753 = vmatprep.mubr.msk.bf16.mxu0 %vm477_vm10, %v451_v61  ;;  %v416_v62 = vpop.permute.xlu1 %415 }
  0x97   : > { %v414_v63 = vpop.permute.xlu0 %413  ;;  %v448_v2 = vsel %vm440_vm8, %v883_v7, %v416_v62 }
  0x98   : > { %v446_v0 = vsel %vm440_vm8, %v881_v6, %v414_v63  ;;  %v715_v6 = vld [vmem:[%s961_s3] ss:$0 sm:$0xff] }
  0x99   : > { %v455_v1 = vsel %vm449_vm9, %v446_v0, %v437_v56 }
  0x9a   : > { %757 = vmatprep.mubr.msk.bf16.mxu1 %vm477_vm10, %v455_v1  ;;  %v439_v3 = vpop.permute.xlu1 %438 }
  0x9b   : > { %v457_v5 = vsel %vm449_vm9, %v448_v2, %v439_v3  ;;  %v435_v8 = vpop.permute.xlu0 %434 }
  0x9c   : > { %v453_v9 = vsel %vm449_vm9, %v444_v4, %v435_v8  ;;  %758 = vmatmul.mubr.msk.bf16.vlgmr.msra.gmra.mrb[0].mxu1 %vm477_vm10, %v457_v5 }
  0x9d   : > { %754 = vmatmul.mubr.msk.bf16.vlgmr.msra.gmra.mrb[0].mxu0 %vm477_vm10, %v453_v9 }
 0x16f   : > { %v759_v7 = vpop.f32.mrb[0].mxu1 }
 0x170   : > { %v755_v10 = vpop.f32.mrb[0].mxu0  ;;  %v549_v11 = vadd.f32 %v759_v7, %v715_v6  ;;  %v540_v12 = vpop.f32.mrb[1].mxu1 }
 0x171   : > { %v533_v13 = vadd.f32 %v755_v10, %v715_v6  ;;  %v524_v14 = vpop.f32.mrb[1].mxu0  ;;  %v541_v15 = vadd.f32 %v715_v6, %v540_v12  ;;  %v760_v16 = vpop.f32.mrb[2].mxu1 }
 0x172   : > { %v741_v17 = vpack.c.bf16 %v549_v11, %v549_v11  ;;  %v525_v18 = vadd.f32 %v715_v6, %v524_v14  ;;  %v756_v19 = vpop.f32.mrb[2].mxu0  ;;  %v552_v20 = vadd.f32 %v760_v16, %v715_v6  ;;  %v543_v21 = vpop.f32.mrb[3].mxu1 }
 0x173   : > { %v737_v22 = vpack.c.bf16 %v533_v13, %v533_v13  ;;  %v739_v23 = vpack.c.bf16 %v541_v15, %v541_v15  ;;  %v536_v24 = vadd.f32 %v756_v19, %v715_v6  ;;  %v527_v25 = vpop.f32.mrb[3].mxu0  ;;  %v544_v26 = vadd.f32 %v715_v6, %v543_v21 }
 0x174   : > { %594 = vst.msk [vmem:[%s305_s12 + $0x18] sm:$0xf] %vm587_vm11, %v741_v17  ;;  %v735_v27 = vpack.c.bf16 %v525_v18, %v525_v18  ;;  %v742_v28 = vpack.c.bf16 %v552_v20, %v552_v20  ;;  %v528_v29 = vadd.f32 %v715_v6, %v527_v25 }
 0x175   : > { %590 = vst.msk [vmem:[%s305_s12 + $0x8] sm:$0xf] %vm587_vm11, %v737_v22  ;;  %592 = vst.msk [vmem:[%s305_s12 + $0x10] sm:$0xf] %vm587_vm11, %v739_v23  ;;  %v738_v30 = vpack.c.bf16 %v536_v24, %v536_v24  ;;  %v740_v31 = vpack.c.bf16 %v544_v26, %v544_v26 }
 0x176   : > { %588 = vst.msk [vmem:[%s305_s12] sm:$0xf] %vm587_vm11, %v735_v27  ;;  %595 = vst.msk [vmem:[%s305_s12 + $0x1c] sm:$0xf] %vm587_vm11, %v742_v28  ;;  %v736_v32 = vpack.c.bf16 %v528_v29, %v528_v29 }
 0x177   : > { %591 = vst.msk [vmem:[%s305_s12 + $0xc] sm:$0xf] %vm587_vm11, %v738_v30  ;;  %593 = vst.msk [vmem:[%s305_s12 + $0x14] sm:$0xf] %vm587_vm11, %v740_v31 }
 0x178   : > { %589 = vst.msk [vmem:[%s305_s12 + $0x4] sm:$0xf] %vm587_vm11, %v736_v32 }
 0x179 PF: > { %s14_s17 = sadd.s32 1, %s825_s17   ;;  %s963_s15 = smov %s821_s16 }
 0x17a   : > { %p11_p5 = scmp.ge.s32.totalorder %s14_s17, 4   ;;  %s964_s16 = smov %s966_s18 }
 0x17c   :  { %13 = sbr.rel (!%p11_p5) target bundleno = 2 (0x2), region = 69 }

// kernel: _lambda_.54
= control target key start
LH: loop header
LB: loop body
LE: loop exit
PB: predicated region body
PF: predicated region fallthrough
CT: control target
= control target key end

     0   :  { %s1110_s21 = smov 0   ;;  %s1112_s22 = smov 0   ;;  %s1217_s0 = inlined_call_operand.vmem [shape: bf16[2,80,8], index: 0, kind: input, shape index: {}, may-alias: {0,1}]   ;;  %s1218_s1 = inlined_call_operand.vmem [shape: bf16[2,80,8], index: 1, kind: input, shape index: {}, may-alias: {0,1}]   ;;  %s1219_s2 = inlined_call_operand.vmem [shape: bf16[24,8], index: 2, kind: input, shape index: {}]   ;;  %s1220_s3 = inlined_call_operand.vmem [shape: f32[1,8], index: 3, kind: input, shape index: {}]   ;;  %s1221_s4 = inlined_call_operand.vmem [shape: bf16[2,64,8], index: 4, kind: input, shape index: {}]   ;;  %s1222_s5 = inlined_call_operand.vmem [shape: bf16[2,64,8], index: 5, kind: input, shape index: {}]   ;;  %s1223_s6 = inlined_call_operand.vmem [shape: bf16[2,64,8], index: 6, kind: output, shape index: {}]  }
   0x1   :  { %s1114_s23 = smov 0  }
   0x2 LB: > { %s28_s24 = sadd.s32 1, %s1067_s22  ;;  %p907_p0 = scmp.ge.s32.totalorder %s1071_s23, 1  ;;  %s1071_s23 = sphi %s1114_s23, %s16_s23   ;;  %s1067_s22 = sphi %s1112_s22, %s1225_s22   ;;  %s1063_s21 = sphi %s1110_s21, %s1224_s21  }
   0x3   : > { %p30_p1 = scmp.ge.s32.totalorder %s28_s24, 2  ;;  %p300_p2 = scmp.lt.s32.totalorder %s1071_s23, 3 }
   0x5   : > { %s1227_s24 = smov (%p30_p1, %s28_s24), 0  ;;  %p301_p3 = pnand %p907_p0, %p300_p2 }
   0x6   : > { %p376_p4 = scmp.lt.s32.totalorder (!%p301_p3), %s1063_s21, 1  ;;  %vm540_vm2 = vcmask (!%p301_p3), 1046528   ;;  %v1047_v11 = vld [vmem:[%s1219_s2] sm:$0xff] (!%p301_p3)   ;;  %s1073_s11 = smov (!%p301_p3), 16   ;;  %v1048_v34 = vld [vmem:[%s1219_s2 + $0x8] ss:$0 sps:$4 sm:$0xff] (!%p301_p3)  }
   0x7   : > { %304 = sbr.rel (%p301_p3) target bundleno = 381 (0x17d), region = 44  ;;  %995 = vmatprep.subr.bf16.mxu0 (!%p301_p3), %v1047_v11  ;;  %1007 = vmatprep.subr.bf16.mxu1 (!%p301_p3), %v1047_v11  ;;  %vm490_vm6 = vsmask.f32 (!%p301_p3), 7424  ;;  %vm604_vm7 = vcmask (!%p301_p3), 1043456   ;;  %s1074_s14 = smov (!%p301_p3), 8   ;;  %vm558_vm8 = vcmask (!%p301_p3), 64512  }
   0x8   : > { %996 = vmatpush3.bf16.msra.mxu0 (!%p301_p3), %v1047_v11  ;;  %1009 = vmatpush3.bf16.msra.mxu1 (!%p301_p3), %v1047_v11  ;;  %v606_v42 = vsel (!%p301_p3), %vm604_vm7, %v1048_v34, 0  ;;  %vm567_vm9 = vcmask (!%p301_p3), 130048   ;;  %vm595_vm10 = vcmask (!%p301_p3), 195584   ;;  %vm753_vm11 = vcmask (!%p301_p3), 60416  }
   0x9   : > { %1011 = vmatprep.subr.msk.bf16.mxu0 (!%p301_p3), %vm604_vm7, %v1048_v34  ;;  %1012 = vmatprep.subr.msk.bf16.mxu1 (!%p301_p3), %vm604_vm7, %v1048_v34 }
   0xc   : > { %998 = vmatpush3.bf16.msra.mxu0 (!%p301_p3), %v606_v42  ;;  %1010 = vmatpush3.bf16.msra.mxu1 (!%p301_p3), %v606_v42 }
   0xe   : > { %s1229_s21 = smov (!%p376_p4, %s1063_s21), 1 }
   0xf   : > { %s1013_s25 = smul.u32 40, %s1229_s21  ;;  %s1183_s15 = sshll.u32 %s1229_s21, 5 }
  0x10   : > { %s411_s18 = scalar_lea.vmem %s1221_s4, %s1183_s15 }
  0x11   : > { %s383_s28 = scalar_lea.vmem %s1217_s0, %s1013_s25  ;;  %s939_s29 = sadd.s32 32, %s1013_s25 }
  0x12   : > { %v1042_v0 = vld [vmem:[%s383_s28 + $0x10] sm:$0xff]   ;;  %v1043_v1 = vld [vmem:[%s383_s28 + $0x18] sm:$0xff]   ;;  %s399_s8 = scalar_lea.vmem %s1218_s1, %s939_s29  ;;  %v1044_v4 = vld [vmem:[%s383_s28] sm:$0xff]   ;;  %s421_s25 = scalar_lea.vmem %s1222_s5, %s1183_s15 }
  0x13   : > { %vm477_vm0 = vcmp.ge.bf16.partialorder %v1042_v0, 0  ;;  %vm478_vm1 = vcmp.ge.bf16.partialorder %v1043_v1, 0  ;;  %v482_v2 = vmul.bf16 1036860877, %v1042_v0  ;;  %v483_v3 = vmul.bf16 1036860877, %v1043_v1  ;;  %s431_s29 = scalar_lea.vmem %s1223_s6, %s1183_s15 }
  0x14   : > { %v1045_v5 = vld [vmem:[%s383_s28 + $0x8] sm:$0xff]   ;;  %v1046_v8 = vld [vmem:[%s399_s8] sm:$0xff]   ;;  %vm475_vm3 = vcmp.ge.bf16.partialorder %v1044_v4, 0  ;;  %v480_v12 = vmul.bf16 1036860877, %v1044_v4 }
  0x15   : > { %v1137_v6 = vsel %vm477_vm0, %v1042_v0, %v482_v2  ;;  %v1139_v7 = vsel %vm478_vm1, %v1043_v1, %v483_v3  ;;  %vm476_vm4 = vcmp.ge.bf16.partialorder %v1045_v5, 0  ;;  %v481_v13 = vmul.bf16 1036860877, %v1045_v5  ;;  %v983_v1 = vld [vmem:[%s411_s18 + $0x8] sm:$0xff]   ;;  %v985_v2 = vld [vmem:[%s411_s18 + $0x18] sm:$0xff]   ;;  %v952_v3 = vld [vmem:[%s411_s18] sm:$0xff]  }
  0x16   : > { %v544_v9 = vrot.slane %v1137_v6, 1  ;;  %v546_v10 = vrot.slane %v1139_v7, 1  ;;  %v507_v14 = vshll.u32 %v1137_v6, 16  ;;  %vm479_vm5 = vcmp.ge.bf16.partialorder %v1046_v8, 0 }
  0x17   : > { %v484_v16 = vmul.bf16 1036860877, %v1046_v8  ;;  %v515_v17 = vshll.u32 %v1139_v7, 16  ;;  %v485_v18 = vsel %vm475_vm3, %v1044_v4, %v480_v12  ;;  %v1150_v19 = vsel %vm476_vm4, %v1045_v5, %v481_v13  ;;  %v986_v4 = vld [vmem:[%s421_s25 + $0x8] sm:$0xff]   ;;  %v988_v5 = vld [vmem:[%s421_s25 + $0x18] sm:$0xff]  }
  0x18   : > { %v547_v15 = vsel %vm540_vm2, %v544_v9, %v546_v10  ;;  %v519_v20 = vshrl.u32 %v1139_v7, 16  ;;  %v511_v21 = vshrl.u32 %v1137_v6, 16  ;;  %v541_v22 = vrot.slane %v485_v18, 1 }
  0x19   : > { %554 = vrot.lane.b32.xlu1 %v547_v15, %s1073_s11  ;;  %v542_v23 = vrot.slane %v1150_v19, 1  ;;  %v499_v24 = vshll.u32 %v1150_v19, 16  ;;  %v503_v25 = vshrl.u32 %v1150_v19, 16  ;;  %v492_v26 = vshrl.u32 %v485_v18, 16 }
  0x1a   : > { %v494_v27 = vshll.u32 %v485_v18, 16  ;;  %v489_v28 = vsel %vm479_vm5, %v1046_v8, %v484_v16  ;;  %v517_v29 = vrot.slane %v515_v17, 1  ;;  %v509_v32 = vrot.slane %v507_v14, 1  ;;  %v987_v8 = vld [vmem:[%s421_s25 + $0x10] sm:$0xff]  }
  0x1b   : > { %v543_v30 = vsel %vm540_vm2, %v541_v22, %v542_v23  ;;  %v501_v31 = vrot.slane %v499_v24, 1  ;;  %v523_v33 = vshll.u32 %v489_v28, 16  ;;  %v548_v45 = vrot.slane %v489_v28, 1 }
  0x1c   : > { %550 = vrot.lane.b32.xlu0 %v543_v30, %s1073_s11  ;;  %v496_v35 = vrot.slane %v494_v27, 1  ;;  %v521_v37 = vor.u32 %v519_v20, %v517_v29  ;;  %v513_v40 = vor.u32 %v511_v21, %v509_v32  ;;  %v545_v48 = vsel %vm540_vm2, %v542_v23, %v544_v9  ;;  %v921_v9 = vld [vmem:[%s1220_s3] ss:$0 sm:$0xff] }
  0x1d   : > { %v505_v36 = vor.u32 %v503_v25, %v501_v31  ;;  %v525_v38 = vrot.slane %v523_v33, 1  ;;  %v549_v47 = vsel %vm540_vm2, %v546_v10, %v548_v45  ;;  %v957_v10 = vunpack.c.l.bf16 %v983_v1 }
  0x1e   : > { %v497_v39 = vor.u32 %v496_v35, %v492_v26  ;;  %v518_v46 = vsel %vm490_vm6, %v513_v40, %v517_v29  ;;  %v965_v11 = vunpack.c.l.bf16 %v985_v2  ;;  %v953_v12 = vunpack.c.l.bf16 %v952_v3 }
  0x1f   : > { %v510_v41 = vsel %vm490_vm6, %v505_v36, %v509_v32  ;;  %v526_v44 = vsel %vm490_vm6, %v521_v37, %v525_v38  ;;  %v973_v13 = vunpack.c.l.bf16 %v986_v4  ;;  %v981_v14 = vunpack.c.l.bf16 %v988_v5 }
  0x20   : > { %529 = vrot.lane.b32.xlu1 %v510_v41, %s1074_s14  ;;  %v502_v43 = vsel %vm490_vm6, %v497_v39, %v501_v31  ;;  %v958_v16 = vunpack.c.h.bf16 %v983_v1  ;;  %v966_v20 = vunpack.c.h.bf16 %v985_v2  ;;  %v954_v21 = vunpack.c.h.bf16 %v952_v3 }
  0x21   : > { %527 = vrot.lane.b32.xlu0 %v502_v43, %s1074_s14  ;;  %v974_v25 = vunpack.c.h.bf16 %v986_v4  ;;  %v982_v26 = vunpack.c.h.bf16 %v988_v5  ;;  %v978_v33 = vunpack.c.h.bf16 %v987_v8 }
  0x24   : > { %533 = vrot.lane.b32.xlu1 %v526_v44, %s1074_s14 }
  0x25   : > { %531 = vrot.lane.b32.xlu0 %v518_v46, %s1074_s14 }
  0x28   : > { %556 = vrot.lane.b32.xlu1 %v549_v47, %s1073_s11 }
  0x29   : > { %552 = vrot.lane.b32.xlu0 %v545_v48, %s1073_s11 }
  0x8b   : > { %v555_v49 = vpop.permute.xlu1 %554 }
  0x8e   : > { %v551_v50 = vpop.permute.xlu0 %550 }
  0x92   : > { %v530_v51 = vpop.permute.xlu1 %529 }
  0x93   : > { %v528_v52 = vpop.permute.xlu0 %527  ;;  %v562_v61 = vsel %vm558_vm8, %v1150_v19, %v530_v51  ;;  %v977_v19 = vunpack.c.l.bf16 %v987_v8 }
  0x94   : > { %v560_v53 = vsel %vm558_vm8, %v485_v18, %v528_v52 }
  0x95   : > { %v569_v54 = vsel %vm567_vm9, %v560_v53, %v551_v50 }
  0x96   : > { %999 = vmatprep.mubr.msk.bf16.mxu0 %vm595_vm10, %v569_v54  ;;  %v534_v55 = vpop.permute.xlu1 %533 }
  0x97   : > { %v532_v56 = vpop.permute.xlu0 %531  ;;  %v566_v59 = vsel %vm558_vm8, %v1139_v7, %v534_v55  ;;  %v968_v7 = vld [vmem:[%s421_s25] sm:$0xff]  }
  0x98   : > { %v564_v57 = vsel %vm558_vm8, %v1137_v6, %v532_v56  ;;  %v984_v6 = vld [vmem:[%s411_s18 + $0x10] sm:$0xff]   ;;  %v969_v18 = vunpack.c.l.bf16 %v968_v7  ;;  %v970_v32 = vunpack.c.h.bf16 %v968_v7 }
  0x99   : > { %v573_v58 = vsel %vm567_vm9, %v564_v57, %v555_v49  ;;  %v961_v15 = vunpack.c.l.bf16 %v984_v6  ;;  %v962_v27 = vunpack.c.h.bf16 %v984_v6 }
  0x9a   : > { %1003 = vmatprep.mubr.msk.bf16.mxu1 %vm595_vm10, %v573_v58  ;;  %v557_v60 = vpop.permute.xlu1 %556 }
  0x9b   : > { %v575_v62 = vsel %vm567_vm9, %v566_v59, %v557_v60  ;;  %v553_v63 = vpop.permute.xlu0 %552 }
  0x9c   : > { %v571_v0 = vsel %vm567_vm9, %v562_v61, %v553_v63  ;;  %1004 = vmatmul.mubr.msk.bf16.vlgmr.msra.gmra.mrb[0].mxu1 %vm595_vm10, %v575_v62 }
  0x9d   : > { %1000 = vmatmul.mubr.msk.bf16.vlgmr.msra.gmra.mrb[0].mxu0 %vm595_vm10, %v571_v0 }
 0x16f   : > { %v1005_v17 = vpop.f32.mrb[0].mxu1 }
 0x170   : > { %v1001_v22 = vpop.f32.mrb[0].mxu0  ;;  %v667_v23 = vadd.f32 %v1005_v17, %v921_v9  ;;  %v658_v24 = vpop.f32.mrb[1].mxu1 }
 0x171   : > { %v651_v28 = vadd.f32 %v1001_v22, %v921_v9  ;;  %v642_v29 = vpop.f32.mrb[1].mxu0  ;;  %v659_v30 = vadd.f32 %v921_v9, %v658_v24  ;;  %v1006_v31 = vpop.f32.mrb[2].mxu1 }
 0x172   : > { %v695_v34 = vadd.f32 %v965_v11, %v667_v23  ;;  %v643_v35 = vadd.f32 %v921_v9, %v642_v29  ;;  %v1002_v36 = vpop.f32.mrb[2].mxu0  ;;  %v670_v37 = vadd.f32 %v1006_v31, %v921_v9  ;;  %v661_v38 = vpop.f32.mrb[3].mxu1 }
 0x173   : > { %v691_v39 = vadd.f32 %v957_v10, %v651_v28  ;;  %v693_v40 = vadd.f32 %v961_v15, %v659_v30  ;;  %v654_v41 = vadd.f32 %v1002_v36, %v921_v9  ;;  %v645_v42 = vpop.f32.mrb[3].mxu0  ;;  %v662_v43 = vadd.f32 %v921_v9, %v661_v38 }
 0x174   : > { %v719_v44 = vadd.f32 %v981_v14, %v695_v34  ;;  %v689_v45 = vadd.f32 %v953_v12, %v643_v35  ;;  %v696_v46 = vadd.f32 %v966_v20, %v670_v37  ;;  %v646_v47 = vadd.f32 %v921_v9, %v645_v42 }
 0x175   : > { %v715_v48 = vadd.f32 %v973_v13, %v691_v39  ;;  %v717_v49 = vadd.f32 %v977_v19, %v693_v40  ;;  %v692_v50 = vadd.f32 %v958_v16, %v654_v41  ;;  %v694_v51 = vadd.f32 %v962_v27, %v662_v43 }
 0x176   : > { %v949_v52 = vpack.c.bf16 %v719_v44, %v719_v44  ;;  %v713_v53 = vadd.f32 %v969_v18, %v689_v45  ;;  %v720_v54 = vadd.f32 %v982_v26, %v696_v46  ;;  %v690_v55 = vadd.f32 %v954_v21, %v646_v47 }
 0x177   : > { %v945_v56 = vpack.c.bf16 %v715_v48, %v715_v48  ;;  %v947_v57 = vpack.c.bf16 %v717_v49, %v717_v49  ;;  %v716_v58 = vadd.f32 %v974_v25, %v692_v50  ;;  %v718_v59 = vadd.f32 %v978_v33, %v694_v51 }
 0x178   : > { %760 = vst.msk [vmem:[%s431_s29 + $0x18] sm:$0xf] %vm753_vm11, %v949_v52  ;;  %v943_v60 = vpack.c.bf16 %v713_v53, %v713_v53  ;;  %v950_v61 = vpack.c.bf16 %v720_v54, %v720_v54  ;;  %v714_v62 = vadd.f32 %v970_v32, %v690_v55 }
 0x179   : > { %756 = vst.msk [vmem:[%s431_s29 + $0x8] sm:$0xf] %vm753_vm11, %v945_v56  ;;  %758 = vst.msk [vmem:[%s431_s29 + $0x10] sm:$0xf] %vm753_vm11, %v947_v57  ;;  %v946_v63 = vpack.c.bf16 %v716_v58, %v716_v58  ;;  %v948_v0 = vpack.c.bf16 %v718_v59, %v718_v59 }
 0x17a   : > { %754 = vst.msk [vmem:[%s431_s29] sm:$0xf] %vm753_vm11, %v943_v60  ;;  %761 = vst.msk [vmem:[%s431_s29 + $0x1c] sm:$0xf] %vm753_vm11, %v950_v61  ;;  %v944_v1 = vpack.c.bf16 %v714_v62, %v714_v62 }
 0x17b   : > { %757 = vst.msk [vmem:[%s431_s29 + $0xc] sm:$0xf] %vm753_vm11, %v946_v63  ;;  %759 = vst.msk [vmem:[%s431_s29 + $0x14] sm:$0xf] %vm753_vm11, %v948_v0 }
 0x17c   : > { %755 = vst.msk [vmem:[%s431_s29 + $0x4] sm:$0xf] %vm753_vm11, %v944_v1 }
 0x17d PF: > { %s16_s23 = sadd.s32 1, %s1071_s23   ;;  %s1224_s21 = smov %s1067_s22 }
 0x17e   : > { %p13_p5 = scmp.ge.s32.totalorder %s16_s23, 4   ;;  %s1225_s22 = smov %s1227_s24 }
 0x180   :  { %15 = sbr.rel (!%p13_p5) target bundleno = 2 (0x2), region = 83 }

// kernel: _lambda_.55
= control target key start
LH: loop header
LB: loop body
LE: loop exit
PB: predicated region body
PF: predicated region fallthrough
CT: control target
= control target key end

     0   :  { %s995_s17 = smov 0   ;;  %s997_s18 = smov 0   ;;  %s1195_s0 = inlined_call_operand.vmem [shape: bf16[2,80,8], index: 0, kind: input, shape index: {}, may-alias: {0,1}]   ;;  %s1196_s1 = inlined_call_operand.vmem [shape: bf16[2,80,8], index: 1, kind: input, shape index: {}, may-alias: {0,1}]   ;;  %s1197_s2 = inlined_call_operand.vmem [shape: bf16[56,1], index: 2, kind: input, shape index: {}]   ;;  %s1198_s3 = inlined_call_operand.<no memory space> [shape: f32[1,1], index: 3, kind: input, shape index: {}]   ;;  %s1199_s4 = inlined_call_operand.vmem [shape: f32[2,64,1], index: 4, kind: output, shape index: {}]  }
   0x1   :  { %v9_v0 = vstv %s1198_s3  ;;  %s999_s19 = smov 0  }
   0x2   :  { %10 = vst [vmem:[#allocation2] sm:$0x1] %v9_v0 }
   0x3 LB: > { %s28_s3 = sadd.s32 1, %s955_s18  ;;  %p821_p0 = scmp.ge.s32.totalorder %s959_s19, 1  ;;  %s959_s19 = sphi %s999_s19, %s16_s19   ;;  %s955_s18 = sphi %s997_s18, %s1201_s18   ;;  %s951_s17 = sphi %s995_s17, %s1200_s17  }
   0x4   : > { %p30_p1 = scmp.ge.s32.totalorder %s28_s3, 2  ;;  %p218_p2 = scmp.lt.s32.totalorder %s959_s19, 3 }
   0x6   : > { %s1203_s3 = smov (%p30_p1, %s28_s3), 0  ;;  %p219_p3 = pnand %p821_p0, %p218_p2 }
   0x7   : > { %p272_p4 = scmp.lt.s32.totalorder (!%p219_p3), %s951_s17, 1  ;;  %vm416_vm2 = vcmask (!%p219_p3), 1046528   ;;  %s961_s28 = smov (!%p219_p3), 16   ;;  %vm366_vm6 = vsmask.f32 (!%p219_p3), 7424  ;;  %vm464_vm8 = vcmask (!%p219_p3), 1045504  }
   0x8   : > { %222 = sbr.rel (%p219_p3) target bundleno = 419 (0x1a3), region = 36  ;;  %s962_s29 = smov (!%p219_p3), 8   ;;  %vm434_vm7 = vsmask.f32 (!%p219_p3), 6400  ;;  %vm482_vm9 = vsmask.f32 (!%p219_p3), 5376 }
   0x9   : > { %s963_s30 = smov (!%p219_p3), 24   ;;  %s964_s9 = smov (!%p219_p3), 32   ;;  %vm626_vm10 = vcmask (!%p219_p3), 1043456   ;;  %vm510_vm11 = vcmask (!%p219_p3), 1044480   ;;  %vm528_vm12 = vcmask (!%p219_p3), 64512   ;;  %vm546_vm13 = vcmask (!%p219_p3), 195584  }
   0xa   : > { %s965_s14 = smov (!%p219_p3), 40   ;;  %s966_s15 = smov (!%p219_p3), 48   ;;  %vm537_vm14 = vcmask (!%p219_p3), 130048   ;;  %vm555_vm15 = vcmask (!%p219_p3), 261120  }
   0xf   : > { %s1205_s17 = smov (!%p272_p4, %s951_s17), 1 }
  0x10   : > { %s879_s20 = smul.u32 40, %s1205_s17  ;;  %s844_s16 = sshll.u32 %s1205_s17, 6 }
  0x11   : > { %s307_s22 = scalar_lea.vmem %s1199_s4, %s844_s16 }
  0x12   : > { %s279_s23 = scalar_lea.vmem %s1195_s0, %s879_s20  ;;  %s843_s24 = sadd.s32 32, %s879_s20 }
  0x13   : > { %v912_v1 = vld [vmem:[%s279_s23 + $0x10] sm:$0xff]   ;;  %v913_v2 = vld [vmem:[%s279_s23 + $0x18] sm:$0xff]   ;;  %s295_s27 = scalar_lea.vmem %s1196_s1, %s843_s24  ;;  %v914_v5 = vld [vmem:[%s279_s23] sm:$0xff]  }
  0x14   : > { %vm353_vm0 = vcmp.ge.bf16.partialorder %v912_v1, 0  ;;  %vm354_vm1 = vcmp.ge.bf16.partialorder %v913_v2, 0  ;;  %v358_v3 = vmul.bf16 1009007652, %v912_v1  ;;  %v359_v4 = vmul.bf16 1009007652, %v913_v2 }
  0x15   : > { %v915_v6 = vld [vmem:[%s279_s23 + $0x8] sm:$0xff]   ;;  %v916_v9 = vld [vmem:[%s295_s27] sm:$0xff]   ;;  %vm351_vm3 = vcmp.ge.bf16.partialorder %v914_v5, 0  ;;  %v356_v12 = vmul.bf16 1009007652, %v914_v5 }
  0x16   : > { %v1022_v7 = vsel %vm353_vm0, %v912_v1, %v358_v3  ;;  %v1024_v8 = vsel %vm354_vm1, %v913_v2, %v359_v4  ;;  %vm352_vm4 = vcmp.ge.bf16.partialorder %v915_v6, 0  ;;  %v357_v13 = vmul.bf16 1009007652, %v915_v6  ;;  %v917_v4 = vld [vmem:[%s1197_s2] sm:$0xff]  }
  0x17   : > { %v420_v10 = vrot.slane %v1022_v7, 1  ;;  %v422_v11 = vrot.slane %v1024_v8, 1  ;;  %vm355_vm5 = vcmp.ge.bf16.partialorder %v916_v9, 0  ;;  %v1029_v14 = vshll.u32 %v1022_v7, 16  ;;  %853 = vmatprep.subr.bf16.mxu0 %v917_v4  ;;  %869 = vmatprep.subr.bf16.mxu1 %v917_v4 }
  0x18   : > { %v360_v16 = vmul.bf16 1009007652, %v916_v9  ;;  %v1033_v17 = vshll.u32 %v1024_v8, 16  ;;  %v1036_v18 = vsel %vm351_vm3, %v914_v5, %v356_v12  ;;  %v1038_v19 = vsel %vm352_vm4, %v915_v6, %v357_v13  ;;  %854 = vmatpush3.bf16.msra.mxu0 %v917_v4  ;;  %873 = vmatpush3.bf16.msra.mxu1 %v917_v4 }
  0x19   : > { %v423_v15 = vsel %vm416_vm2, %v420_v10, %v422_v11  ;;  %v385_v20 = vrot.slane %v1029_v14, 1  ;;  %v1042_v21 = vshrl.u32 %v1024_v8, 16  ;;  %v417_v22 = vrot.slane %v1036_v18, 1 }
  0x1a   : > { %430 = vrot.lane.b32.xlu1 %v423_v15, %s961_s28  ;;  %v418_v23 = vrot.slane %v1038_v19, 1  ;;  %v1046_v24 = vsel %vm355_vm5, %v916_v9, %v360_v16  ;;  %v1049_v25 = vshll.u32 %v1038_v19, 16  ;;  %v1053_v27 = vshrl.u32 %v1038_v19, 16 }
  0x1b   : > { %v424_v26 = vrot.slane %v1046_v24, 1  ;;  %v1056_v28 = vshrl.u32 %v1036_v18, 16  ;;  %v1059_v29 = vshll.u32 %v1036_v18, 16  ;;  %v393_v32 = vrot.slane %v1033_v17, 1 }
  0x1c   : > { %v419_v30 = vsel %vm416_vm2, %v417_v22, %v418_v23  ;;  %v377_v31 = vrot.slane %v1049_v25, 1  ;;  %v1065_v33 = vshrl.u32 %v1022_v7, 16  ;;  %v1071_v36 = vshll.u32 %v1046_v24, 16 }
  0x1d   : > { %426 = vrot.lane.b32.xlu0 %v419_v30, %s961_s28  ;;  %v425_v34 = vsel %vm416_vm2, %v422_v11, %v424_v26  ;;  %v372_v35 = vrot.slane %v1059_v29, 1  ;;  %v421_v37 = vsel %vm416_vm2, %v418_v23, %v420_v10  ;;  %v397_v39 = vor.u32 %v1042_v21, %v393_v32 }
  0x1e   : > { %432 = vrot.lane.b32.xlu1 %v425_v34, %s961_s28  ;;  %v381_v38 = vor.u32 %v1053_v27, %v377_v31  ;;  %v442_v40 = vrot.slane %v1065_v33, 1  ;;  %v401_v42 = vrot.slane %v1071_v36, 1  ;;  %v443_v43 = vrot.slane %v1029_v14, 2  ;;  %v919_v34 = vld [vmem:[%s1197_s2 + $0x10] sm:$0xff]  }
  0x1f   : > { %v373_v41 = vor.u32 %v372_v35, %v1056_v28  ;;  %v446_v44 = vrot.slane %v1042_v21, 1  ;;  %v447_v46 = vrot.slane %v1033_v17, 2  ;;  %v389_v48 = vor.u32 %v1065_v33, %v385_v20 }
  0x20   : > { %v386_v45 = vsel %vm366_vm6, %v381_v38, %v385_v20  ;;  %v435_v49 = vrot.slane %v1056_v28, 1  ;;  %v436_v50 = vrot.slane %v1059_v29, 2  ;;  %v438_v51 = vrot.slane %v1053_v27, 1  ;;  %v918_v20 = vld [vmem:[%s1197_s2 + $0x8] sm:$0xff]  }
  0x21   : > { %428 = vrot.lane.b32.xlu0 %v421_v37, %s961_s28  ;;  %v378_v47 = vsel %vm366_vm6, %v373_v41, %v377_v31  ;;  %v439_v52 = vrot.slane %v1049_v25, 2  ;;  %v450_v53 = vshrl.u32 %v1046_v24, 16  ;;  %v402_v54 = vsel %vm366_vm6, %v397_v39, %v401_v42  ;;  %855 = vmatprep.subr.bf16.mxu0 %v918_v20 }
  0x22   : > { %405 = vrot.lane.b32.xlu1 %v386_v45, %s962_s29  ;;  %v444_v55 = vor.u32 %v443_v43, %v442_v40  ;;  %v448_v56 = vor.u32 %v447_v46, %v446_v44  ;;  %v453_v57 = vrot.slane %v1071_v36, 2  ;;  %v394_v59 = vsel %vm366_vm6, %v389_v48, %v393_v32  ;;  %870 = vmatprep.subr.bf16.mxu1 %v918_v20 }
  0x23   : > { %v452_v58 = vrot.slane %v450_v53, 1  ;;  %v437_v60 = vor.u32 %v436_v50, %v435_v49  ;;  %v440_v61 = vor.u32 %v439_v52, %v438_v51  ;;  %v468_v1 = vrot.slane %v1022_v7, 2  ;;  %856 = vmatpush3.bf16.msra.mxu0 %v918_v20  ;;  %874 = vmatpush3.bf16.msra.mxu1 %v918_v20 }
  0x24   : > { %v449_v62 = vsel %vm434_vm7, %v444_v55, %v448_v56  ;;  %v470_v2 = vrot.slane %v1024_v8, 2  ;;  %v465_v5 = vrot.slane %v1036_v18, 2  ;;  %v466_v6 = vrot.slane %v1038_v19, 2  ;;  %857 = vmatprep.subr.bf16.mxu0 %v919_v34  ;;  %871 = vmatprep.subr.bf16.mxu1 %v919_v34 }
  0x25   : > { %403 = vrot.lane.b32.xlu0 %v378_v47, %s962_s29  ;;  %v454_v63 = vor.u32 %v453_v57, %v452_v58  ;;  %v441_v0 = vsel %vm434_vm7, %v437_v60, %v440_v61  ;;  %v472_v9 = vrot.slane %v1046_v24, 2  ;;  %v445_v10 = vsel %vm434_vm7, %v440_v61, %v444_v55 }
  0x26   : > { %409 = vrot.lane.b32.xlu1 %v402_v54, %s962_s29  ;;  %v471_v11 = vsel %vm464_vm8, %v468_v1, %v470_v2  ;;  %v490_v12 = vrot.slane %v1065_v33, 2  ;;  %v491_v13 = vrot.slane %v1029_v14, 3  ;;  %v494_v15 = vrot.slane %v1042_v21, 2 }
  0x27   : > { %v455_v3 = vsel %vm434_vm7, %v448_v56, %v454_v63  ;;  %v495_v16 = vrot.slane %v1033_v17, 3  ;;  %v467_v22 = vsel %vm464_vm8, %v465_v5, %v466_v6  ;;  %v473_v23 = vsel %vm464_vm8, %v470_v2, %v472_v9  ;;  %858 = vmatpush3.bf16.msra.mxu0 %v919_v34  ;;  %875 = vmatpush3.bf16.msra.mxu1 %v919_v34 }
  0x28   : > { %v483_v14 = vrot.slane %v1056_v28, 2  ;;  %v484_v21 = vrot.slane %v1059_v29, 3  ;;  %v486_v17 = vrot.slane %v1053_v27, 2  ;;  %v487_v26 = vrot.slane %v1049_v25, 3 }
  0x29   : > { %407 = vrot.lane.b32.xlu0 %v394_v59, %s962_s29  ;;  %v492_v30 = vor.u32 %v491_v13, %v490_v12  ;;  %v496_v31 = vor.u32 %v495_v16, %v494_v15  ;;  %v498_v32 = vrot.slane %v450_v53, 2  ;;  %v499_v33 = vrot.slane %v1071_v36, 3  ;;  %v920_v36 = vld [vmem:[%s1197_s2 + $0x18] ss:$0 sps:$4 sm:$0xff]  }
  0x2a   : > { %460 = vrot.lane.b32.xlu1 %v449_v62, %s963_s30  ;;  %v469_v27 = vsel %vm464_vm8, %v466_v6, %v468_v1  ;;  %v485_v28 = vor.u32 %v484_v21, %v483_v14  ;;  %v488_v25 = vor.u32 %v487_v26, %v486_v17  ;;  %877 = vmatprep.subr.msk.bf16.mxu0 %vm626_vm10, %v920_v36  ;;  %v628_v37 = vsel %vm626_vm10, %v920_v36, 0 }
  0x2b   : > { %v497_v29 = vsel %vm482_vm9, %v492_v30, %v496_v31  ;;  %v500_v35 = vor.u32 %v499_v33, %v498_v32  ;;  %878 = vmatprep.subr.msk.bf16.mxu1 %vm626_vm10, %v920_v36  ;;  %v514_v40 = vrot.slane %v1022_v7, 3  ;;  %v516_v41 = vrot.slane %v1024_v8, 3  ;;  %860 = vmatpush3.bf16.msra.mxu0 %v628_v37 }
  0x2c   : > { %v489_v38 = vsel %vm482_vm9, %v485_v28, %v488_v25  ;;  %876 = vmatpush3.bf16.msra.mxu1 %v628_v37  ;;  %v493_v42 = vsel %vm482_vm9, %v488_v25, %v492_v30  ;;  %v511_v43 = vrot.slane %v1036_v18, 3  ;;  %v512_v44 = vrot.slane %v1038_v19, 3 }
  0x2d   : > { %456 = vrot.lane.b32.xlu0 %v441_v0, %s963_s30  ;;  %v501_v39 = vsel %vm482_vm9, %v496_v31, %v500_v35  ;;  %v517_v45 = vsel %vm510_vm11, %v514_v40, %v516_v41  ;;  %v518_v46 = vrot.slane %v1046_v24, 3  ;;  %vm564_vm0 = vcmask 326656  }
  0x2e   : > { %462 = vrot.lane.b32.xlu1 %v455_v3, %s963_s30  ;;  %v513_v47 = vsel %vm510_vm11, %v511_v43, %v512_v44  ;;  %v515_v49 = vsel %vm510_vm11, %v512_v44, %v514_v40  ;;  %vm573_vm1 = vcmask 392192   ;;  %vm617_vm2 = vcmask 457728  }
  0x2f   : > { %v519_v48 = vsel %vm510_vm11, %v516_v41, %v518_v46  ;;  %vm703_vm3 = vcmask 7168  }
  0x31   : > { %458 = vrot.lane.b32.xlu0 %v445_v10, %s963_s30 }
  0x32   : > { %478 = vrot.lane.b32.xlu1 %v471_v11, %s964_s9 }
  0x35   : > { %474 = vrot.lane.b32.xlu0 %v467_v22, %s964_s9 }
  0x36   : > { %480 = vrot.lane.b32.xlu1 %v473_v23, %s964_s9 }
  0x39   : > { %476 = vrot.lane.b32.xlu0 %v469_v27, %s964_s9 }
  0x3a   : > { %506 = vrot.lane.b32.xlu1 %v497_v29, %s965_s14  ;;  %v831_v29 = vld [vmem:[#allocation2] ss:$0 sm:$0xff] }
  0x3d   : > { %502 = vrot.lane.b32.xlu0 %v489_v38, %s965_s14 }
  0x3e   : > { %508 = vrot.lane.b32.xlu1 %v501_v39, %s965_s14 }
  0x41   : > { %504 = vrot.lane.b32.xlu0 %v493_v42, %s965_s14 }
  0x42   : > { %524 = vrot.lane.b32.xlu1 %v517_v45, %s966_s15 }
  0x45   : > { %520 = vrot.lane.b32.xlu0 %v513_v47, %s966_s15 }
  0x46   : > { %526 = vrot.lane.b32.xlu1 %v519_v48, %s966_s15 }
  0x49   : > { %522 = vrot.lane.b32.xlu0 %v515_v49, %s966_s15 }
  0x8c   : > { %v431_v50 = vpop.permute.xlu1 %430 }
  0x8f   : > { %v427_v51 = vpop.permute.xlu0 %426 }
  0x90   : > { %v433_v52 = vpop.permute.xlu1 %432 }
  0x93   : > { %v429_v53 = vpop.permute.xlu0 %428 }
  0x94   : > { %v406_v54 = vpop.permute.xlu1 %405 }
  0x97   : > { %v404_v55 = vpop.permute.xlu0 %403 }
  0x98   : > { %v410_v56 = vpop.permute.xlu1 %409  ;;  %v530_v5 = vsel %vm528_vm12, %v1036_v18, %v404_v55  ;;  %v532_v18 = vsel %vm528_vm12, %v1038_v19, %v406_v54 }
  0x99   : > { %v536_v9 = vsel %vm528_vm12, %v1024_v8, %v410_v56  ;;  %v539_v12 = vsel %vm537_vm14, %v530_v5, %v427_v51  ;;  %v541_v26 = vsel %vm537_vm14, %v532_v18, %v429_v53 }
  0x9a   : > { %v545_v20 = vsel %vm537_vm14, %v536_v9, %v433_v52 }
  0x9b   : > { %v408_v24 = vpop.permute.xlu0 %407 }
  0x9c   : > { %v461_v57 = vpop.permute.xlu1 %460  ;;  %v534_v2 = vsel %vm528_vm12, %v1022_v7, %v408_v24 }
  0x9d   : > { %v543_v6 = vsel %vm537_vm14, %v534_v2, %v431_v50 }
  0x9e   : > { %v552_v10 = vsel %vm546_vm13, %v543_v6, %v461_v57 }
  0x9f   : > { %v457_v58 = vpop.permute.xlu0 %456 }
  0xa0   : > { %v463_v59 = vpop.permute.xlu1 %462  ;;  %v548_v16 = vsel %vm546_vm13, %v539_v12, %v457_v58 }
  0xa1   : > { %v554_v22 = vsel %vm546_vm13, %v545_v20, %v463_v59 }
  0xa3   : > { %v459_v60 = vpop.permute.xlu0 %458 }
  0xa4   : > { %v479_v61 = vpop.permute.xlu1 %478  ;;  %v550_v32 = vsel %vm546_vm13, %v541_v26, %v459_v60 }
  0xa5   : > { %v561_v11 = vsel %vm555_vm15, %v552_v10, %v479_v61 }
  0xa7   : > { %v475_v62 = vpop.permute.xlu0 %474 }
  0xa8   : > { %v481_v63 = vpop.permute.xlu1 %480  ;;  %v557_v23 = vsel %vm555_vm15, %v548_v16, %v475_v62 }
  0xa9   : > { %v563_v14 = vsel %vm555_vm15, %v554_v22, %v481_v63 }
  0xab   : > { %v477_v0 = vpop.permute.xlu0 %476 }
  0xac   : > { %v507_v1 = vpop.permute.xlu1 %506  ;;  %v559_v34 = vsel %vm555_vm15, %v550_v32, %v477_v0 }
  0xad   : > { %v570_v13 = vsel %vm564_vm0, %v561_v11, %v507_v1 }
  0xaf   : > { %v503_v3 = vpop.permute.xlu0 %502 }
  0xb0   : > { %v509_v4 = vpop.permute.xlu1 %508  ;;  %v566_v21 = vsel %vm564_vm0, %v557_v23, %v503_v3 }
  0xb1   : > { %v572_v19 = vsel %vm564_vm0, %v563_v14, %v509_v4 }
  0xb3   : > { %v505_v7 = vpop.permute.xlu0 %504 }
  0xb4   : > { %v525_v15 = vpop.permute.xlu1 %524  ;;  %v568_v27 = vsel %vm564_vm0, %v559_v34, %v505_v7 }
  0xb5   : > { %v579_v8 = vsel %vm573_vm1, %v570_v13, %v525_v15 }
  0xb6   : > { %865 = vmatprep.mubr.msk.bf16.mxu1 %vm617_vm2, %v579_v8 }
  0xb7   : > { %v521_v17 = vpop.permute.xlu0 %520 }
  0xb8   : > { %v575_v30 = vsel %vm573_vm1, %v566_v21, %v521_v17  ;;  %v527_v31 = vpop.permute.xlu1 %526 }
  0xb9   : > { %861 = vmatprep.mubr.msk.bf16.mxu0 %vm617_vm2, %v575_v30  ;;  %v581_v33 = vsel %vm573_vm1, %v572_v19, %v527_v31 }
  0xba   : > { %866 = vmatmul.mubr.msk.bf16.vlgmr.msra.gmra.mrb[0].mxu1 %vm617_vm2, %v581_v33 }
  0xbb   : > { %v523_v28 = vpop.permute.xlu0 %522 }
  0xbc   : > { %v577_v25 = vsel %vm573_vm1, %v568_v27, %v523_v28 }
  0xbd   : > { %862 = vmatmul.mubr.msk.bf16.vlgmr.msra.gmra.mrb[0].mxu0 %vm617_vm2, %v577_v25 }
 0x18d   : > { %v867_v35 = vpop.f32.mrb[0].mxu1 }
 0x18e   : > { %v689_v36 = vadd.f32 %v867_v35, %v831_v29  ;;  %v680_v37 = vpop.f32.mrb[1].mxu1 }
 0x18f   : > { %v681_v38 = vadd.f32 %v831_v29, %v680_v37  ;;  %v868_v39 = vpop.f32.mrb[2].mxu1 }
 0x190   : > { %v863_v40 = vpop.f32.mrb[0].mxu0  ;;  %921 = vtanh.f32 %v689_v36  ;;  %v692_v41 = vadd.f32 %v868_v39, %v831_v29  ;;  %v683_v42 = vpop.f32.mrb[3].mxu1 }
 0x191   : > { %v673_v43 = vadd.f32 %v863_v40, %v831_v29  ;;  %v664_v44 = vpop.f32.mrb[1].mxu0  ;;  %923 = vtanh.f32 %v681_v38  ;;  %v684_v49 = vadd.f32 %v831_v29, %v683_v42 }
 0x192   : > { %v665_v45 = vadd.f32 %v831_v29, %v664_v44  ;;  %v864_v46 = vpop.f32.mrb[2].mxu0  ;;  %925 = vtanh.f32 %v692_v41 }
 0x193   : > { %927 = vtanh.f32 %v673_v43  ;;  %v676_v47 = vadd.f32 %v864_v46, %v831_v29  ;;  %v667_v48 = vpop.f32.mrb[3].mxu0 }
 0x194   : > { %929 = vtanh.f32 %v665_v45  ;;  %v668_v50 = vadd.f32 %v831_v29, %v667_v48 }
 0x195   : > { %931 = vtanh.f32 %v676_v47 }
 0x196   : > { %933 = vtanh.f32 %v668_v50 }
 0x197   : > { %935 = vtanh.f32 %v684_v49 }
 0x19a   : > { %v922_v51 = vpop.eup %921 }
 0x19b   : > { %v924_v52 = vpop.eup %923  ;;  %710 = vst.msk [vmem:[%s307_s22 + $0x30] sm:$0xff] %vm703_vm3, %v922_v51 }
 0x19c   : > { %v926_v53 = vpop.eup %925  ;;  %708 = vst.msk [vmem:[%s307_s22 + $0x20] sm:$0xff] %vm703_vm3, %v924_v52 }
 0x19d   : > { %v928_v54 = vpop.eup %927  ;;  %711 = vst.msk [vmem:[%s307_s22 + $0x38] sm:$0xff] %vm703_vm3, %v926_v53 }
 0x19e   : > { %v930_v55 = vpop.eup %929  ;;  %706 = vst.msk [vmem:[%s307_s22 + $0x10] sm:$0xff] %vm703_vm3, %v928_v54 }
 0x19f   : > { %v932_v56 = vpop.eup %931  ;;  %704 = vst.msk [vmem:[%s307_s22] sm:$0xff] %vm703_vm3, %v930_v55 }
 0x1a0   : > { %v934_v24 = vpop.eup %933  ;;  %707 = vst.msk [vmem:[%s307_s22 + $0x18] sm:$0xff] %vm703_vm3, %v932_v56 }
 0x1a1   : > { %v936_v57 = vpop.eup %935  ;;  %705 = vst.msk [vmem:[%s307_s22 + $0x8] sm:$0xff] %vm703_vm3, %v934_v24 }
 0x1a2   : > { %709 = vst.msk [vmem:[%s307_s22 + $0x28] sm:$0xff] %vm703_vm3, %v936_v57 }
 0x1a3 PF: > { %s16_s19 = sadd.s32 1, %s959_s19   ;;  %s1200_s17 = smov %s955_s18 }
 0x1a4   : > { %p13_p5 = scmp.ge.s32.totalorder %s16_s19, 4   ;;  %s1201_s18 = smov %s1203_s3 }
 0x1a6   :  { %15 = sbr.rel (!%p13_p5) target bundleno = 3 (0x3), region = 69 }

</bundles_post_ra>
